<compile_context>
chip_gen: v6e
topology: v6e:2x2x1
jax: 0.10.0
libtpu: 0.0.40
codegen_flags: <defaults>
</compile_context>

<pallas_src>
import jax
import jax.numpy as jnp
from jax.experimental import pallas as pl
from jax.experimental.pallas import tpu as pltpu

DIMS = [28 * 28 * 1, 64, 128, 58, 96, 64, 10]   # true layer widths
LANE = 128
# padded widths: hidden/output features padded to the 128-lane width; the
# 784-wide input dim is left as-is (full-array sublane dim of W0).
PDIMS = [DIMS[0]] + [((d + LANE - 1) // LANE) * LANE for d in DIMS[1:]]
BN_EPS = 1e-5
GROUP = 128                      # rows per BN group (one torch call, batch=128)
N_LAYERS = len(DIMS) - 1


def mlp_kernel(*refs):
    # refs = [x_ref, (w,b,gamma,beta) * 6, out_ref]
    x_ref = refs[0]
    o_ref = refs[-1]
    param_refs = refs[1:-1]

    # First-layer matmul operand; every later h is produced directly in bf16
    # by the fused BN epilogue below (no separate per-layer cast pass).
    h = x_ref[...].astype(jnp.bfloat16)                      # (GROUP, 784)

    for i in range(N_LAYERS):
        w_ref, b_ref, g_ref, be_ref = param_refs[4 * i: 4 * i + 4]
        # Linear on the MXU: bf16 x bf16 -> f32 accumulation, + f32 bias.
        z = jnp.dot(h, w_ref[...],
                    preferred_element_type=jnp.float32) + b_ref[...]
        # ReLU
        z = jnp.maximum(z, 0.0)
        # BatchNorm1d (training mode, biased variance) folded into a single
        # scale/shift pass.  Padded lanes: z==0 -> mu=var=0 -> shift==0, so
        # they stay exactly zero through every layer.
        mu = jnp.mean(z, axis=0, keepdims=True)              # (1, F)
        ez2 = jnp.mean(z * z, axis=0, keepdims=True)         # (1, F)
        var = jnp.maximum(ez2 - mu * mu, 0.0)                # clamp cancellation
        scale = g_ref[...] * jax.lax.rsqrt(var + BN_EPS)     # (1, F)
        shift = be_ref[...] - mu * scale                     # (1, F)
        hf = z * scale + shift                               # f32, one VPU pass
        # Fused downcast for the next matmul; keep the final layer in f32
        # for the softmax.
        h = hf.astype(jnp.bfloat16) if i < N_LAYERS - 1 else hf

    # Softmax over the 10 real classes; padded lanes masked out.  Exact divide
    # (denominator is a (GROUP,1) vector) so rows sum to 1 to f32 precision.
    lane_id = jax.lax.broadcasted_iota(jnp.int32, h.shape, 1)
    h = jnp.where(lane_id < DIMS[-1], h, jnp.float32(-1e30))
    m = jnp.max(h, axis=1, keepdims=True)
    e = jnp.exp(h - m)
    s = jnp.sum(e, axis=1, keepdims=True)
    o_ref[...] = e / s                       # lane-dense (GROUP, 128) store


@jax.jit
def mlp_forward(x, params):
    """x: (n_groups*GROUP, 784).  Each GROUP-row slab is an independent BN
    group (exactly one torch forward call with batch_size=GROUP)."""
    B = x.shape[0]
    assert B % GROUP == 0, "batch must be a multiple of the BN group size"
    n_groups = B // GROUP
    f_out_pad = params[-1][0].shape[1]

    flat_inputs = [x]
    for (w, b, g, be) in params:
        flat_inputs += [w, b, g, be]

    # x / out tiled on the group axis; parameters get constant index_maps so
    # they are fetched once and stay VMEM-resident across grid steps.
    x_spec = pl.BlockSpec((GROUP, x.shape[1]), lambda g: (g, 0))
    out_spec = pl.BlockSpec((GROUP, f_out_pad), lambda g: (g, 0))
    param_specs = []
    for (w, b, g_, be) in params:
        param_specs += [pl.BlockSpec(w.shape, lambda g: (0, 0)),
                        pl.BlockSpec(b.shape, lambda g: (0, 0)),
                        pl.BlockSpec(g_.shape, lambda g: (0, 0)),
                        pl.BlockSpec(be.shape, lambda g: (0, 0))]

    flops = 2 * B * sum(p[0].shape[0] * p[0].shape[1] for p in params)
    bytes_accessed = (
        x.size * jnp.dtype(x.dtype).itemsize
        + sum(a.size * jnp.dtype(a.dtype).itemsize for p in params for a in p)
        + B * f_out_pad * 4
    )
    transcendentals = B * f_out_pad + n_groups * N_LAYERS * f_out_pad  # exp+rsqrt

    out = pl.pallas_call(
        mlp_kernel,
        out_shape=jax.ShapeDtypeStruct((B, f_out_pad), jnp.float32),
        grid=(n_groups,),
        in_specs=[x_spec] + param_specs,
        out_specs=out_spec,
        compiler_params=pltpu.CompilerParams(
            # Groups are independent -> shard across TensorCores on v7x
            # (no effect on v5e/v6e single-TC chips).
            dimension_semantics=("parallel",),
        ),
        cost_estimate=pl.CostEstimate(
            flops=flops,
            transcendentals=transcendentals,
            bytes_accessed=bytes_accessed,
        ),
    )(*flat_inputs)
    # final lane-padded slab sliced to the 10 real classes in the wrapper
    return out[:, :DIMS[-1]]


def init_params(key):
    """PyTorch-default init, stored lane-padded.
    Linear: W,b ~ U(-1/sqrt(fan_in), 1/sqrt(fan_in)); BatchNorm1d: gamma=1,
    beta=0.  Weights stored as (in_pad, out_pad) bf16 (zero-padded);
    bias/gamma/beta f32 as (1, out_pad)."""
    params = []
    for i in range(len(DIMS) - 1):
        fin, fout = DIMS[i], DIMS[i + 1]
        pin, pout = PDIMS[i], PDIMS[i + 1]
        key, kw, kb = jax.random.split(key, 3)
        bound = 1.0 / (float(fin) ** 0.5)
        w = jax.random.uniform(kw, (fin, fout), jnp.float32, -bound, bound)
        b = jax.random.uniform(kb, (fout,), jnp.float32, -bound, bound)
        wp = jnp.zeros((pin, pout), jnp.float32).at[:fin, :fout].set(w)
        wp = wp.astype(jnp.bfloat16)
        bp = jnp.zeros((1, pout), jnp.float32).at[0, :fout].set(b)
        gp = jnp.ones((1, pout), jnp.float32)
        bep = jnp.zeros((1, pout), jnp.float32)
        params.append((wp, bp, gp, bep))
    return params


def validate_params(params):
    """Pad-lane invariants the kernel relies on (checked at load time):
    zero-padded W rows/cols, zero bias/beta in the pad region, gamma pad
    lanes finite (kept at 1)."""
    for i, (w, b, g, be) in enumerate(params):
        fin, fout = DIMS[i], DIMS[i + 1]
        assert bool(jnp.all(w[fin:, :] == 0)), f"layer {i}: W pad rows nonzero"
        assert bool(jnp.all(w[:, fout:] == 0)), f"layer {i}: W pad cols nonzero"
        assert bool(jnp.all(b[0, fout:] == 0)), f"layer {i}: bias pad nonzero"
        assert bool(jnp.all(be[0, fout:] == 0)), f"layer {i}: beta pad nonzero"
        assert bool(jnp.all(jnp.isfinite(g))), f"layer {i}: gamma not finite"


def reference_forward_group(xg, params):
    """Pure-JAX reference for ONE BN group on the true (unpadded) dims:
    same bf16 matmul inputs with f32 accumulation, two-pass BN variance,
    exact softmax."""
    h = xg.astype(jnp.bfloat16)
    for i, (w, b, g, be) in enumerate(params):
        fin, fout = DIMS[i], DIMS[i + 1]
        z = jnp.dot(h, w[:fin, :fout],
                    preferred_element_type=jnp.float32) + b[0, :fout]
        z = jnp.maximum(z, 0.0)
        mu = jnp.mean(z, axis=0, keepdims=True)
        var = jnp.mean(jnp.square(z - mu), axis=0, keepdims=True)
        hf = (z - mu) * jax.lax.rsqrt(var + BN_EPS) * g[0, :fout] + be[0, :fout]
        h = hf.astype(jnp.bfloat16) if i < len(params) - 1 else hf
    return jax.nn.softmax(h, axis=1)


if __name__ == "__main__":
    key = jax.random.PRNGKey(0)
    key, kx = jax.random.split(key)

    # Two independent 128-row BN groups -> exercises the grid, weight
    # residency, x double-buffering, and the "parallel" axis on v7x.
    n_groups = 2
    B = n_groups * GROUP
    x = jax.random.normal(kx, (B, DIMS[0]), jnp.float32)

    params = init_params(jax.random.PRNGKey(0))
    validate_params(params)

    out = jax.block_until_ready(mlp_forward(x, params))

    ref = jnp.concatenate(
        [reference_forward_group(x[g * GROUP:(g + 1) * GROUP], params)
         for g in range(n_groups)], axis=0)

    assert out.shape == (B, DIMS[-1])
    # bf16 matmuls + one-pass (clamped) variance => slightly loose tolerance
    assert jnp.allclose(out, ref, atol=5e-3, rtol=1e-2)
    # exact softmax divide -> rows sum to 1 at f32 precision
    assert jnp.allclose(jnp.sum(out, axis=1), jnp.ones((B,)), atol=1e-4)

    print("KERNEL_OK")
</pallas_src>

<mosaic_0001>
module attributes {stable_mosaic.version = 11 : i64} {
  func.func @mlp_kernel(%arg0: i32, %arg1: memref<128x784xf32, #tpu.memory_space<vmem>>, %arg2: memref<784x128xbf16, #tpu.memory_space<vmem>>, %arg3: memref<1x128xf32, #tpu.memory_space<vmem>>, %arg4: memref<1x128xf32, #tpu.memory_space<vmem>>, %arg5: memref<1x128xf32, #tpu.memory_space<vmem>>, %arg6: memref<128x128xbf16, #tpu.memory_space<vmem>>, %arg7: memref<1x128xf32, #tpu.memory_space<vmem>>, %arg8: memref<1x128xf32, #tpu.memory_space<vmem>>, %arg9: memref<1x128xf32, #tpu.memory_space<vmem>>, %arg10: memref<128x128xbf16, #tpu.memory_space<vmem>>, %arg11: memref<1x128xf32, #tpu.memory_space<vmem>>, %arg12: memref<1x128xf32, #tpu.memory_space<vmem>>, %arg13: memref<1x128xf32, #tpu.memory_space<vmem>>, %arg14: memref<128x128xbf16, #tpu.memory_space<vmem>>, %arg15: memref<1x128xf32, #tpu.memory_space<vmem>>, %arg16: memref<1x128xf32, #tpu.memory_space<vmem>>, %arg17: memref<1x128xf32, #tpu.memory_space<vmem>>, %arg18: memref<128x128xbf16, #tpu.memory_space<vmem>>, %arg19: memref<1x128xf32, #tpu.memory_space<vmem>>, %arg20: memref<1x128xf32, #tpu.memory_space<vmem>>, %arg21: memref<1x128xf32, #tpu.memory_space<vmem>>, %arg22: memref<128x128xbf16, #tpu.memory_space<vmem>>, %arg23: memref<1x128xf32, #tpu.memory_space<vmem>>, %arg24: memref<1x128xf32, #tpu.memory_space<vmem>>, %arg25: memref<1x128xf32, #tpu.memory_space<vmem>>, %arg26: memref<128x128xf32, #tpu.memory_space<vmem>>) attributes {dimension_semantics = [#tpu.dimension_semantics<parallel>], iteration_bounds = array<i64: 2>, scalar_prefetch = 0 : i64, scratch_operands = 0 : i64, tpu.core_type = #tpu.core_type<tc>, window_params = [{transform_indices = @transform_0, window_bounds = array<i64: 128, 784>}, {pipeline_mode = #tpu.pipeline_mode<synchronous>, transform_indices = @transform_1, window_bounds = array<i64: 784, 128>}, {pipeline_mode = #tpu.pipeline_mode<synchronous>, transform_indices = @transform_2, window_bounds = array<i64: 1, 128>}, {pipeline_mode = #tpu.pipeline_mode<synchronous>, transform_indices = @transform_3, window_bounds = array<i64: 1, 128>}, {pipeline_mode = #tpu.pipeline_mode<synchronous>, transform_indices = @transform_4, window_bounds = array<i64: 1, 128>}, {pipeline_mode = #tpu.pipeline_mode<synchronous>, transform_indices = @transform_5, window_bounds = array<i64: 128, 128>}, {pipeline_mode = #tpu.pipeline_mode<synchronous>, transform_indices = @transform_6, window_bounds = array<i64: 1, 128>}, {pipeline_mode = #tpu.pipeline_mode<synchronous>, transform_indices = @transform_7, window_bounds = array<i64: 1, 128>}, {pipeline_mode = #tpu.pipeline_mode<synchronous>, transform_indices = @transform_8, window_bounds = array<i64: 1, 128>}, {pipeline_mode = #tpu.pipeline_mode<synchronous>, transform_indices = @transform_9, window_bounds = array<i64: 128, 128>}, {pipeline_mode = #tpu.pipeline_mode<synchronous>, transform_indices = @transform_10, window_bounds = array<i64: 1, 128>}, {pipeline_mode = #tpu.pipeline_mode<synchronous>, transform_indices = @transform_11, window_bounds = array<i64: 1, 128>}, {pipeline_mode = #tpu.pipeline_mode<synchronous>, transform_indices = @transform_12, window_bounds = array<i64: 1, 128>}, {pipeline_mode = #tpu.pipeline_mode<synchronous>, transform_indices = @transform_13, window_bounds = array<i64: 128, 128>}, {pipeline_mode = #tpu.pipeline_mode<synchronous>, transform_indices = @transform_14, window_bounds = array<i64: 1, 128>}, {pipeline_mode = #tpu.pipeline_mode<synchronous>, transform_indices = @transform_15, window_bounds = array<i64: 1, 128>}, {pipeline_mode = #tpu.pipeline_mode<synchronous>, transform_indices = @transform_16, window_bounds = array<i64: 1, 128>}, {pipeline_mode = #tpu.pipeline_mode<synchronous>, transform_indices = @transform_17, window_bounds = array<i64: 128, 128>}, {pipeline_mode = #tpu.pipeline_mode<synchronous>, transform_indices = @transform_18, window_bounds = array<i64: 1, 128>}, {pipeline_mode = #tpu.pipeline_mode<synchronous>, transform_indices = @transform_19, window_bounds = array<i64: 1, 128>}, {pipeline_mode = #tpu.pipeline_mode<synchronous>, transform_indices = @transform_20, window_bounds = array<i64: 1, 128>}, {pipeline_mode = #tpu.pipeline_mode<synchronous>, transform_indices = @transform_21, window_bounds = array<i64: 128, 128>}, {pipeline_mode = #tpu.pipeline_mode<synchronous>, transform_indices = @transform_22, window_bounds = array<i64: 1, 128>}, {pipeline_mode = #tpu.pipeline_mode<synchronous>, transform_indices = @transform_23, window_bounds = array<i64: 1, 128>}, {pipeline_mode = #tpu.pipeline_mode<synchronous>, transform_indices = @transform_24, window_bounds = array<i64: 1, 128>}, {transform_indices = @transform_25, window_bounds = array<i64: 128, 128>}]} {
    %c0 = arith.constant 0 : index
    %c0_0 = arith.constant 0 : index
    %0 = vector.load %arg1[%c0, %c0_0] : memref<128x784xf32, #tpu.memory_space<vmem>>, vector<128x784xf32>
    %1 = arith.truncf %0 : vector<128x784xf32> to vector<128x784xbf16>
    %c0_1 = arith.constant 0 : index
    %c0_2 = arith.constant 0 : index
    %2 = vector.load %arg2[%c0_1, %c0_2] : memref<784x128xbf16, #tpu.memory_space<vmem>>, vector<784x128xbf16>
    %cst = arith.constant dense<0.000000e+00> : vector<128x128xf32>
    %3 = tpu.matmul %1, %2, %cst {dimension_numbers = #tpu.dot_dimension_numbers<[1], [0], [0], [1], [0, 0, 1, 1], [], []>} : vector<128x784xbf16>, vector<784x128xbf16>, vector<128x128xf32> -> vector<128x128xf32>
    %c0_3 = arith.constant 0 : index
    %c0_4 = arith.constant 0 : index
    %4 = vector.load %arg3[%c0_3, %c0_4] : memref<1x128xf32, #tpu.memory_space<vmem>>, vector<1x128xf32>
    %5 = vector.broadcast %4 : vector<1x128xf32> to vector<128x128xf32>
    %6 = arith.addf %3, %5 : vector<128x128xf32>
    %cst_5 = arith.constant 0.000000e+00 : f32
    %7 = vector.broadcast %cst_5 : f32 to vector<128x128xf32>
    %8 = arith.maximumf %6, %7 : vector<128x128xf32>
    %cst_6 = arith.constant dense<0.000000e+00> : vector<128xf32>
    %9 = vector.multi_reduction <add>, %8, %cst_6 [0] : vector<128x128xf32> to vector<128xf32>
    %10 = vector.shape_cast %9 : vector<128xf32> to vector<1x128xf32>
    %cst_7 = arith.constant 1.280000e+02 : f32
    %11 = vector.broadcast %cst_7 : f32 to vector<1x128xf32>
    %12 = arith.divf %10, %11 : vector<1x128xf32>
    %13 = arith.mulf %8, %8 : vector<128x128xf32>
    %cst_8 = arith.constant dense<0.000000e+00> : vector<128xf32>
    %14 = vector.multi_reduction <add>, %13, %cst_8 [0] : vector<128x128xf32> to vector<128xf32>
    %15 = vector.shape_cast %14 : vector<128xf32> to vector<1x128xf32>
    %cst_9 = arith.constant 1.280000e+02 : f32
    %16 = vector.broadcast %cst_9 : f32 to vector<1x128xf32>
    %17 = arith.divf %15, %16 : vector<1x128xf32>
    %18 = arith.mulf %12, %12 : vector<1x128xf32>
    %19 = arith.subf %17, %18 : vector<1x128xf32>
    %cst_10 = arith.constant 0.000000e+00 : f32
    %20 = vector.broadcast %cst_10 : f32 to vector<1x128xf32>
    %21 = arith.maximumf %19, %20 : vector<1x128xf32>
    %c0_11 = arith.constant 0 : index
    %c0_12 = arith.constant 0 : index
    %22 = vector.load %arg4[%c0_11, %c0_12] : memref<1x128xf32, #tpu.memory_space<vmem>>, vector<1x128xf32>
    %cst_13 = arith.constant 9.99999974E-6 : f32
    %23 = vector.broadcast %cst_13 : f32 to vector<1x128xf32>
    %24 = arith.addf %21, %23 : vector<1x128xf32>
    %25 = math.rsqrt %24 : vector<1x128xf32>
    %26 = arith.mulf %22, %25 : vector<1x128xf32>
    %c0_14 = arith.constant 0 : index
    %c0_15 = arith.constant 0 : index
    %27 = vector.load %arg5[%c0_14, %c0_15] : memref<1x128xf32, #tpu.memory_space<vmem>>, vector<1x128xf32>
    %28 = arith.mulf %12, %26 : vector<1x128xf32>
    %29 = arith.subf %27, %28 : vector<1x128xf32>
    %30 = vector.broadcast %26 : vector<1x128xf32> to vector<128x128xf32>
    %31 = arith.mulf %8, %30 : vector<128x128xf32>
    %32 = vector.broadcast %29 : vector<1x128xf32> to vector<128x128xf32>
    %33 = arith.addf %31, %32 : vector<128x128xf32>
    %34 = arith.truncf %33 : vector<128x128xf32> to vector<128x128xbf16>
    %c0_16 = arith.constant 0 : index
    %c0_17 = arith.constant 0 : index
    %35 = vector.load %arg6[%c0_16, %c0_17] : memref<128x128xbf16, #tpu.memory_space<vmem>>, vector<128x128xbf16>
    %cst_18 = arith.constant dense<0.000000e+00> : vector<128x128xf32>
    %36 = tpu.matmul %34, %35, %cst_18 {dimension_numbers = #tpu.dot_dimension_numbers<[1], [0], [0], [1], [0, 0, 1, 1], [], []>} : vector<128x128xbf16>, vector<128x128xbf16>, vector<128x128xf32> -> vector<128x128xf32>
    %c0_19 = arith.constant 0 : index
    %c0_20 = arith.constant 0 : index
    %37 = vector.load %arg7[%c0_19, %c0_20] : memref<1x128xf32, #tpu.memory_space<vmem>>, vector<1x128xf32>
    %38 = vector.broadcast %37 : vector<1x128xf32> to vector<128x128xf32>
    %39 = arith.addf %36, %38 : vector<128x128xf32>
    %cst_21 = arith.constant 0.000000e+00 : f32
    %40 = vector.broadcast %cst_21 : f32 to vector<128x128xf32>
    %41 = arith.maximumf %39, %40 : vector<128x128xf32>
    %cst_22 = arith.constant dense<0.000000e+00> : vector<128xf32>
    %42 = vector.multi_reduction <add>, %41, %cst_22 [0] : vector<128x128xf32> to vector<128xf32>
    %43 = vector.shape_cast %42 : vector<128xf32> to vector<1x128xf32>
    %cst_23 = arith.constant 1.280000e+02 : f32
    %44 = vector.broadcast %cst_23 : f32 to vector<1x128xf32>
    %45 = arith.divf %43, %44 : vector<1x128xf32>
    %46 = arith.mulf %41, %41 : vector<128x128xf32>
    %cst_24 = arith.constant dense<0.000000e+00> : vector<128xf32>
    %47 = vector.multi_reduction <add>, %46, %cst_24 [0] : vector<128x128xf32> to vector<128xf32>
    %48 = vector.shape_cast %47 : vector<128xf32> to vector<1x128xf32>
    %cst_25 = arith.constant 1.280000e+02 : f32
    %49 = vector.broadcast %cst_25 : f32 to vector<1x128xf32>
    %50 = arith.divf %48, %49 : vector<1x128xf32>
    %51 = arith.mulf %45, %45 : vector<1x128xf32>
    %52 = arith.subf %50, %51 : vector<1x128xf32>
    %cst_26 = arith.constant 0.000000e+00 : f32
    %53 = vector.broadcast %cst_26 : f32 to vector<1x128xf32>
    %54 = arith.maximumf %52, %53 : vector<1x128xf32>
    %c0_27 = arith.constant 0 : index
    %c0_28 = arith.constant 0 : index
    %55 = vector.load %arg8[%c0_27, %c0_28] : memref<1x128xf32, #tpu.memory_space<vmem>>, vector<1x128xf32>
    %cst_29 = arith.constant 9.99999974E-6 : f32
    %56 = vector.broadcast %cst_29 : f32 to vector<1x128xf32>
    %57 = arith.addf %54, %56 : vector<1x128xf32>
    %58 = math.rsqrt %57 : vector<1x128xf32>
    %59 = arith.mulf %55, %58 : vector<1x128xf32>
    %c0_30 = arith.constant 0 : index
    %c0_31 = arith.constant 0 : index
    %60 = vector.load %arg9[%c0_30, %c0_31] : memref<1x128xf32, #tpu.memory_space<vmem>>, vector<1x128xf32>
    %61 = arith.mulf %45, %59 : vector<1x128xf32>
    %62 = arith.subf %60, %61 : vector<1x128xf32>
    %63 = vector.broadcast %59 : vector<1x128xf32> to vector<128x128xf32>
    %64 = arith.mulf %41, %63 : vector<128x128xf32>
    %65 = vector.broadcast %62 : vector<1x128xf32> to vector<128x128xf32>
    %66 = arith.addf %64, %65 : vector<128x128xf32>
    %67 = arith.truncf %66 : vector<128x128xf32> to vector<128x128xbf16>
    %c0_32 = arith.constant 0 : index
    %c0_33 = arith.constant 0 : index
    %68 = vector.load %arg10[%c0_32, %c0_33] : memref<128x128xbf16, #tpu.memory_space<vmem>>, vector<128x128xbf16>
    %cst_34 = arith.constant dense<0.000000e+00> : vector<128x128xf32>
    %69 = tpu.matmul %67, %68, %cst_34 {dimension_numbers = #tpu.dot_dimension_numbers<[1], [0], [0], [1], [0, 0, 1, 1], [], []>} : vector<128x128xbf16>, vector<128x128xbf16>, vector<128x128xf32> -> vector<128x128xf32>
    %c0_35 = arith.constant 0 : index
    %c0_36 = arith.constant 0 : index
    %70 = vector.load %arg11[%c0_35, %c0_36] : memref<1x128xf32, #tpu.memory_space<vmem>>, vector<1x128xf32>
    %71 = vector.broadcast %70 : vector<1x128xf32> to vector<128x128xf32>
    %72 = arith.addf %69, %71 : vector<128x128xf32>
    %cst_37 = arith.constant 0.000000e+00 : f32
    %73 = vector.broadcast %cst_37 : f32 to vector<128x128xf32>
    %74 = arith.maximumf %72, %73 : vector<128x128xf32>
    %cst_38 = arith.constant dense<0.000000e+00> : vector<128xf32>
    %75 = vector.multi_reduction <add>, %74, %cst_38 [0] : vector<128x128xf32> to vector<128xf32>
    %76 = vector.shape_cast %75 : vector<128xf32> to vector<1x128xf32>
    %cst_39 = arith.constant 1.280000e+02 : f32
    %77 = vector.broadcast %cst_39 : f32 to vector<1x128xf32>
    %78 = arith.divf %76, %77 : vector<1x128xf32>
    %79 = arith.mulf %74, %74 : vector<128x128xf32>
    %cst_40 = arith.constant dense<0.000000e+00> : vector<128xf32>
    %80 = vector.multi_reduction <add>, %79, %cst_40 [0] : vector<128x128xf32> to vector<128xf32>
    %81 = vector.shape_cast %80 : vector<128xf32> to vector<1x128xf32>
    %cst_41 = arith.constant 1.280000e+02 : f32
    %82 = vector.broadcast %cst_41 : f32 to vector<1x128xf32>
    %83 = arith.divf %81, %82 : vector<1x128xf32>
    %84 = arith.mulf %78, %78 : vector<1x128xf32>
    %85 = arith.subf %83, %84 : vector<1x128xf32>
    %cst_42 = arith.constant 0.000000e+00 : f32
    %86 = vector.broadcast %cst_42 : f32 to vector<1x128xf32>
    %87 = arith.maximumf %85, %86 : vector<1x128xf32>
    %c0_43 = arith.constant 0 : index
    %c0_44 = arith.constant 0 : index
    %88 = vector.load %arg12[%c0_43, %c0_44] : memref<1x128xf32, #tpu.memory_space<vmem>>, vector<1x128xf32>
    %cst_45 = arith.constant 9.99999974E-6 : f32
    %89 = vector.broadcast %cst_45 : f32 to vector<1x128xf32>
    %90 = arith.addf %87, %89 : vector<1x128xf32>
    %91 = math.rsqrt %90 : vector<1x128xf32>
    %92 = arith.mulf %88, %91 : vector<1x128xf32>
    %c0_46 = arith.constant 0 : index
    %c0_47 = arith.constant 0 : index
    %93 = vector.load %arg13[%c0_46, %c0_47] : memref<1x128xf32, #tpu.memory_space<vmem>>, vector<1x128xf32>
    %94 = arith.mulf %78, %92 : vector<1x128xf32>
    %95 = arith.subf %93, %94 : vector<1x128xf32>
    %96 = vector.broadcast %92 : vector<1x128xf32> to vector<128x128xf32>
    %97 = arith.mulf %74, %96 : vector<128x128xf32>
    %98 = vector.broadcast %95 : vector<1x128xf32> to vector<128x128xf32>
    %99 = arith.addf %97, %98 : vector<128x128xf32>
    %100 = arith.truncf %99 : vector<128x128xf32> to vector<128x128xbf16>
    %c0_48 = arith.constant 0 : index
    %c0_49 = arith.constant 0 : index
    %101 = vector.load %arg14[%c0_48, %c0_49] : memref<128x128xbf16, #tpu.memory_space<vmem>>, vector<128x128xbf16>
    %cst_50 = arith.constant dense<0.000000e+00> : vector<128x128xf32>
    %102 = tpu.matmul %100, %101, %cst_50 {dimension_numbers = #tpu.dot_dimension_numbers<[1], [0], [0], [1], [0, 0, 1, 1], [], []>} : vector<128x128xbf16>, vector<128x128xbf16>, vector<128x128xf32> -> vector<128x128xf32>
    %c0_51 = arith.constant 0 : index
    %c0_52 = arith.constant 0 : index
    %103 = vector.load %arg15[%c0_51, %c0_52] : memref<1x128xf32, #tpu.memory_space<vmem>>, vector<1x128xf32>
    %104 = vector.broadcast %103 : vector<1x128xf32> to vector<128x128xf32>
    %105 = arith.addf %102, %104 : vector<128x128xf32>
    %cst_53 = arith.constant 0.000000e+00 : f32
    %106 = vector.broadcast %cst_53 : f32 to vector<128x128xf32>
    %107 = arith.maximumf %105, %106 : vector<128x128xf32>
    %cst_54 = arith.constant dense<0.000000e+00> : vector<128xf32>
    %108 = vector.multi_reduction <add>, %107, %cst_54 [0] : vector<128x128xf32> to vector<128xf32>
    %109 = vector.shape_cast %108 : vector<128xf32> to vector<1x128xf32>
    %cst_55 = arith.constant 1.280000e+02 : f32
    %110 = vector.broadcast %cst_55 : f32 to vector<1x128xf32>
    %111 = arith.divf %109, %110 : vector<1x128xf32>
    %112 = arith.mulf %107, %107 : vector<128x128xf32>
    %cst_56 = arith.constant dense<0.000000e+00> : vector<128xf32>
    %113 = vector.multi_reduction <add>, %112, %cst_56 [0] : vector<128x128xf32> to vector<128xf32>
    %114 = vector.shape_cast %113 : vector<128xf32> to vector<1x128xf32>
    %cst_57 = arith.constant 1.280000e+02 : f32
    %115 = vector.broadcast %cst_57 : f32 to vector<1x128xf32>
    %116 = arith.divf %114, %115 : vector<1x128xf32>
    %117 = arith.mulf %111, %111 : vector<1x128xf32>
    %118 = arith.subf %116, %117 : vector<1x128xf32>
    %cst_58 = arith.constant 0.000000e+00 : f32
    %119 = vector.broadcast %cst_58 : f32 to vector<1x128xf32>
    %120 = arith.maximumf %118, %119 : vector<1x128xf32>
    %c0_59 = arith.constant 0 : index
    %c0_60 = arith.constant 0 : index
    %121 = vector.load %arg16[%c0_59, %c0_60] : memref<1x128xf32, #tpu.memory_space<vmem>>, vector<1x128xf32>
    %cst_61 = arith.constant 9.99999974E-6 : f32
    %122 = vector.broadcast %cst_61 : f32 to vector<1x128xf32>
    %123 = arith.addf %120, %122 : vector<1x128xf32>
    %124 = math.rsqrt %123 : vector<1x128xf32>
    %125 = arith.mulf %121, %124 : vector<1x128xf32>
    %c0_62 = arith.constant 0 : index
    %c0_63 = arith.constant 0 : index
    %126 = vector.load %arg17[%c0_62, %c0_63] : memref<1x128xf32, #tpu.memory_space<vmem>>, vector<1x128xf32>
    %127 = arith.mulf %111, %125 : vector<1x128xf32>
    %128 = arith.subf %126, %127 : vector<1x128xf32>
    %129 = vector.broadcast %125 : vector<1x128xf32> to vector<128x128xf32>
    %130 = arith.mulf %107, %129 : vector<128x128xf32>
    %131 = vector.broadcast %128 : vector<1x128xf32> to vector<128x128xf32>
    %132 = arith.addf %130, %131 : vector<128x128xf32>
    %133 = arith.truncf %132 : vector<128x128xf32> to vector<128x128xbf16>
    %c0_64 = arith.constant 0 : index
    %c0_65 = arith.constant 0 : index
    %134 = vector.load %arg18[%c0_64, %c0_65] : memref<128x128xbf16, #tpu.memory_space<vmem>>, vector<128x128xbf16>
    %cst_66 = arith.constant dense<0.000000e+00> : vector<128x128xf32>
    %135 = tpu.matmul %133, %134, %cst_66 {dimension_numbers = #tpu.dot_dimension_numbers<[1], [0], [0], [1], [0, 0, 1, 1], [], []>} : vector<128x128xbf16>, vector<128x128xbf16>, vector<128x128xf32> -> vector<128x128xf32>
    %c0_67 = arith.constant 0 : index
    %c0_68 = arith.constant 0 : index
    %136 = vector.load %arg19[%c0_67, %c0_68] : memref<1x128xf32, #tpu.memory_space<vmem>>, vector<1x128xf32>
    %137 = vector.broadcast %136 : vector<1x128xf32> to vector<128x128xf32>
    %138 = arith.addf %135, %137 : vector<128x128xf32>
    %cst_69 = arith.constant 0.000000e+00 : f32
    %139 = vector.broadcast %cst_69 : f32 to vector<128x128xf32>
    %140 = arith.maximumf %138, %139 : vector<128x128xf32>
    %cst_70 = arith.constant dense<0.000000e+00> : vector<128xf32>
    %141 = vector.multi_reduction <add>, %140, %cst_70 [0] : vector<128x128xf32> to vector<128xf32>
    %142 = vector.shape_cast %141 : vector<128xf32> to vector<1x128xf32>
    %cst_71 = arith.constant 1.280000e+02 : f32
    %143 = vector.broadcast %cst_71 : f32 to vector<1x128xf32>
    %144 = arith.divf %142, %143 : vector<1x128xf32>
    %145 = arith.mulf %140, %140 : vector<128x128xf32>
    %cst_72 = arith.constant dense<0.000000e+00> : vector<128xf32>
    %146 = vector.multi_reduction <add>, %145, %cst_72 [0] : vector<128x128xf32> to vector<128xf32>
    %147 = vector.shape_cast %146 : vector<128xf32> to vector<1x128xf32>
    %cst_73 = arith.constant 1.280000e+02 : f32
    %148 = vector.broadcast %cst_73 : f32 to vector<1x128xf32>
    %149 = arith.divf %147, %148 : vector<1x128xf32>
    %150 = arith.mulf %144, %144 : vector<1x128xf32>
    %151 = arith.subf %149, %150 : vector<1x128xf32>
    %cst_74 = arith.constant 0.000000e+00 : f32
    %152 = vector.broadcast %cst_74 : f32 to vector<1x128xf32>
    %153 = arith.maximumf %151, %152 : vector<1x128xf32>
    %c0_75 = arith.constant 0 : index
    %c0_76 = arith.constant 0 : index
    %154 = vector.load %arg20[%c0_75, %c0_76] : memref<1x128xf32, #tpu.memory_space<vmem>>, vector<1x128xf32>
    %cst_77 = arith.constant 9.99999974E-6 : f32
    %155 = vector.broadcast %cst_77 : f32 to vector<1x128xf32>
    %156 = arith.addf %153, %155 : vector<1x128xf32>
    %157 = math.rsqrt %156 : vector<1x128xf32>
    %158 = arith.mulf %154, %157 : vector<1x128xf32>
    %c0_78 = arith.constant 0 : index
    %c0_79 = arith.constant 0 : index
    %159 = vector.load %arg21[%c0_78, %c0_79] : memref<1x128xf32, #tpu.memory_space<vmem>>, vector<1x128xf32>
    %160 = arith.mulf %144, %158 : vector<1x128xf32>
    %161 = arith.subf %159, %160 : vector<1x128xf32>
    %162 = vector.broadcast %158 : vector<1x128xf32> to vector<128x128xf32>
    %163 = arith.mulf %140, %162 : vector<128x128xf32>
    %164 = vector.broadcast %161 : vector<1x128xf32> to vector<128x128xf32>
    %165 = arith.addf %163, %164 : vector<128x128xf32>
    %166 = arith.truncf %165 : vector<128x128xf32> to vector<128x128xbf16>
    %c0_80 = arith.constant 0 : index
    %c0_81 = arith.constant 0 : index
    %167 = vector.load %arg22[%c0_80, %c0_81] : memref<128x128xbf16, #tpu.memory_space<vmem>>, vector<128x128xbf16>
    %cst_82 = arith.constant dense<0.000000e+00> : vector<128x128xf32>
    %168 = tpu.matmul %166, %167, %cst_82 {dimension_numbers = #tpu.dot_dimension_numbers<[1], [0], [0], [1], [0, 0, 1, 1], [], []>} : vector<128x128xbf16>, vector<128x128xbf16>, vector<128x128xf32> -> vector<128x128xf32>
    %c0_83 = arith.constant 0 : index
    %c0_84 = arith.constant 0 : index
    %169 = vector.load %arg23[%c0_83, %c0_84] : memref<1x128xf32, #tpu.memory_space<vmem>>, vector<1x128xf32>
    %170 = vector.broadcast %169 : vector<1x128xf32> to vector<128x128xf32>
    %171 = arith.addf %168, %170 : vector<128x128xf32>
    %cst_85 = arith.constant 0.000000e+00 : f32
    %172 = vector.broadcast %cst_85 : f32 to vector<128x128xf32>
    %173 = arith.maximumf %171, %172 : vector<128x128xf32>
    %cst_86 = arith.constant dense<0.000000e+00> : vector<128xf32>
    %174 = vector.multi_reduction <add>, %173, %cst_86 [0] : vector<128x128xf32> to vector<128xf32>
    %175 = vector.shape_cast %174 : vector<128xf32> to vector<1x128xf32>
    %cst_87 = arith.constant 1.280000e+02 : f32
    %176 = vector.broadcast %cst_87 : f32 to vector<1x128xf32>
    %177 = arith.divf %175, %176 : vector<1x128xf32>
    %178 = arith.mulf %173, %173 : vector<128x128xf32>
    %cst_88 = arith.constant dense<0.000000e+00> : vector<128xf32>
    %179 = vector.multi_reduction <add>, %178, %cst_88 [0] : vector<128x128xf32> to vector<128xf32>
    %180 = vector.shape_cast %179 : vector<128xf32> to vector<1x128xf32>
    %cst_89 = arith.constant 1.280000e+02 : f32
    %181 = vector.broadcast %cst_89 : f32 to vector<1x128xf32>
    %182 = arith.divf %180, %181 : vector<1x128xf32>
    %183 = arith.mulf %177, %177 : vector<1x128xf32>
    %184 = arith.subf %182, %183 : vector<1x128xf32>
    %cst_90 = arith.constant 0.000000e+00 : f32
    %185 = vector.broadcast %cst_90 : f32 to vector<1x128xf32>
    %186 = arith.maximumf %184, %185 : vector<1x128xf32>
    %c0_91 = arith.constant 0 : index
    %c0_92 = arith.constant 0 : index
    %187 = vector.load %arg24[%c0_91, %c0_92] : memref<1x128xf32, #tpu.memory_space<vmem>>, vector<1x128xf32>
    %cst_93 = arith.constant 9.99999974E-6 : f32
    %188 = vector.broadcast %cst_93 : f32 to vector<1x128xf32>
    %189 = arith.addf %186, %188 : vector<1x128xf32>
    %190 = math.rsqrt %189 : vector<1x128xf32>
    %191 = arith.mulf %187, %190 : vector<1x128xf32>
    %c0_94 = arith.constant 0 : index
    %c0_95 = arith.constant 0 : index
    %192 = vector.load %arg25[%c0_94, %c0_95] : memref<1x128xf32, #tpu.memory_space<vmem>>, vector<1x128xf32>
    %193 = arith.mulf %177, %191 : vector<1x128xf32>
    %194 = arith.subf %192, %193 : vector<1x128xf32>
    %195 = vector.broadcast %191 : vector<1x128xf32> to vector<128x128xf32>
    %196 = arith.mulf %173, %195 : vector<128x128xf32>
    %197 = vector.broadcast %194 : vector<1x128xf32> to vector<128x128xf32>
    %198 = arith.addf %196, %197 : vector<128x128xf32>
    %199 = tpu.iota {dimensions = array<i32: 1>} : vector<128x128xi32>
    %c10_i32 = arith.constant 10 : i32
    %200 = vector.broadcast %c10_i32 : i32 to vector<128x128xi32>
    %201 = arith.cmpi slt, %199, %200 : vector<128x128xi32>
    %cst_96 = arith.constant -1.000000e+30 : f32
    %202 = vector.broadcast %cst_96 : f32 to vector<128x128xf32>
    %203 = arith.select %201, %198, %202 : vector<128x128xi1>, vector<128x128xf32>
    %cst_97 = arith.constant dense<0xFF800000> : vector<128xf32>
    %204 = vector.multi_reduction <maximumf>, %203, %cst_97 [1] : vector<128x128xf32> to vector<128xf32>
    %205 = vector.shape_cast %204 : vector<128xf32> to vector<128x1xf32>
    %206 = vector.broadcast %205 : vector<128x1xf32> to vector<128x128xf32>
    %207 = arith.subf %203, %206 : vector<128x128xf32>
    %208 = math.exp %207 : vector<128x128xf32>
    %cst_98 = arith.constant dense<0.000000e+00> : vector<128xf32>
    %209 = vector.multi_reduction <add>, %208, %cst_98 [1] : vector<128x128xf32> to vector<128xf32>
    %210 = vector.shape_cast %209 : vector<128xf32> to vector<128x1xf32>
    %211 = vector.broadcast %210 : vector<128x1xf32> to vector<128x128xf32>
    %212 = arith.divf %208, %211 : vector<128x128xf32>
    %c0_99 = arith.constant 0 : index
    %c0_100 = arith.constant 0 : index
    %213 = vector.load %arg26[%c0_99, %c0_100] : memref<128x128xf32, #tpu.memory_space<vmem>>, vector<128x128xf32>
    tpu.vector_store %arg26[%c0_99, %c0_100], %212 {strides = array<i32>} : memref<128x128xf32, #tpu.memory_space<vmem>>, vector<128x128xf32>,
    return
  }
  func.func @transform_0(%arg0: i32) -> (i32, i32) {
    %c0_i32 = arith.constant 0 : i32
    %c0_i32_0 = arith.constant 0 : i32
    return %arg0, %c0_i32 : i32, i32
  }
  func.func @transform_1(%arg0: i32) -> (i32, i32) {
    %c0_i32 = arith.constant 0 : i32
    %c0_i32_0 = arith.constant 0 : i32
    %c0_i32_1 = arith.constant 0 : i32
    return %c0_i32, %c0_i32_0 : i32, i32
  }
  func.func @transform_2(%arg0: i32) -> (i32, i32) {
    %c0_i32 = arith.constant 0 : i32
    %c0_i32_0 = arith.constant 0 : i32
    %c0_i32_1 = arith.constant 0 : i32
    return %c0_i32, %c0_i32_0 : i32, i32
  }
  func.func @transform_3(%arg0: i32) -> (i32, i32) {
    %c0_i32 = arith.constant 0 : i32
    %c0_i32_0 = arith.constant 0 : i32
    %c0_i32_1 = arith.constant 0 : i32
    return %c0_i32, %c0_i32_0 : i32, i32
  }
  func.func @transform_4(%arg0: i32) -> (i32, i32) {
    %c0_i32 = arith.constant 0 : i32
    %c0_i32_0 = arith.constant 0 : i32
    %c0_i32_1 = arith.constant 0 : i32
    return %c0_i32, %c0_i32_0 : i32, i32
  }
  func.func @transform_5(%arg0: i32) -> (i32, i32) {
    %c0_i32 = arith.constant 0 : i32
    %c0_i32_0 = arith.constant 0 : i32
    %c0_i32_1 = arith.constant 0 : i32
    return %c0_i32, %c0_i32_0 : i32, i32
  }
  func.func @transform_6(%arg0: i32) -> (i32, i32) {
    %c0_i32 = arith.constant 0 : i32
    %c0_i32_0 = arith.constant 0 : i32
    %c0_i32_1 = arith.constant 0 : i32
    return %c0_i32, %c0_i32_0 : i32, i32
  }
  func.func @transform_7(%arg0: i32) -> (i32, i32) {
    %c0_i32 = arith.constant 0 : i32
    %c0_i32_0 = arith.constant 0 : i32
    %c0_i32_1 = arith.constant 0 : i32
    return %c0_i32, %c0_i32_0 : i32, i32
  }
  func.func @transform_8(%arg0: i32) -> (i32, i32) {
    %c0_i32 = arith.constant 0 : i32
    %c0_i32_0 = arith.constant 0 : i32
    %c0_i32_1 = arith.constant 0 : i32
    return %c0_i32, %c0_i32_0 : i32, i32
  }
  func.func @transform_9(%arg0: i32) -> (i32, i32) {
    %c0_i32 = arith.constant 0 : i32
    %c0_i32_0 = arith.constant 0 : i32
    %c0_i32_1 = arith.constant 0 : i32
    return %c0_i32, %c0_i32_0 : i32, i32
  }
  func.func @transform_10(%arg0: i32) -> (i32, i32) {
    %c0_i32 = arith.constant 0 : i32
    %c0_i32_0 = arith.constant 0 : i32
    %c0_i32_1 = arith.constant 0 : i32
    return %c0_i32, %c0_i32_0 : i32, i32
  }
  func.func @transform_11(%arg0: i32) -> (i32, i32) {
    %c0_i32 = arith.constant 0 : i32
    %c0_i32_0 = arith.constant 0 : i32
    %c0_i32_1 = arith.constant 0 : i32
    return %c0_i32, %c0_i32_0 : i32, i32
  }
  func.func @transform_12(%arg0: i32) -> (i32, i32) {
    %c0_i32 = arith.constant 0 : i32
    %c0_i32_0 = arith.constant 0 : i32
    %c0_i32_1 = arith.constant 0 : i32
    return %c0_i32, %c0_i32_0 : i32, i32
  }
  func.func @transform_13(%arg0: i32) -> (i32, i32) {
    %c0_i32 = arith.constant 0 : i32
    %c0_i32_0 = arith.constant 0 : i32
    %c0_i32_1 = arith.constant 0 : i32
    return %c0_i32, %c0_i32_0 : i32, i32
  }
  func.func @transform_14(%arg0: i32) -> (i32, i32) {
    %c0_i32 = arith.constant 0 : i32
    %c0_i32_0 = arith.constant 0 : i32
    %c0_i32_1 = arith.constant 0 : i32
    return %c0_i32, %c0_i32_0 : i32, i32
  }
  func.func @transform_15(%arg0: i32) -> (i32, i32) {
    %c0_i32 = arith.constant 0 : i32
    %c0_i32_0 = arith.constant 0 : i32
    %c0_i32_1 = arith.constant 0 : i32
    return %c0_i32, %c0_i32_0 : i32, i32
  }
  func.func @transform_16(%arg0: i32) -> (i32, i32) {
    %c0_i32 = arith.constant 0 : i32
    %c0_i32_0 = arith.constant 0 : i32
    %c0_i32_1 = arith.constant 0 : i32
    return %c0_i32, %c0_i32_0 : i32, i32
  }
  func.func @transform_17(%arg0: i32) -> (i32, i32) {
    %c0_i32 = arith.constant 0 : i32
    %c0_i32_0 = arith.constant 0 : i32
    %c0_i32_1 = arith.constant 0 : i32
    return %c0_i32, %c0_i32_0 : i32, i32
  }
  func.func @transform_18(%arg0: i32) -> (i32, i32) {
    %c0_i32 = arith.constant 0 : i32
    %c0_i32_0 = arith.constant 0 : i32
    %c0_i32_1 = arith.constant 0 : i32
    return %c0_i32, %c0_i32_0 : i32, i32
  }
  func.func @transform_19(%arg0: i32) -> (i32, i32) {
    %c0_i32 = arith.constant 0 : i32
    %c0_i32_0 = arith.constant 0 : i32
    %c0_i32_1 = arith.constant 0 : i32
    return %c0_i32, %c0_i32_0 : i32, i32
  }
  func.func @transform_20(%arg0: i32) -> (i32, i32) {
    %c0_i32 = arith.constant 0 : i32
    %c0_i32_0 = arith.constant 0 : i32
    %c0_i32_1 = arith.constant 0 : i32
    return %c0_i32, %c0_i32_0 : i32, i32
  }
  func.func @transform_21(%arg0: i32) -> (i32, i32) {
    %c0_i32 = arith.constant 0 : i32
    %c0_i32_0 = arith.constant 0 : i32
    %c0_i32_1 = arith.constant 0 : i32
    return %c0_i32, %c0_i32_0 : i32, i32
  }
  func.func @transform_22(%arg0: i32) -> (i32, i32) {
    %c0_i32 = arith.constant 0 : i32
    %c0_i32_0 = arith.constant 0 : i32
    %c0_i32_1 = arith.constant 0 : i32
    return %c0_i32, %c0_i32_0 : i32, i32
  }
  func.func @transform_23(%arg0: i32) -> (i32, i32) {
    %c0_i32 = arith.constant 0 : i32
    %c0_i32_0 = arith.constant 0 : i32
    %c0_i32_1 = arith.constant 0 : i32
    return %c0_i32, %c0_i32_0 : i32, i32
  }
  func.func @transform_24(%arg0: i32) -> (i32, i32) {
    %c0_i32 = arith.constant 0 : i32
    %c0_i32_0 = arith.constant 0 : i32
    %c0_i32_1 = arith.constant 0 : i32
    return %c0_i32, %c0_i32_0 : i32, i32
  }
  func.func @transform_25(%arg0: i32) -> (i32, i32) {
    %c0_i32 = arith.constant 0 : i32
    %c0_i32_0 = arith.constant 0 : i32
    return %arg0, %c0_i32 : i32, i32
  }
}

</mosaic_0001>

<bundles_post_ra>
// kernel: mlp_forward.1
= control target key start
LH: loop header
LB: loop body
LE: loop exit
PB: predicated region body
PF: predicated region fallthrough
CT: control target
= control target key end

     0   :  { %s4533_s29 = smov 0   ;;  %s5983_s0 = inlined_call_operand.vmem [shape: f32[256,784], index: 0, kind: input, shape index: {}]   ;;  %s5984_s1 = inlined_call_operand.vmem [shape: bf16[784,128], index: 1, kind: input, shape index: {}]   ;;  %s5985_s2 = inlined_call_operand.vmem [shape: f32[1,128], index: 2, kind: input, shape index: {}]   ;;  %s5986_s3 = inlined_call_operand.vmem [shape: f32[1,128], index: 3, kind: input, shape index: {}]   ;;  %s5987_s4 = inlined_call_operand.vmem [shape: f32[1,128], index: 4, kind: input, shape index: {}]   ;;  %s5988_s5 = inlined_call_operand.vmem [shape: bf16[128,128], index: 5, kind: input, shape index: {}]   ;;  %s5989_s6 = inlined_call_operand.vmem [shape: f32[1,128], index: 6, kind: input, shape index: {}]   ;;  %s5990_s7 = inlined_call_operand.vmem [shape: f32[1,128], index: 7, kind: input, shape index: {}]   ;;  %s5991_s8 = inlined_call_operand.vmem [shape: f32[1,128], index: 8, kind: input, shape index: {}]   ;;  %s5992_s9 = inlined_call_operand.vmem [shape: bf16[128,128], index: 9, kind: input, shape index: {}]   ;;  %s5993_s10 = inlined_call_operand.vmem [shape: f32[1,128], index: 10, kind: input, shape index: {}]   ;;  %s5994_s11 = inlined_call_operand.vmem [shape: f32[1,128], index: 11, kind: input, shape index: {}]   ;;  %s5995_s12 = inlined_call_operand.vmem [shape: f32[1,128], index: 12, kind: input, shape index: {}]   ;;  %s5996_s13 = inlined_call_operand.vmem [shape: bf16[128,128], index: 13, kind: input, shape index: {}]   ;;  %s5997_s14 = inlined_call_operand.vmem [shape: f32[1,128], index: 14, kind: input, shape index: {}]   ;;  %s5998_s15 = inlined_call_operand.vmem [shape: f32[1,128], index: 15, kind: input, shape index: {}]   ;;  %s5999_s16 = inlined_call_operand.vmem [shape: f32[1,128], index: 16, kind: input, shape index: {}]   ;;  %s6000_s17 = inlined_call_operand.vmem [shape: bf16[128,128], index: 17, kind: input, shape index: {}]   ;;  %s6001_s18 = inlined_call_operand.vmem [shape: f32[1,128], index: 18, kind: input, shape index: {}]   ;;  %s6002_s19 = inlined_call_operand.vmem [shape: f32[1,128], index: 19, kind: input, shape index: {}]   ;;  %s6003_s20 = inlined_call_operand.vmem [shape: f32[1,128], index: 20, kind: input, shape index: {}]   ;;  %s6004_s21 = inlined_call_operand.vmem [shape: bf16[128,128], index: 21, kind: input, shape index: {}]   ;;  %s6005_s22 = inlined_call_operand.vmem [shape: f32[1,128], index: 22, kind: input, shape index: {}]   ;;  %s6006_s23 = inlined_call_operand.vmem [shape: f32[1,128], index: 23, kind: input, shape index: {}]   ;;  %s6007_s24 = inlined_call_operand.vmem [shape: f32[1,128], index: 24, kind: input, shape index: {}]   ;;  %s6008_s25 = inlined_call_operand.vmem [shape: f32[256,128], index: 25, kind: output, shape index: {}]  }
   0x1   :  { %6012 = sst [smem:[#allocation12_spill]] %s5983_s0 }
   0x2   :  { %6013 = sst [smem:[#allocation13_spill]] %s5984_s1 }
   0x3   :  { %6014 = sst [smem:[#allocation14_spill]] %s5985_s2 }
   0x4   :  { %6015 = sst [smem:[#allocation15_spill]] %s5986_s3 }
   0x5   :  { %6016 = sst [smem:[#allocation16_spill]] %s5987_s4 }
   0x6   :  { %6017 = sst [smem:[#allocation17_spill]] %s5988_s5 }
   0x7   :  { %6018 = sst [smem:[#allocation18_spill]] %s5989_s6 }
   0x8   :  { %6019 = sst [smem:[#allocation19_spill]] %s5990_s7 }
   0x9   :  { %6020 = sst [smem:[#allocation20_spill]] %s5991_s8 }
   0xa   :  { %6021 = sst [smem:[#allocation21_spill]] %s5992_s9 }
   0xb LB: > { %s3648_s2 = sadd.s32 4294967295, %s4401_s29   ;;  %p3652_p0 = scmp.ge.s32.totalorder %s4401_s29, 1  ;;  %s4401_s29 = sphi %s4533_s29, %s35_s29  }
   0xc   : > { %p689_p1 = scmp.lt.s32.totalorder %s4401_s29, 3 }
   0xe   : > { %p690_p2 = pnand %p3652_p0, %p689_p1 }
  0x10   : > { %693 = sbr.rel (%p690_p2) target bundleno = 2189 (0x88d), region = 120 }
  0x15   : > { %s6022_s7 = sld [smem:[#allocation13_spill]]  ;;  %s3653_s1 = sshll.u32 %s3648_s2, 4  ;;  %vm1339_vm0 = vcmask 130048  }
  0x16   : > { %p759_p3 = scmp.lt.s32.totalorder %s3653_s1, 31  ;;  %s6023_s30 = sld [smem:[#allocation12_spill]] }
  0x17   : > { %s6024_s2 = sld [smem:[#allocation14_spill]] }
  0x18   : > { %s6053_s1 = smov (!%p759_p3, %s3653_s1), 31  ;;  %s6025_s8 = sld [smem:[#allocation17_spill]] }
  0x19   : > { %s4221_s3 = smul.u32 56, %s6053_s1  ;;  %s6046_s5 = sld [smem:[#allocation15_spill]] }
  0x1a   : > { %s6048_s27 = sld [smem:[#allocation21_spill]]  ;;  %s3656_s0 = sshll.u32 %s6053_s1, 3 }
  0x1b   : > { %v4230_v0 = vld [vmem:[%s6022_s7 + $0x78] sm:$0xff]   ;;  %v4234_v4 = vld [vmem:[%s6022_s7 + $0x70] sm:$0xff]   ;;  %v4238_v8 = vld [vmem:[%s6022_s7 + $0x68] sm:$0xff]   ;;  %s6049_s6 = sld [smem:[#allocation18_spill]] }
  0x1c   : > { %v4231_v1 = vld [vmem:[%s6022_s7 + $0x38] sm:$0xff]   ;;  %3762 = vmatprep.subr.bf16.mxu0 %v4230_v0  ;;  %v4235_v5 = vld [vmem:[%s6022_s7 + $0x30] sm:$0xff]   ;;  %v4239_v9 = vld [vmem:[%s6022_s7 + $0x28] sm:$0xff]   ;;  %s4636_s26 = scalar_lea.vmem %s6023_s30, %s4221_s3  ;;  %s6050_s30 = sld [smem:[#allocation19_spill]] }
  0x1d   : > { %v4232_v2 = vld [vmem:[%s6022_s7 + $0xf8] sm:$0xff]   ;;  %3763 = vmatpush3.bf16.msra.mxu0 %v4231_v1  ;;  %v4236_v6 = vld [vmem:[%s6022_s7 + $0xf0] sm:$0xff]   ;;  %v4240_v10 = vld [vmem:[%s6022_s7 + $0xe8] sm:$0xff]   ;;  %s6051_s3 = sld [smem:[#allocation20_spill]] }
  0x1e   : > { %v4233_v3 = vld [vmem:[%s6022_s7 + $0xb8] sm:$0xff]   ;;  %3826 = vmatprep.subr.bf16.mxu1 %v4232_v2  ;;  %3764 = vmatprep.subr.bf16.mxu0 %v4234_v4  ;;  %v4237_v7 = vld [vmem:[%s6022_s7 + $0xb0] sm:$0xff]   ;;  %v4241_v11 = vld [vmem:[%s6022_s7 + $0xa8] sm:$0xff]  }
  0x1f   : > { %3827 = vmatpush3.bf16.msra.mxu1 %v4233_v3  ;;  %v4242_v12 = vld [vmem:[%s6022_s7 + $0x60] sm:$0xff]   ;;  %v4246_v16 = vld [vmem:[%s6022_s7 + $0x58] sm:$0xff]   ;;  %v4250_v20 = vld [vmem:[%s6022_s7 + $0x50] sm:$0xff]  }
  0x20   : > { %3828 = vmatprep.subr.bf16.mxu1 %v4236_v6  ;;  %v4243_v13 = vld [vmem:[%s6022_s7 + $0x20] sm:$0xff]   ;;  %v4247_v17 = vld [vmem:[%s6022_s7 + $0x18] sm:$0xff]   ;;  %v4251_v21 = vld [vmem:[%s6022_s7 + $0x10] sm:$0xff]  }
  0x21   : > { %3765 = vmatpush3.bf16.msra.mxu0 %v4235_v5  ;;  %v4244_v14 = vld [vmem:[%s6022_s7 + $0xe0] sm:$0xff]   ;;  %v4248_v18 = vld [vmem:[%s6022_s7 + $0xd8] sm:$0xff]   ;;  %v4252_v22 = vld [vmem:[%s6022_s7 + $0xd0] sm:$0xff]  }
  0x22   : > { %3766 = vmatprep.subr.bf16.mxu0 %v4238_v8  ;;  %v4245_v15 = vld [vmem:[%s6022_s7 + $0xa0] sm:$0xff]   ;;  %v4249_v19 = vld [vmem:[%s6022_s7 + $0x98] sm:$0xff]   ;;  %v4253_v23 = vld [vmem:[%s6022_s7 + $0x90] sm:$0xff]  }
  0x23   : > { %3829 = vmatpush3.bf16.msra.mxu1 %v4237_v7  ;;  %v4254_v24 = vld [vmem:[%s6022_s7 + $0x48] sm:$0xff]   ;;  %v4258_v28 = vld [vmem:[%s6022_s7 + $0x40] sm:$0xff]   ;;  %v779_v36 = vld [vmem:[%s4636_s26 + $0x38] sm:$0xff] }
  0x24   : > { %3830 = vmatprep.subr.bf16.mxu1 %v4240_v10  ;;  %v4255_v25 = vld [vmem:[%s6022_s7 + $0x8] sm:$0xff]   ;;  %v4259_v29 = vld [vmem:[%s6022_s7] sm:$0xff]   ;;  %v4262_v38 = vld [vmem:[%s6022_s7 + $0x178] sm:$0xff]  }
  0x25   : > { %3767 = vmatpush3.bf16.msra.mxu0 %v4239_v9  ;;  %v4256_v26 = vld [vmem:[%s6022_s7 + $0xc8] sm:$0xff]   ;;  %v4260_v30 = vld [vmem:[%s6022_s7 + $0xc0] sm:$0xff]   ;;  %v775_v39 = vld [vmem:[%s4636_s26 + $0x18] sm:$0xff] }
  0x26   : > { %3768 = vmatprep.subr.bf16.mxu0 %v4242_v12  ;;  %v4257_v27 = vld [vmem:[%s6022_s7 + $0x88] sm:$0xff]   ;;  %v780_v32 = vld [vmem:[%s4636_s26 + $0x40] sm:$0xff]  ;;  %v782_v40 = vld [vmem:[%s4636_s26 + $0x50] sm:$0xff] }
  0x27   : > { %3831 = vmatpush3.bf16.msra.mxu1 %v4241_v11  ;;  %v773_v31 = vld [vmem:[%s4636_s26 + $0x8] sm:$0xff]  ;;  %v4261_v34 = vld [vmem:[%s6022_s7 + $0x80] sm:$0xff]   ;;  %v887_v41 = vpack.c.bf16 %v782_v40, %v775_v39  ;;  %v4263_v42 = vld [vmem:[%s6022_s7 + $0x138] sm:$0xff]  }
  0x28   : > { %3832 = vmatprep.subr.bf16.mxu1 %v4244_v14  ;;  %v885_v33 = vpack.c.bf16 %v780_v32, %v773_v31  ;;  %v772_v35 = vld [vmem:[%s4636_s26] sm:$0xff]  ;;  %v774_v43 = vld [vmem:[%s4636_s26 + $0x10] sm:$0xff]  ;;  %v781_v44 = vld [vmem:[%s4636_s26 + $0x48] sm:$0xff] }
  0x29   : > { %3769 = vmatpush3.bf16.msra.mxu0 %v4243_v13  ;;  %v884_v37 = vpack.c.bf16 %v779_v36, %v772_v35  ;;  %v787_v45 = vld [vmem:[%s4636_s26 + $0x78] sm:$0xff]  ;;  %1493 = vmatprep.mubr.bf16.mxu1 %v887_v41  ;;  %v886_v46 = vpack.c.bf16 %v781_v44, %v774_v43  ;;  %v794_v47 = vld [vmem:[%s4636_s26 + $0xb0] sm:$0xff]  ;;  %v793_v49 = vld [vmem:[%s4636_s26 + $0xa8] sm:$0xff] }
  0x2a   : > { %3770 = vmatprep.subr.bf16.mxu0 %v4246_v16  ;;  %1396 = vmatprep.mubr.bf16.mxu0 %v885_v33  ;;  %v786_v48 = vld [vmem:[%s4636_s26 + $0x70] sm:$0xff]  ;;  %v892_v50 = vpack.c.bf16 %v794_v47, %v787_v45  ;;  %v789_v52 = vld [vmem:[%s4636_s26 + $0x88] sm:$0xff]  ;;  %v796_v53 = vld [vmem:[%s4636_s26 + $0xc0] sm:$0xff] }
  0x2b   : > { %3833 = vmatpush3.bf16.msra.mxu1 %v4245_v15  ;;  %v4264_v51 = vld [vmem:[%s6022_s7 + $0x170] sm:$0xff]   ;;  %v891_v54 = vpack.c.bf16 %v793_v49, %v786_v48  ;;  %v894_v55 = vpack.c.bf16 %v796_v53, %v789_v52  ;;  %v788_v57 = vld [vmem:[%s4636_s26 + $0x80] sm:$0xff]  ;;  %v795_v58 = vld [vmem:[%s4636_s26 + $0xb8] sm:$0xff] }
  0x2c   : > { %3834 = vmatprep.subr.bf16.mxu1 %v4248_v18  ;;  %v4265_v56 = vld [vmem:[%s6022_s7 + $0x130] sm:$0xff]   ;;  %v801_v59 = vld [vmem:[%s4636_s26 + $0xe8] sm:$0xff]  ;;  %v808_v60 = vld [vmem:[%s4636_s26 + $0x120] sm:$0xff]  ;;  %v893_v62 = vpack.c.bf16 %v795_v58, %v788_v57 }
  0x2d   : > { %3771 = vmatpush3.bf16.msra.mxu0 %v4247_v17  ;;  %v899_v61 = vpack.c.bf16 %v808_v60, %v801_v59  ;;  %v4266_v63 = vld [vmem:[%s6022_s7 + $0x168] sm:$0xff]   ;;  %v803_v0 = vld [vmem:[%s4636_s26 + $0xf8] sm:$0xff]  ;;  %v810_v1 = vld [vmem:[%s4636_s26 + $0x130] sm:$0xff] }
  0x2e   : > { %3772 = vmatprep.subr.bf16.mxu0 %v4250_v20  ;;  %v800_v2 = vld [vmem:[%s4636_s26 + $0xe0] sm:$0xff]  ;;  %v807_v3 = vld [vmem:[%s4636_s26 + $0x118] sm:$0xff]  ;;  %v901_v4 = vpack.c.bf16 %v810_v1, %v803_v0  ;;  %v4267_v5 = vld [vmem:[%s6022_s7 + $0x128] sm:$0xff]  }
  0x2f   : > { %3835 = vmatpush3.bf16.msra.mxu1 %v4249_v19  ;;  %v802_v6 = vld [vmem:[%s4636_s26 + $0xf0] sm:$0xff]  ;;  %v815_v7 = vld [vmem:[%s4636_s26 + $0x158] sm:$0xff]  ;;  %v809_v9 = vld [vmem:[%s4636_s26 + $0x128] sm:$0xff]  ;;  %v898_v10 = vpack.c.bf16 %v807_v3, %v800_v2 }
  0x30   : > { %3836 = vmatprep.subr.bf16.mxu1 %v4252_v22  ;;  %v822_v8 = vld [vmem:[%s4636_s26 + $0x190] sm:$0xff]  ;;  %v4268_v11 = vld [vmem:[%s6022_s7 + $0x160] sm:$0xff]   ;;  %v817_v12 = vld [vmem:[%s4636_s26 + $0x168] sm:$0xff]  ;;  %v900_v16 = vpack.c.bf16 %v809_v9, %v802_v6 }
  0x31   : > { %3773 = vmatpush3.bf16.msra.mxu0 %v4251_v21  ;;  %v824_v13 = vld [vmem:[%s4636_s26 + $0x1a0] sm:$0xff]  ;;  %v906_v14 = vpack.c.bf16 %v822_v8, %v815_v7  ;;  %v814_v17 = vld [vmem:[%s4636_s26 + $0x150] sm:$0xff]  ;;  %v821_v18 = vld [vmem:[%s4636_s26 + $0x188] sm:$0xff] }
  0x32   : > { %3774 = vmatprep.subr.bf16.mxu0 %v4254_v24  ;;  %v4269_v15 = vld [vmem:[%s6022_s7 + $0x120] sm:$0xff]   ;;  %v908_v19 = vpack.c.bf16 %v824_v13, %v817_v12  ;;  %v4270_v20 = vld [vmem:[%s6022_s7 + $0x158] sm:$0xff]   ;;  %v829_v22 = vld [vmem:[%s4636_s26 + $0x1c8] sm:$0xff] }
  0x33   : > { %3837 = vmatpush3.bf16.msra.mxu1 %v4253_v23  ;;  %v4271_v21 = vld [vmem:[%s6022_s7 + $0x180] sm:$0xff]   ;;  %v4272_v24 = vld [vmem:[%s6022_s7 + $0x118] sm:$0xff]   ;;  %v4273_v31 = vld [vmem:[%s6022_s7 + $0x150] sm:$0xff]  }
  0x34   : > { %3838 = vmatprep.subr.bf16.mxu1 %v4256_v26  ;;  %v836_v23 = vld [vmem:[%s4636_s26 + $0x200] sm:$0xff]  ;;  %v835_v36 = vld [vmem:[%s4636_s26 + $0x1f8] sm:$0xff]  ;;  %v830_v39 = vld [vmem:[%s4636_s26 + $0x1d0] sm:$0xff] }
  0x35   : > { %3775 = vmatpush3.bf16.msra.mxu0 %v4255_v25  ;;  %v905_v25 = vpack.c.bf16 %v821_v18, %v814_v17  ;;  %v816_v26 = vld [vmem:[%s4636_s26 + $0x160] sm:$0xff]  ;;  %v837_v40 = vld [vmem:[%s4636_s26 + $0x208] sm:$0xff]  ;;  %v842_v49 = vld [vmem:[%s4636_s26 + $0x230] sm:$0xff] }
  0x36   : > { %3776 = vmatprep.subr.bf16.mxu0 %v4258_v28  ;;  %v913_v28 = vpack.c.bf16 %v836_v23, %v829_v22  ;;  %v828_v35 = vld [vmem:[%s4636_s26 + $0x1c0] sm:$0xff]  ;;  %v4275_v41 = vld [vmem:[%s6022_s7 + $0x148] sm:$0xff]   ;;  %v914_v47 = vpack.c.bf16 %v837_v40, %v830_v39  ;;  %v851_v57 = vld [vmem:[%s4636_s26 + $0x278] sm:$0xff] }
  0x37   : > { %3839 = vmatpush3.bf16.msra.mxu1 %v4257_v27  ;;  %v823_v27 = vld [vmem:[%s4636_s26 + $0x198] sm:$0xff]  ;;  %v4276_v43 = vld [vmem:[%s6022_s7 + $0x108] sm:$0xff]   ;;  %v4277_v48 = vld [vmem:[%s6022_s7 + $0x140] sm:$0xff]  }
  0x38   : > { %3840 = vmatprep.subr.bf16.mxu1 %v4260_v30  ;;  %v838_v30 = vld [vmem:[%s4636_s26 + $0x210] sm:$0xff]  ;;  %v907_v32 = vpack.c.bf16 %v823_v27, %v816_v26  ;;  %v845_v45 = vld [vmem:[%s4636_s26 + $0x248] sm:$0xff]  ;;  %v4278_v52 = vld [vmem:[%s6022_s7 + $0x100] sm:$0xff]  }
  0x39   : > { %3777 = vmatpush3.bf16.msra.mxu0 %v4259_v29  ;;  %v831_v29 = vld [vmem:[%s4636_s26 + $0x1d8] sm:$0xff]  ;;  %v857_v53 = vld [vmem:[%s4636_s26 + $0x2a8] sm:$0xff]  ;;  %v866_v60 = vld [vmem:[%s4636_s26 + $0x2f0] sm:$0xff] }
  0x3a   : > { %3890 = vmatprep.subr.bf16.mxu0 %v4262_v38  ;;  %v915_v33 = vpack.c.bf16 %v838_v30, %v831_v29  ;;  %v850_v38 = vld [vmem:[%s4636_s26 + $0x270] sm:$0xff]  ;;  %v859_v59 = vld [vmem:[%s4636_s26 + $0x2b8] sm:$0xff]  ;;  %v873_v7 = vld [vmem:[%s4636_s26 + $0x328] sm:$0xff] }
  0x3b   : > { %3841 = vmatpush3.bf16.msra.mxu1 %v4261_v34  ;;  %v4274_v34 = vld [vmem:[%s6022_s7 + $0x110] sm:$0xff]   ;;  %v863_v0 = vld [vmem:[%s4636_s26 + $0x2d8] sm:$0xff]  ;;  %v880_v8 = vld [vmem:[%s4636_s26 + $0x360] sm:$0xff] }
  0x3c   : > { %1397 = vmatmul.mubr.bf16.vlgmr.msra.gmra.mxu0 %v884_v37  ;;  %4043 = vmatprep.subr.bf16.mxu1 %v4271_v21  ;;  %v843_v37 = vld [vmem:[%s4636_s26 + $0x238] sm:$0xff]  ;;  %v878_v2 = vld [vmem:[%s4636_s26 + $0x350] sm:$0xff]  ;;  %v877_v12 = vld [vmem:[%s4636_s26 + $0x348] sm:$0xff] }
  0x3d   : > { %3891 = vmatpush3.bf16.msra.mxu0 %v4263_v42  ;;  %1404 = vmatprep.mubr.bf16.mxu0 %v892_v50  ;;  %v912_v42 = vpack.c.bf16 %v835_v36, %v828_v35  ;;  %v920_v44 = vpack.c.bf16 %v850_v38, %v843_v37  ;;  %v871_v1 = vld [vmem:[%s4636_s26 + $0x318] sm:$0xff]  ;;  %v777_v13 = vld [vmem:[%s4636_s26 + $0x28] sm:$0xff]  ;;  %v778_v17 = vld [vmem:[%s4636_s26 + $0x30] sm:$0xff] }
  0x3e   : > { %1494 = vmatmul.mubr.bf16.vlgmr.msra.gmra.mxu1 %v886_v46  ;;  %3892 = vmatprep.subr.bf16.mxu0 %v4264_v51  ;;  %v852_v46 = vld [vmem:[%s4636_s26 + $0x280] sm:$0xff]  ;;  %v849_v51 = vld [vmem:[%s4636_s26 + $0x268] sm:$0xff]  ;;  %v934_v6 = vpack.c.bf16 %v878_v2, %v871_v1  ;;  %v783_v23 = vld [vmem:[%s4636_s26 + $0x58] sm:$0xff] }
  0x3f   : > { %1501 = vmatprep.mubr.bf16.mxu1 %v894_v55  ;;  %4044 = vmatpush3.bf16.msra.mxu1 %v4271_v21  ;;  %v922_v50 = vpack.c.bf16 %v852_v46, %v845_v45  ;;  %v919_v55 = vpack.c.bf16 %v849_v51, %v842_v49  ;;  %v785_v18 = vld [vmem:[%s4636_s26 + $0x68] sm:$0xff]  ;;  %v776_v22 = vld [vmem:[%s4636_s26 + $0x20] sm:$0xff]  ;;  %v798_v26 = vld [vmem:[%s4636_s26 + $0xd0] sm:$0xff] }
  0x40   : > { %v792_v27 = vld [vmem:[%s4636_s26 + $0xa0] sm:$0xff]  ;;  %v806_v29 = vld [vmem:[%s4636_s26 + $0x110] sm:$0xff]  ;;  %v813_v30 = vld [vmem:[%s4636_s26 + $0x148] sm:$0xff] }
  0x41   : > { %3893 = vmatpush3.bf16.msra.mxu0 %v4265_v56  ;;  %v844_v56 = vld [vmem:[%s4636_s26 + $0x240] sm:$0xff]  ;;  %v797_v35 = vld [vmem:[%s4636_s26 + $0xc8] sm:$0xff]  ;;  %v904_v38 = vpack.c.bf16 %v813_v30, %v806_v29  ;;  %v827_v40 = vld [vmem:[%s4636_s26 + $0x1b8] sm:$0xff] }
  0x42   : > { %3894 = vmatprep.subr.bf16.mxu0 %v4266_v63  ;;  %v856_v63 = vld [vmem:[%s4636_s26 + $0x2a0] sm:$0xff]  ;;  %v805_v36 = vld [vmem:[%s4636_s26 + $0x108] sm:$0xff]  ;;  %v811_v46 = vld [vmem:[%s4636_s26 + $0x138] sm:$0xff] }
  0x43   : > { %v926_v3 = vpack.c.bf16 %v863_v0, %v856_v63  ;;  %v812_v37 = vld [vmem:[%s4636_s26 + $0x140] sm:$0xff]  ;;  %v826_v49 = vld [vmem:[%s4636_s26 + $0x1b0] sm:$0xff]  ;;  %v883_v1 = vld [vmem:[%s4636_s26 + $0x378] sm:$0xff] }
  0x44   : > { %1405 = vmatmul.mubr.bf16.gmra.mxu0 %v891_v54  ;;  %v864_v54 = vld [vmem:[%s4636_s26 + $0x2e0] sm:$0xff] }
  0x45   : > { %1412 = vmatprep.mubr.bf16.mxu0 %v899_v61  ;;  %3895 = vmatpush3.bf16.msra.mxu0 %v4267_v5  ;;  %v927_v58 = vpack.c.bf16 %v864_v54, %v857_v53  ;;  %v921_v61 = vpack.c.bf16 %v851_v57, %v844_v56  ;;  %v865_v5 = vld [vmem:[%s4636_s26 + $0x2e8] sm:$0xff]  ;;  %v820_v39 = vld [vmem:[%s4636_s26 + $0x180] sm:$0xff] }
  0x46   : > { %1502 = vmatmul.mubr.bf16.gmra.mxu1 %v893_v62  ;;  %3896 = vmatprep.subr.bf16.mxu0 %v4268_v11  ;;  %v929_v62 = vpack.c.bf16 %v866_v60, %v859_v59  ;;  %v870_v11 = vld [vmem:[%s4636_s26 + $0x310] sm:$0xff]  ;;  %v804_v45 = vld [vmem:[%s4636_s26 + $0x100] sm:$0xff]  ;;  %v869_v56 = vld [vmem:[%s4636_s26 + $0x308] sm:$0xff] }
  0x47   : > { %1509 = vmatprep.mubr.bf16.mxu1 %v901_v4  ;;  %v858_v4 = vld [vmem:[%s4636_s26 + $0x2b0] sm:$0xff]  ;;  %v848_v51 = vld [vmem:[%s4636_s26 + $0x260] sm:$0xff]  ;;  %v902_v53 = vpack.c.bf16 %v811_v46, %v804_v45  ;;  %v825_v60 = vld [vmem:[%s4636_s26 + $0x1a8] sm:$0xff] }
  0x48   : > { %v928_v9 = vpack.c.bf16 %v865_v5, %v858_v4  ;;  %v818_v59 = vld [vmem:[%s4636_s26 + $0x170] sm:$0xff]  ;;  %v876_v0 = vld [vmem:[%s4636_s26 + $0x340] sm:$0xff]  ;;  %v839_v5 = vld [vmem:[%s4636_s26 + $0x218] sm:$0xff] }
  0x49   : > { %3897 = vmatpush3.bf16.msra.mxu0 %v4269_v15  ;;  %v879_v15 = vld [vmem:[%s4636_s26 + $0x358] sm:$0xff]  ;;  %v909_v63 = vpack.c.bf16 %v825_v60, %v818_v59  ;;  %v832_v4 = vld [vmem:[%s4636_s26 + $0x1e0] sm:$0xff] }
  0x4a   : > { %3898 = vmatprep.subr.bf16.mxu0 %v4270_v20  ;;  %v4279_v60 = vld [vmem:[%s6025_s8 + $0x38] sm:$0xff]  }
  0x4b   : > { %4061 = vmatprep.subr.bf16.mxu1 %v4279_v60 }
  0x4c   : > { %1413 = vmatmul.mubr.bf16.gmra.mxu0 %v898_v10  ;;  %v936_v10 = vpack.c.bf16 %v880_v8, %v873_v7  ;;  %v854_v7 = vld [vmem:[%s4636_s26 + $0x290] sm:$0xff]  ;;  %v916_v8 = vpack.c.bf16 %v839_v5, %v832_v4 }
  0x4d   : > { %1420 = vmatprep.mubr.bf16.mxu0 %v906_v14  ;;  %3899 = vmatpush3.bf16.msra.mxu0 %v4272_v24  ;;  %v872_v14 = vld [vmem:[%s4636_s26 + $0x320] sm:$0xff]  ;;  %v890_v24 = vpack.c.bf16 %v785_v18, %v778_v17  ;;  %v867_v17 = vld [vmem:[%s4636_s26 + $0x2f8] sm:$0xff] }
  0x4e   : > { %1510 = vmatmul.mubr.bf16.gmra.mxu1 %v900_v16  ;;  %3900 = vmatprep.subr.bf16.mxu0 %v4273_v31  ;;  %v784_v16 = vld [vmem:[%s4636_s26 + $0x60] sm:$0xff]  ;;  %v935_v21 = vpack.c.bf16 %v879_v15, %v872_v14  ;;  %v888_v31 = vpack.c.bf16 %v783_v23, %v776_v22  ;;  %v875_v18 = vld [vmem:[%s4636_s26 + $0x338] sm:$0xff]  ;;  %v874_v22 = vld [vmem:[%s4636_s26 + $0x330] sm:$0xff] }
  0x4f   : > { %1517 = vmatprep.mubr.bf16.mxu1 %v908_v19  ;;  %v933_v19 = vpack.c.bf16 %v877_v12, %v870_v11  ;;  %v889_v20 = vpack.c.bf16 %v784_v16, %v777_v13  ;;  %v853_v11 = vld [vmem:[%s4636_s26 + $0x288] sm:$0xff]  ;;  %v868_v13 = vld [vmem:[%s4636_s26 + $0x300] sm:$0xff] }
  0x50   : > { %v861_v12 = vld [vmem:[%s4636_s26 + $0x2c8] sm:$0xff]  ;;  %v860_v16 = vld [vmem:[%s4636_s26 + $0x2c0] sm:$0xff] }
  0x51   : > { %3901 = vmatpush3.bf16.msra.mxu0 %v4274_v34  ;;  %v790_v34 = vld [vmem:[%s4636_s26 + $0x90] sm:$0xff]  ;;  %v931_v15 = vpack.c.bf16 %v868_v13, %v861_v12  ;;  %v881_v23 = vld [vmem:[%s4636_s26 + $0x368] sm:$0xff] }
  0x52   : > { %3902 = vmatprep.subr.bf16.mxu0 %v4275_v41  ;;  %v834_v41 = vld [vmem:[%s4636_s26 + $0x1f0] sm:$0xff] }
  0x54   : > { %1421 = vmatmul.mubr.bf16.gmra.mxu0 %v905_v25  ;;  %v791_v25 = vld [vmem:[%s4636_s26 + $0x98] sm:$0xff] }
  0x55   : > { %1428 = vmatprep.mubr.bf16.mxu0 %v913_v28  ;;  %3903 = vmatpush3.bf16.msra.mxu0 %v4276_v43  ;;  %v799_v28 = vld [vmem:[%s4636_s26 + $0xd8] sm:$0xff]  ;;  %v895_v43 = vpack.c.bf16 %v797_v35, %v790_v34 }
  0x56   : > { %1518 = vmatmul.mubr.bf16.gmra.mxu1 %v907_v32  ;;  %3904 = vmatprep.subr.bf16.mxu0 %v4277_v48  ;;  %v896_v32 = vpack.c.bf16 %v798_v26, %v791_v25  ;;  %v819_v48 = vld [vmem:[%s4636_s26 + $0x178] sm:$0xff]  ;;  %v4821_v26 = vld [vmem:[%s6024_s2] ss:$0 sm:$0xff]  ;;  %s6047_s2 = sld [smem:[#allocation16_spill]] }
  0x57   : > { %1525 = vmatprep.mubr.bf16.mxu1 %v915_v33  ;;  %v897_v33 = vpack.c.bf16 %v799_v28, %v792_v27  ;;  %v910_v54 = vpack.c.bf16 %v826_v49, %v819_v48 }
  0x59   : > { %3905 = vmatpush3.bf16.msra.mxu0 %v4278_v52  ;;  %v855_v52 = vld [vmem:[%s4636_s26 + $0x298] sm:$0xff] }
  0x5a   : > { %v925_v57 = vpack.c.bf16 %v855_v52, %v848_v51 }
  0x5c   : > { %1429 = vmatmul.mubr.bf16.gmra.mxu0 %v912_v42  ;;  %v841_v42 = vld [vmem:[%s4636_s26 + $0x228] sm:$0xff] }
  0x5d   : > { %1436 = vmatprep.mubr.bf16.mxu0 %v920_v44  ;;  %v903_v44 = vpack.c.bf16 %v812_v37, %v805_v36 }
  0x5e   : > { %1526 = vmatmul.mubr.bf16.gmra.mxu1 %v914_v47  ;;  %v911_v47 = vpack.c.bf16 %v827_v40, %v820_v39 }
  0x5f   : > { %1533 = vmatprep.mubr.bf16.mxu1 %v922_v50  ;;  %v918_v50 = vpack.c.bf16 %v841_v42, %v834_v41 }
  0x64   : > { %1437 = vmatmul.mubr.bf16.gmra.mxu0 %v919_v55  ;;  %v862_v55 = vld [vmem:[%s4636_s26 + $0x2d0] sm:$0xff] }
  0x65   : > { %1444 = vmatprep.mubr.bf16.mxu0 %v927_v58  ;;  %v932_v58 = vpack.c.bf16 %v869_v56, %v862_v55 }
  0x66   : > { %1534 = vmatmul.mubr.bf16.gmra.mxu1 %v921_v61  ;;  %v833_v61 = vld [vmem:[%s4636_s26 + $0x1e8] sm:$0xff] }
  0x67   : > { %1541 = vmatprep.mubr.bf16.mxu1 %v929_v62  ;;  %v840_v62 = vld [vmem:[%s4636_s26 + $0x220] sm:$0xff] }
  0x68   : > { %v917_v2 = vpack.c.bf16 %v840_v62, %v833_v61 }
  0x6c   : > { %1445 = vmatmul.mubr.bf16.gmra.mxu0 %v926_v3  ;;  %v939_v3 = vpack.c.bf16 %v883_v1, %v876_v0 }
  0x6d   : > { %1452 = vmatprep.mubr.bf16.mxu0 %v934_v6  ;;  %v847_v6 = vld [vmem:[%s4636_s26 + $0x258] sm:$0xff] }
  0x6e   : > { %1542 = vmatmul.mubr.bf16.gmra.mxu1 %v928_v9  ;;  %v924_v9 = vpack.c.bf16 %v854_v7, %v847_v6 }
  0x6f   : > { %1549 = vmatprep.mubr.bf16.mxu1 %v936_v10  ;;  %v846_v10 = vld [vmem:[%s4636_s26 + $0x250] sm:$0xff] }
  0x70   : > { %v923_v14 = vpack.c.bf16 %v853_v11, %v846_v10 }
  0x74   : > { %1453 = vmatmul.mubr.bf16.gmra.mxu0 %v933_v19  ;;  %v882_v19 = vld [vmem:[%s4636_s26 + $0x370] sm:$0xff]  ;;  %s5946_s26 = scalar_lea.vmem %s6008_s25, %s3656_s0 }
  0x75   : > { %1590 = vmatprep.mubr.bf16.mxu0 %v889_v20  ;;  %v930_v20 = vpack.c.bf16 %v867_v17, %v860_v16 }
  0x76   : > { %1550 = vmatmul.mubr.bf16.gmra.mxu1 %v935_v21  ;;  %v938_v21 = vpack.c.bf16 %v882_v19, %v875_v18 }
  0x77   : > { %4045 = vmatprep.mubr.msk.bf16.mxu1 %vm1339_vm0, %v890_v24  ;;  %v937_v24 = vpack.c.bf16 %v881_v23, %v874_v22 }
  0x7c   : > { %1591 = vmatmul.mubr.bf16.vlgmr.msra.gmra.mxu0 %v888_v31 }
  0x7d   : > { %1598 = vmatprep.mubr.bf16.mxu0 %v896_v32 }
  0x7e   : > { %4046 = vmatmul.mubr.msk.bf16.vlgmr.msra.gmra.mxu1 %vm1339_vm0, %v897_v33 }
  0x7f   : > { %4049 = vmatprep.mubr.msk.bf16.mxu1 %vm1339_vm0, %v904_v38  ;;  %4062 = vmatpush3.bf16.msra.mxu1 %v4279_v60 }
  0x84   : > { %1599 = vmatmul.mubr.bf16.gmra.mxu0 %v895_v43 }
  0x85   : > { %1606 = vmatprep.mubr.bf16.mxu0 %v903_v44 }
  0x86   : > { %4050 = vmatmul.mubr.msk.bf16.gmra.mxu1 %vm1339_vm0, %v911_v47 }
  0x87   : > { %4053 = vmatprep.mubr.msk.bf16.mxu1 %vm1339_vm0, %v918_v50 }
  0x8c   : > { %1607 = vmatmul.mubr.bf16.gmra.mxu0 %v902_v53 }
  0x8d   : > { %1614 = vmatprep.mubr.bf16.mxu0 %v910_v54 }
  0x8e   : > { %4054 = vmatmul.mubr.msk.bf16.gmra.mxu1 %vm1339_vm0, %v925_v57 }
  0x8f   : > { %4057 = vmatprep.mubr.msk.bf16.mxu1 %vm1339_vm0, %v932_v58 }
  0x94   : > { %1615 = vmatmul.mubr.bf16.gmra.mxu0 %v909_v63 }
  0x95   : > { %1622 = vmatprep.mubr.bf16.mxu0 %v917_v2  ;;  %v4280_v2 = vld [vmem:[%s6025_s8 + $0x30] sm:$0xff]  }
  0x96   : > { %4058 = vmatmul.mubr.msk.bf16.gmra.mxu1 %vm1339_vm0, %v939_v3  ;;  %4063 = vmatprep.subr.bf16.mxu1 %v4280_v2 }
  0x97   : > { %4064 = vmatpush3.bf16.msra.mxu1 %v4280_v2 }
  0x9c   : > { %1623 = vmatmul.mubr.bf16.gmra.mxu0 %v916_v8  ;;  %v4281_v8 = vld [vmem:[%s6025_s8 + $0x28] sm:$0xff]  }
  0x9d   : > { %1630 = vmatprep.mubr.bf16.mxu0 %v924_v9  ;;  %4065 = vmatprep.subr.bf16.mxu1 %v4281_v8 }
  0x9e   : > { %4066 = vmatpush3.bf16.msra.mxu1 %v4281_v8 }
  0xa4   : > { %1631 = vmatmul.mubr.bf16.gmra.mxu0 %v923_v14  ;;  %v4282_v14 = vld [vmem:[%s6025_s8 + $0x20] sm:$0xff]  }
  0xa5   : > { %1638 = vmatprep.mubr.bf16.mxu0 %v931_v15  ;;  %4067 = vmatprep.subr.bf16.mxu1 %v4282_v14 }
  0xa6   : > { %4068 = vmatpush3.bf16.msra.mxu1 %v4282_v14 }
  0xac   : > { %1639 = vmatmul.mubr.bf16.gmra.mxu0 %v930_v20  ;;  %v4283_v20 = vld [vmem:[%s6025_s8 + $0x18] sm:$0xff]  }
  0xad   : > { %1646 = vmatprep.mubr.bf16.mxu0 %v938_v21  ;;  %4069 = vmatprep.subr.bf16.mxu1 %v4283_v20 }
  0xae   : > { %4070 = vmatpush3.bf16.msra.mxu1 %v4283_v20 }
  0xb4   : > { %1647 = vmatmul.mubr.bf16.gmra.mxu0 %v937_v24 }
  0xfc   : > { %v3778_v25 = vpop.f32.mrf.mxu0 }
  0xfe   : > { %v3779_v27 = vpop.f32.mrf.mxu0  ;;  %v3842_v29 = vpop.f32.mrf.mxu1 }
  0xff   : > { %v3780_v28 = vadd.f32 %v3779_v27, %v3778_v25  ;;  %v4284_v27 = vld [vmem:[%s6025_s8 + $0x10] sm:$0xff]  }
 0x100   : > { %v3781_v30 = vpop.f32.mrf.mxu0  ;;  %v3843_v32 = vpop.f32.mrf.mxu1  ;;  %4071 = vmatprep.subr.bf16.mxu1 %v4284_v27 }
 0x101   : > { %v1399_v31 = vadd.f32 %v3780_v28, %v4821_v26  ;;  %v3844_v33 = vadd.f32 %v3843_v32, %v3842_v29  ;;  %4072 = vmatpush3.bf16.msra.mxu1 %v4284_v27 }
 0x102   : > { %v3782_v34 = vpop.f32.mrf.mxu0  ;;  %v4826_v36 = vpop.f32.mrf.mxu1 }
 0x103   : > { %v4824_v35 = vadd.f32 %v3782_v34, %v3781_v30  ;;  %v4828_v37 = vadd.f32 %v3844_v33, %v1399_v31  ;;  %v4285_v33 = vld [vmem:[%s6025_s8 + $0x8] sm:$0xff]  }
 0x104   : > { %v3784_v38 = vpop.f32.mrf.mxu0  ;;  %v4830_v39 = vpop.f32.mrf.mxu1  ;;  %4073 = vmatprep.subr.bf16.mxu1 %v4285_v33 }
 0x105   : > { %4074 = vmatpush3.bf16.msra.mxu1 %v4285_v33 }
 0x106   : > { %v3785_v40 = vpop.f32.mrf.mxu0  ;;  %v4834_v42 = vpop.f32.mrf.mxu1 }
 0x107   : > { %v4832_v41 = vadd.f32 %v3785_v40, %v3784_v38 }
 0x108   : > { %v3787_v43 = vpop.f32.mrf.mxu0  ;;  %v4836_v44 = vpop.f32.mrf.mxu1 }
 0x10a   : > { %v3788_v45 = vpop.f32.mrf.mxu0  ;;  %v4840_v47 = vpop.f32.mrf.mxu1 }
 0x10b   : > { %v4838_v46 = vadd.f32 %v3788_v45, %v3787_v43  ;;  %v4286_v43 = vld [vmem:[%s6025_s8] sm:$0xff]  }
 0x10c   : > { %v3790_v48 = vpop.f32.mrf.mxu0  ;;  %v4842_v49 = vpop.f32.mrf.mxu1  ;;  %4075 = vmatprep.subr.bf16.mxu1 %v4286_v43 }
 0x10d   : > { %4076 = vmatpush3.bf16.msra.mxu1 %v4286_v43 }
 0x10e   : > { %v3791_v50 = vpop.f32.mrf.mxu0  ;;  %v4846_v52 = vpop.f32.mrf.mxu1 }
 0x10f   : > { %v4844_v51 = vadd.f32 %v3791_v50, %v3790_v48 }
 0x110   : > { %v3793_v53 = vpop.f32.mrf.mxu0  ;;  %v4848_v54 = vpop.f32.mrf.mxu1 }
 0x112   : > { %v3794_v55 = vpop.f32.mrf.mxu0  ;;  %v4852_v57 = vpop.f32.mrf.mxu1 }
 0x113   : > { %v4850_v56 = vadd.f32 %v3794_v55, %v3793_v53 }
 0x114   : > { %v3796_v58 = vpop.f32.mrf.mxu0  ;;  %v4854_v59 = vpop.f32.mrf.mxu1 }
 0x116   : > { %v3797_v61 = vpop.f32.mrf.mxu0  ;;  %v4861_v63 = vpop.f32.mrf.mxu1 }
 0x117   : > { %v4859_v62 = vadd.f32 %v3797_v61, %v3796_v58 }
 0x118   : > { %v3799_v0 = vpop.f32.mrf.mxu0  ;;  %v4863_v1 = vpop.f32.mrf.mxu1 }
 0x11a   : > { %v3800_v3 = vpop.f32.mrf.mxu0  ;;  %v4870_v5 = vpop.f32.mrf.mxu1 }
 0x11b   : > { %v4868_v4 = vadd.f32 %v3800_v3, %v3799_v0 }
 0x11c   : > { %v3802_v6 = vpop.f32.mrf.mxu0  ;;  %v4872_v7 = vpop.f32.mrf.mxu1 }
 0x11e   : > { %v3803_v9 = vpop.f32.mrf.mxu0  ;;  %v4879_v11 = vpop.f32.mrf.mxu1 }
 0x11f   : > { %v4877_v10 = vadd.f32 %v3803_v9, %v3802_v6 }
 0x120   : > { %v3805_v12 = vpop.f32.mrf.mxu0  ;;  %v4881_v13 = vpop.f32.mrf.mxu1 }
 0x122   : > { %v3806_v15 = vpop.f32.mrf.mxu0  ;;  %v4888_v17 = vpop.f32.mrf.mxu1 }
 0x123   : > { %v4886_v16 = vadd.f32 %v3806_v15, %v3805_v12 }
 0x124   : > { %v3808_v18 = vpop.f32.mrf.mxu0  ;;  %v4890_v19 = vpop.f32.mrf.mxu1 }
 0x126   : > { %v3809_v21 = vpop.f32.mrf.mxu0  ;;  %v4897_v23 = vpop.f32.mrf.mxu1 }
 0x127   : > { %v4895_v22 = vadd.f32 %v3809_v21, %v3808_v18 }
 0x128   : > { %v3811_v24 = vpop.f32.mrf.mxu0  ;;  %v4899_v25 = vpop.f32.mrf.mxu1 }
 0x12a   : > { %v3812_v28 = vpop.f32.mrf.mxu0  ;;  %v4906_v30 = vpop.f32.mrf.mxu1 }
 0x12b   : > { %v4904_v29 = vadd.f32 %v3812_v28, %v3811_v24 }
 0x12c   : > { %v3814_v31 = vpop.f32.mrf.mxu0  ;;  %v4908_v32 = vpop.f32.mrf.mxu1 }
 0x12e   : > { %v3815_v34 = vpop.f32.mrf.mxu0  ;;  %v4915_v40 = vpop.f32.mrf.mxu1 }
 0x12f   : > { %v4913_v38 = vadd.f32 %v3815_v34, %v3814_v31 }
 0x130   : > { %v3817_v45 = vpop.f32.mrf.mxu0  ;;  %v4920_v48 = vpop.f32.mrf.mxu1 }
 0x132   : > { %v3818_v50 = vpop.f32.mrf.mxu0  ;;  %v4924_v55 = vpop.f32.mrf.mxu1 }
 0x133   : > { %v4922_v53 = vadd.f32 %v3818_v50, %v3817_v45  ;;  %6026 = vst [vmem:[#allocation2_spill] sm:$0xff] %v4924_v55  ;;  %v1402_v45 = vadd.f32 %v4824_v35, %v4821_v26  ;;  %v3847_v50 = vadd.f32 %v4830_v39, %v4826_v36  ;;  %v3853_v35 = vadd.f32 %v4842_v49, %v4840_v47 }
 0x134   : > { %v4926_v58 = vpop.f32.mrf.mxu0  ;;  %v4928_v60 = vpop.f32.mrf.mxu1  ;;  %v1415_v39 = vadd.f32 %v4844_v51, %v4821_v26  ;;  %v3859_v47 = vadd.f32 %v4854_v59, %v4852_v57  ;;  %v1426_v57 = vadd.f32 %v4868_v4, %v4821_v26  ;;  %v1431_v4 = vadd.f32 %v4877_v10, %v4821_v26 }
 0x135   : > { %6027 = vst [vmem:[#allocation3_spill] sm:$0xff] %v4926_v58  ;;  %6028 = vst [vmem:[#allocation4_spill] sm:$0xff] %v4928_v60  ;;  %v1410_v58 = vadd.f32 %v4838_v46, %v4821_v26  ;;  %v1418_v46 = vadd.f32 %v4850_v56, %v4821_v26 }
 0x136   : > { %v4930_v61 = vpop.f32.mrf.mxu0  ;;  %v4932_v0 = vpop.f32.mrf.mxu1 }
 0x137   : > { %6029 = vst [vmem:[#allocation5_spill] sm:$0xff] %v4930_v61  ;;  %6030 = vst [vmem:[#allocation6_spill] sm:$0xff] %v4932_v0  ;;  %v1499_v61 = vadd.f32 %v3847_v50, %v1402_v45  ;;  %v1507_v49 = vadd.f32 %v3853_v35, %v1410_v58 }
 0x138   : > { %v4934_v2 = vpop.f32.mrf.mxu0  ;;  %v4936_v3 = vpop.f32.mrf.mxu1 }
 0x139   : > { %6031 = vst [vmem:[#allocation7_spill] sm:$0xff] %v4934_v2  ;;  %6032 = vst [vmem:[#allocation8_spill] sm:$0xff] %v4936_v3 }
 0x13a   : > { %v4938_v6 = vpop.f32.mrf.mxu0  ;;  %v4940_v8 = vpop.f32.mrf.mxu1 }
 0x13b   : > { %6033 = vst [vmem:[#allocation9_spill] sm:$0xff] %v4938_v6  ;;  %6034 = vst [vmem:[#allocation10_spill] sm:$0xff] %v4940_v8  ;;  %v1407_v8 = vadd.f32 %v4832_v41, %v4821_v26  ;;  %v3850_v6 = vadd.f32 %v4836_v44, %v4834_v42  ;;  %v3856_v41 = vadd.f32 %v4848_v54, %v4846_v52 }
 0x13c   : > { %v3906_v9 = vpop.f32.mrf.mxu0  ;;  %v4942_v12 = vpop.f32.mrf.mxu1  ;;  %v1423_v52 = vadd.f32 %v4859_v62, %v4821_v26  ;;  %v3862_v54 = vadd.f32 %v4863_v1, %v4861_v63 }
 0x13d   : > { %6035 = vst [vmem:[#allocation11_spill] sm:$0xff] %v4942_v12  ;;  %v1504_v42 = vadd.f32 %v3850_v6, %v1407_v8 }
 0x13e   : > { %v3907_v14 = vpop.f32.mrf.mxu0  ;;  %v4047_v15 = vpop.f32.mrf.mxu1  ;;  %v1520_v63 = vadd.f32 %v3862_v54, %v1423_v52 }
 0x13f   : > { %v3908_v60 = vadd.f32 %v3907_v14, %v3906_v9 }
 0x140   : > { %v3909_v18 = vpop.f32.mrf.mxu0  ;;  %v1689_v20 = vpop.f32.mrf.mxu1 }
 0x141   : > { %v1593_v9 = vadd.f32 %v3908_v60, %v4828_v37  ;;  %v3865_v37 = vadd.f32 %v4872_v7, %v4870_v5  ;;  %v3868_v5 = vadd.f32 %v4881_v13, %v4879_v11 }
 0x142   : > { %v3910_v21 = vpop.f32.mrf.mxu0  ;;  %v4048_v27 = vpop.f32.mrf.mxu1 }
 0x143   : > { %v3911_v2 = vadd.f32 %v3910_v21, %v3909_v18  ;;  %v1690_v59 = vadd.f32 %v1689_v20, %v1593_v9  ;;  %v1523_v50 = vadd.f32 %v3865_v37, %v1426_v57 }
 0x144   : > { %v3912_v24 = vpop.f32.mrf.mxu0  ;;  %v1692_v31 = vpop.f32.mrf.mxu1 }
 0x145   : > { %v1596_v44 = vadd.f32 %v3911_v2, %v1499_v61 }
 0x146   : > { %v3913_v28 = vpop.f32.mrf.mxu0  ;;  %v4944_v43 = vpop.f32.mrf.mxu1 }
 0x147   : > { %v3914_v55 = vadd.f32 %v3913_v28, %v3912_v24  ;;  %v1512_v28 = vadd.f32 %v3856_v41, %v1415_v39  ;;  %v1693_v61 = vadd.f32 %v1692_v31, %v1596_v44 }
 0x148   : > { %v3915_v33 = vpop.f32.mrf.mxu0  ;;  %v1705_v0 = vpop.f32.mrf.mxu1 }
 0x149   : > { %v1601_v14 = vadd.f32 %v3914_v55, %v1504_v42  ;;  %v4977_v1 = vmax.f32 %v1693_v61, 0.0  ;;  %v3871_v42 = vadd.f32 %v4890_v19, %v4888_v17 }
 0x14a   : > { %v3916_v34 = vpop.f32.mrf.mxu0  ;;  %v4052_v45 = vpop.f32.mrf.mxu1 }
 0x14b   : > { %v3917_v18 = vadd.f32 %v3916_v34, %v3915_v33  ;;  %v1515_v33 = vadd.f32 %v3859_v47, %v1418_v46  ;;  %v1698_v55 = vadd.f32 %v4047_v15, %v1601_v14  ;;  %v4983_v15 = vmax.f32 %v1690_v59, 0.0 }
 0x14c   : > { %v3918_v12 = vpop.f32.mrf.mxu0  ;;  %v1708_v8 = vpop.f32.mrf.mxu1  ;;  %v1792_v10 = vmul.f32 %v4977_v1, %v4977_v1 }
 0x14d   : > { %v1604_v2 = vadd.f32 %v3917_v18, %v1507_v49  ;;  %v4985_v20 = vmax.f32 %v1698_v55, 0.0  ;;  %v1768_v14 = vadd.f32 %v4977_v1, %v4983_v15 }
 0x14e   : > { %v3919_v3 = vpop.f32.mrf.mxu0 }
 0x14f   : > { %v3920_v24 = vadd.f32 %v3919_v3, %v3918_v12  ;;  %v4975_v3 = vpop.f32.mrf.mxu1  ;;  %v1701_v12 = vadd.f32 %v4048_v27, %v1604_v2  ;;  %v1434_v27 = vadd.f32 %v4886_v16, %v4821_v26  ;;  %v1793_v47 = vmul.f32 %v4985_v20, %v4985_v20 }
 0x150   : > { %v3921_v36 = vpop.f32.mrf.mxu0  ;;  %v1439_v2 = vadd.f32 %v4895_v22, %v4821_v26  ;;  %v3877_v22 = vadd.f32 %v4908_v32, %v4906_v30 }
 0x151   : > { %v1609_v58 = vadd.f32 %v3920_v24, %v1512_v28  ;;  %v1721_v41 = vpop.f32.mrf.mxu1  ;;  %v4993_v44 = vmax.f32 %v1701_v12, 0.0  ;;  %v1531_v9 = vadd.f32 %v3871_v42, %v1434_v27 }
 0x152   : > { %v3922_v21 = vpop.f32.mrf.mxu0 }
 0x153   : > { %v3923_v6 = vadd.f32 %v3922_v21, %v3921_v36  ;;  %v1706_v35 = vadd.f32 %v1705_v0, %v1609_v58  ;;  %v1528_v21 = vadd.f32 %v3868_v5, %v1431_v4  ;;  %v1791_v0 = vmul.f32 %v4983_v15, %v4983_v15  ;;  %v5002_v49 = vpop.f32.mrf.mxu1 }
 0x154   : > { %v3924_v51 = vpop.f32.mrf.mxu0  ;;  %v1794_v28 = vmul.f32 %v4993_v44, %v4993_v44 }
 0x155   : > { %v1612_v31 = vadd.f32 %v3923_v6, %v1515_v33  ;;  %v4999_v16 = vmax.f32 %v1706_v35, 0.0  ;;  %v1769_v6 = vadd.f32 %v1768_v14, %v4985_v20  ;;  %v1724_v55 = vpop.f32.mrf.mxu1 }
 0x156   : > { %v3925_v56 = vpop.f32.mrf.mxu0 }
 0x157   : > { %v3926_v60 = vadd.f32 %v3925_v56, %v3924_v51  ;;  %v1709_v11 = vadd.f32 %v1708_v8, %v1612_v31  ;;  %v1807_v51 = vadd.f32 %v1792_v10, %v1791_v0  ;;  %v1795_v33 = vmul.f32 %v4999_v16, %v4999_v16  ;;  %v4059_v10 = vpop.f32.mrf.mxu1 }
 0x158   : > { %v3927_v62 = vpop.f32.mrf.mxu0 }
 0x159   : > { %v1617_v36 = vadd.f32 %v3926_v60, %v1520_v63  ;;  %v5008_v52 = vmax.f32 %v1709_v11, 0.0  ;;  %v1808_v8 = vadd.f32 %v1807_v51, %v1793_v47  ;;  %v3880_v11 = vadd.f32 %v4920_v48, %v4915_v40  ;;  %v6038_v48 = vld [vmem:[#allocation3_spill] sm:$0xff]  ;;  %v6039_v51 = vld [vmem:[#allocation5_spill] sm:$0xff] }
 0x15a   : > { %v3928_v34 = vpop.f32.mrf.mxu0 }
 0x15b   : > { %v3929_v7 = vadd.f32 %v3928_v34, %v3927_v62  ;;  %v1714_v17 = vadd.f32 %v4944_v43, %v1617_v36  ;;  %v3874_v43 = vadd.f32 %v4899_v25, %v4897_v23  ;;  %v1770_v23 = vadd.f32 %v1769_v6, %v4993_v44 }
 0x15c   : > { %v3930_v39 = vpop.f32.mrf.mxu0  ;;  %v1809_v58 = vadd.f32 %v1808_v8, %v1794_v28  ;;  %v1796_v60 = vmul.f32 %v5008_v52, %v5008_v52  ;;  %v1447_v36 = vadd.f32 %v4913_v38, %v4821_v26 }
 0x15d   : > { %v1620_v13 = vadd.f32 %v3929_v7, %v1523_v50  ;;  %v5017_v57 = vmax.f32 %v1714_v17, 0.0  ;;  %v1536_v12 = vadd.f32 %v3874_v43, %v1439_v2  ;;  %v1771_v31 = vadd.f32 %v1770_v23, %v4999_v16  ;;  %v6036_v17 = vld [vmem:[#allocation2_spill] sm:$0xff] }
 0x15e   : > { %v3931_v18 = vpop.f32.mrf.mxu0  ;;  %v1810_v4 = vadd.f32 %v1809_v58, %v1795_v33  ;;  %v1544_v2 = vadd.f32 %v3880_v11, %v1447_v36  ;;  %v6041_v58 = vld [vmem:[#allocation8_spill] sm:$0xff] }
 0x15f   : > { %v3932_v46 = vadd.f32 %v3931_v18, %v3930_v39  ;;  %v1717_v54 = vadd.f32 %v4052_v45, %v1620_v13  ;;  %v1442_v45 = vadd.f32 %v4904_v29, %v4821_v26  ;;  %v1797_v29 = vmul.f32 %v5017_v57, %v5017_v57 }
 0x160   : > { %v3933_v19 = vpop.f32.mrf.mxu0  ;;  %v1772_v7 = vadd.f32 %v1771_v31, %v5008_v52  ;;  %v1811_v39 = vadd.f32 %v1810_v4, %v1796_v60 }
 0x161   : > { %v1625_v24 = vadd.f32 %v3932_v46, %v1528_v21  ;;  %v5026_v62 = vmax.f32 %v1717_v54, 0.0  ;;  %v1539_v5 = vadd.f32 %v3877_v22, %v1442_v45  ;;  %v1450_v46 = vadd.f32 %v4922_v53, %v4821_v26 }
 0x162   : > { %v3934_v61 = vpop.f32.mrf.mxu0  ;;  %v1773_v13 = vadd.f32 %v1772_v7, %v5017_v57  ;;  %v1812_v38 = vadd.f32 %v1811_v39, %v1797_v29 }
 0x163   : > { %v3935_v56 = vadd.f32 %v3934_v61, %v3933_v19  ;;  %v1722_v37 = vadd.f32 %v1721_v41, %v1625_v24  ;;  %v1798_v41 = vmul.f32 %v5026_v62, %v5026_v62  ;;  %v6037_v19 = vld [vmem:[#allocation4_spill] sm:$0xff]  ;;  %v1737_v61 = vpop.f32.mrf.mxu1 }
 0x164   : > { %v3936_v59 = vpop.f32.mrf.mxu0  ;;  %v1774_v14 = vadd.f32 %v1773_v13, %v5026_v62  ;;  %v6044_v13 = vld [vmem:[#allocation10_spill] sm:$0xff] }
 0x165   : > { %v1628_v25 = vadd.f32 %v3935_v56, %v1531_v9  ;;  %v5031_v30 = vmax.f32 %v1722_v37, 0.0  ;;  %v3883_v9 = vadd.f32 %v6037_v19, %v6036_v17  ;;  %v1813_v28 = vadd.f32 %v1812_v38, %v1798_v41 }
 0x166   : > { %v3937_v63 = vpop.f32.mrf.mxu0 }
 0x167   : > { %v3938_v34 = vadd.f32 %v3937_v63, %v3936_v59  ;;  %v1725_v50 = vadd.f32 %v1724_v55, %v1628_v25  ;;  %v1799_v0 = vmul.f32 %v5031_v30, %v5031_v30  ;;  %v1775_v43 = vadd.f32 %v1774_v14, %v5031_v30  ;;  %v6040_v25 = vld [vmem:[#allocation6_spill] sm:$0xff]  ;;  %v6042_v63 = vld [vmem:[#allocation7_spill] sm:$0xff] }
 0x168   : > { %v3939_v32 = vpop.f32.mrf.mxu0  ;;  %v1547_v59 = vadd.f32 %v3883_v9, %v1450_v46  ;;  %v3886_v60 = vadd.f32 %v6041_v58, %v6040_v25 }
 0x169   : > { %v1633_v35 = vadd.f32 %v3938_v34, %v1536_v12  ;;  %v5038_v27 = vmax.f32 %v1725_v50, 0.0  ;;  %v1814_v8 = vadd.f32 %v1813_v28, %v1799_v0  ;;  %v6043_v12 = vld [vmem:[#allocation9_spill] sm:$0xff]  ;;  %v4060_v50 = vpop.f32.mrf.mxu1 }
 0x16a   : > { %v3940_v42 = vpop.f32.mrf.mxu0 }
 0x16b   : > { %v1730_v18 = vadd.f32 %v4975_v3, %v1633_v35  ;;  %v3941_v21 = vadd.f32 %v3940_v42, %v3939_v32  ;;  %v3822_v3 = vadd.f32 %v6039_v51, %v6038_v48  ;;  %v1800_v53 = vmul.f32 %v5038_v27, %v5038_v27  ;;  %v1740_v38 = vpop.f32.mrf.mxu1 }
 0x16c   : > { %v3942_v47 = vpop.f32.mrf.mxu0  ;;  %v1776_v55 = vadd.f32 %v1775_v43, %v5038_v27 }
 0x16d   : > { %v5051_v24 = vmax.f32 %v1730_v18, 0.0  ;;  %v1636_v40 = vadd.f32 %v3941_v21, %v1539_v5  ;;  %v1455_v23 = vadd.f32 %v3822_v3, %v4821_v26  ;;  %v1815_v31 = vadd.f32 %v1814_v8, %v1800_v53  ;;  %v6045_v18 = vld [vmem:[#allocation11_spill] sm:$0xff] }
 0x16e   : > { %v3943_v54 = vpop.f32.mrf.mxu0  ;;  %v3889_v21 = vadd.f32 %v6045_v18, %v6044_v13  ;;  %v1832_v13 = vld [vmem:[%s6046_s5] sm:$0x1] }
 0x16f   : > { %v1733_v6 = vadd.f32 %v5002_v49, %v1636_v40  ;;  %v3944_v56 = vadd.f32 %v3943_v54, %v3942_v47  ;;  %v1801_v33 = vmul.f32 %v5051_v24, %v5051_v24  ;;  %v3825_v49 = vadd.f32 %v6043_v12, %v6042_v63 }
 0x170   : > { %v3945_v37 = vpop.f32.mrf.mxu0  ;;  %v1777_v4 = vadd.f32 %v1776_v55, %v5051_v24  ;;  %v1552_v42 = vadd.f32 %v3886_v60, %v1455_v23 }
 0x171   : > { %v5062_v45 = vmax.f32 %v1733_v6, 0.0  ;;  %v1641_v22 = vadd.f32 %v3944_v56, %v1544_v2  ;;  %v1816_v7 = vadd.f32 %v1815_v31, %v1801_v33  ;;  %v1458_v11 = vadd.f32 %v3825_v49, %v4821_v26 }
 0x172   : > { %v3946_v34 = vpop.f32.mrf.mxu0 }
 0x173   : > { %v1802_v29 = vmul.f32 %v5062_v45, %v5062_v45  ;;  %v1738_v32 = vadd.f32 %v1737_v61, %v1641_v22  ;;  %v3947_v5 = vadd.f32 %v3946_v34, %v3945_v37  ;;  %v1778_v39 = vadd.f32 %v1777_v4, %v5062_v45 }
 0x174   : > { %v3948_v35 = vpop.f32.mrf.mxu0  ;;  %v1555_v3 = vadd.f32 %v3889_v21, %v1458_v11 }
 0x175   : > { %v5072_v36 = vmax.f32 %v1738_v32, 0.0  ;;  %v1644_v41 = vadd.f32 %v3947_v5, %v1547_v59  ;;  %v1817_v46 = vadd.f32 %v1816_v7, %v1802_v29 }
 0x176   : > { %v3949_v0 = vpop.f32.mrf.mxu0 }
 0x177   : > { %v1779_v47 = vadd.f32 %v1778_v39, %v5072_v36  ;;  %v1803_v17 = vmul.f32 %v5072_v36, %v5072_v36  ;;  %v1741_v19 = vadd.f32 %v1740_v38, %v1644_v41  ;;  %v3950_v9 = vadd.f32 %v3949_v0, %v3948_v35  ;;  %v1836_v38 = vld [vmem:[%s6047_s2] sm:$0x1] }
 0x178   : > { %v3951_v14 = vpop.f32.mrf.mxu0 }
 0x179   : > { %v1818_v40 = vadd.f32 %v1817_v46, %v1803_v17  ;;  %v1765_v48 = vmax.f32 %v1741_v19, 0.0  ;;  %v1649_v51 = vadd.f32 %v3950_v9, %v1552_v42  ;;  %v1840_v42 = vlaneseq }
 0x17a   : > { %v3952_v28 = vpop.f32.mrf.mxu0 }
 0x17b   : > { %v1780_v26 = vadd.f32 %v1779_v47, %v1765_v48  ;;  %v1804_v53 = vmul.f32 %v1765_v48, %v1765_v48  ;;  %v1746_v54 = vadd.f32 %v4059_v10, %v1649_v51  ;;  %v3953_v61 = vadd.f32 %v3952_v28, %v3951_v14 }
 0x17c   : > { %v1841_v11 = vshrl.u32 %v1840_v42, 7 }
 0x17d   : > { %v1819_v2 = vadd.f32 %v1818_v40, %v1804_v53  ;;  %v5081_v43 = vmax.f32 %v1746_v54, 0.0  ;;  %v1652_v6 = vadd.f32 %v3953_v61, %v1555_v3 }
 0x17e   : > { %v5095_v18 = vsub.s32 0, %v1841_v11 }
 0x17f   : > { %v1781_v56 = vadd.f32 %v1780_v26, %v5081_v43  ;;  %v1805_v8 = vmul.f32 %v5081_v43, %v5081_v43  ;;  %v1749_v33 = vadd.f32 %v4060_v50, %v1652_v6 }
 0x181   : > { %v1820_v37 = vadd.f32 %v1819_v2, %v1805_v8  ;;  %v5086_v59 = vmax.f32 %v1749_v33, 0.0 }
 0x183   : > { %v1782_v55 = vadd.f32 %v1781_v56, %v5086_v59  ;;  %v1806_v22 = vmul.f32 %v5086_v59, %v5086_v59 }
 0x185   : > { %v1783_v10 = vrot.slane %v1782_v55, 4  ;;  %v1821_v23 = vadd.f32 %v1820_v37, %v1806_v22 }
 0x187   : > { %v1784_v25 = vadd.f32 %v1783_v10, %v1782_v55  ;;  %v1822_v58 = vrot.slane %v1821_v23, 4 }
 0x189   : > { %v1785_v60 = vrot.slane %v1784_v25, 2  ;;  %v1823_v63 = vadd.f32 %v1822_v58, %v1821_v23 }
 0x18b   : > { %v1786_v12 = vadd.f32 %v1785_v60, %v1784_v25  ;;  %v1824_v49 = vrot.slane %v1823_v63, 2 }
 0x18d   : > { %v1787_v31 = vrot.slane %v1786_v12, 1  ;;  %v1825_v34 = vadd.f32 %v1824_v49, %v1823_v63 }
 0x18f   : > { %v1788_v4 = vadd.f32 %v1787_v31, %v1786_v12  ;;  %v1826_v50 = vrot.slane %v1825_v34, 1  ;;  %v4287_v31 = vld [vmem:[%s6048_s27 + $0x38] sm:$0xff]  }
 0x190   : > { %4093 = vmatprep.subr.bf16.mxu0 %v4287_v31 }
 0x191   : > { %v1790_v29 = vmul.f32 0.0078125, %v1788_v4  ;;  %v1827_v32 = vadd.f32 %v1826_v50, %v1825_v34  ;;  %4094 = vmatpush3.bf16.msra.mxu0 %v4287_v31  ;;  %v4290_v34 = vld [vmem:[%s6048_s27 + $0x20] sm:$0xff]   ;;  %v4291_v4 = vld [vmem:[%s6048_s27 + $0x18] sm:$0xff]   ;;  %v4292_v50 = vld [vmem:[%s6048_s27 + $0x10] sm:$0xff]  }
 0x193   : > { %v1828_v5 = vmul.f32 0.0078125, %v1827_v32  ;;  %v1829_v7 = vmul.f32 %v1790_v29, %v1790_v29  ;;  %v4294_v32 = vld [vmem:[%s6048_s27] sm:$0xff]  }
 0x195   : > { %v1830_v35 = vsub.f32 %v1828_v5, %v1829_v7  ;;  %v5144_v7 = vld [vmem:[%s6049_s6] ss:$0 sm:$0xff] }
 0x197   : > { %v1831_v39 = vmax.f32 %v1830_v35, 0.0 }
 0x199   : > { %v1833_v41 = vadd.f32 1e-05, %v1831_v39 }
 0x19b   : > { %4319 = vrsqrt.f32 %v1833_v41 }
 0x1a8   : > { %v4320_v21 = vpop.eup %4319 }
 0x1a9   : > { %v1835_v46 = vmul.f32 %v4320_v21, %v1832_v13 }
 0x1ab   : > { %v1837_v0 = vmul.f32 %v1835_v46, %v1790_v29  ;;  %v1843_v47 = vrot.slane %v1835_v46, %v5095_v18  ;;  %v4293_v29 = vld [vmem:[%s6048_s27 + $0x8] sm:$0xff]  }
 0x1ad   : > { %v1838_v17 = vsub.f32 %v1836_v38, %v1837_v0  ;;  %v1845_v19 = vmul.f32 %v1843_v47, %v4983_v15  ;;  %v1846_v9 = vmul.f32 %v1843_v47, %v4977_v1  ;;  %v1847_v14 = vmul.f32 %v1843_v47, %v4985_v20 }
 0x1ae   : > { %v1848_v40 = vmul.f32 %v1843_v47, %v4993_v44  ;;  %v1849_v51 = vmul.f32 %v1843_v47, %v4999_v16  ;;  %v1850_v3 = vmul.f32 %v1843_v47, %v5008_v52  ;;  %v1851_v28 = vmul.f32 %v1843_v47, %v5017_v57 }
 0x1af   : > { %v1865_v26 = vrot.slane %v1838_v17, %v5095_v18  ;;  %v1852_v53 = vmul.f32 %v1843_v47, %v5026_v62  ;;  %v1853_v54 = vmul.f32 %v1843_v47, %v5031_v30  ;;  %v1854_v15 = vmul.f32 %v1843_v47, %v5038_v27 }
 0x1b0   : > { %v1855_v1 = vmul.f32 %v1843_v47, %v5051_v24  ;;  %v1856_v20 = vmul.f32 %v1843_v47, %v5062_v45  ;;  %v1857_v44 = vmul.f32 %v1843_v47, %v5072_v36  ;;  %v1858_v61 = vmul.f32 %v1843_v47, %v1765_v48 }
 0x1b1   : > { %v1867_v16 = vadd.f32 %v1865_v26, %v1845_v19  ;;  %v1868_v2 = vadd.f32 %v1865_v26, %v1846_v9  ;;  %v1869_v52 = vadd.f32 %v1865_v26, %v1847_v14  ;;  %v1870_v6 = vadd.f32 %v1865_v26, %v1848_v40 }
 0x1b2   : > { %v1871_v57 = vadd.f32 %v1865_v26, %v1849_v51  ;;  %v1872_v56 = vadd.f32 %v1865_v26, %v1850_v3  ;;  %v1873_v8 = vadd.f32 %v1865_v26, %v1851_v28  ;;  %v1874_v33 = vadd.f32 %v1865_v26, %v1852_v53 }
 0x1b3   : > { %v1883_v62 = vpack.c.bf16 %v1868_v2, %v1867_v16  ;;  %v1884_v37 = vpack.c.bf16 %v1870_v6, %v1869_v52  ;;  %v1875_v30 = vadd.f32 %v1865_v26, %v1853_v54  ;;  %v1876_v55 = vadd.f32 %v1865_v26, %v1854_v15 }
 0x1b4   : > { %v1885_v27 = vpack.c.bf16 %v1872_v56, %v1871_v57  ;;  %v1886_v22 = vpack.c.bf16 %v1874_v33, %v1873_v8  ;;  %v1877_v24 = vadd.f32 %v1865_v26, %v1855_v1  ;;  %v1878_v10 = vadd.f32 %v1865_v26, %v1856_v20 }
 0x1b5   : > { %4077 = vmatprep.mubr.bf16.mxu1 %v1883_v62  ;;  %v1887_v45 = vpack.c.bf16 %v1876_v55, %v1875_v30  ;;  %v1879_v36 = vadd.f32 %v1865_v26, %v1857_v44  ;;  %v1880_v48 = vadd.f32 %v1865_v26, %v1858_v61  ;;  %v1859_v23 = vmul.f32 %v1843_v47, %v5081_v43  ;;  %v4288_v43 = vld [vmem:[%s6048_s27 + $0x30] sm:$0xff]  }
 0x1b6   : > { %4078 = vmatmul.mubr.bf16.vlgmr.msra.gmra.mxu1 %v1884_v37  ;;  %v1888_v25 = vpack.c.bf16 %v1878_v10, %v1877_v24  ;;  %v1860_v58 = vmul.f32 %v1843_v47, %v5086_v59  ;;  %4095 = vmatprep.subr.bf16.mxu0 %v4288_v43  ;;  %v4289_v59 = vld [vmem:[%s6048_s27 + $0x28] sm:$0xff]  }
 0x1b7   : > { %4081 = vmatprep.mubr.bf16.mxu1 %v1885_v27  ;;  %v1889_v60 = vpack.c.bf16 %v1880_v48, %v1879_v36  ;;  %v1881_v63 = vadd.f32 %v1865_v26, %v1859_v23  ;;  %4096 = vmatpush3.bf16.msra.mxu0 %v4288_v43 }
 0x1b8   : > { %v1882_v12 = vadd.f32 %v1865_v26, %v1860_v58  ;;  %4097 = vmatprep.subr.bf16.mxu0 %v4289_v59 }
 0x1ba   : > { %v1890_v49 = vpack.c.bf16 %v1882_v12, %v1881_v63 }
 0x1bb   : > { %4098 = vmatpush3.bf16.msra.mxu0 %v4289_v59 }
 0x1bc   : > { %4099 = vmatprep.subr.bf16.mxu0 %v4290_v34 }
 0x1be   : > { %4082 = vmatmul.mubr.bf16.gmra.mxu1 %v1886_v22 }
 0x1bf   : > { %4085 = vmatprep.mubr.bf16.mxu1 %v1887_v45  ;;  %4100 = vmatpush3.bf16.msra.mxu0 %v4290_v34 }
 0x1c0   : > { %4101 = vmatprep.subr.bf16.mxu0 %v4291_v4 }
 0x1c3   : > { %4102 = vmatpush3.bf16.msra.mxu0 %v4291_v4 }
 0x1c4   : > { %4103 = vmatprep.subr.bf16.mxu0 %v4292_v50 }
 0x1c6   : > { %4086 = vmatmul.mubr.bf16.gmra.mxu1 %v1888_v25 }
 0x1c7   : > { %4089 = vmatprep.mubr.bf16.mxu1 %v1889_v60  ;;  %4104 = vmatpush3.bf16.msra.mxu0 %v4292_v50 }
 0x1c8   : > { %4105 = vmatprep.subr.bf16.mxu0 %v4293_v29 }
 0x1cb   : > { %4106 = vmatpush3.bf16.msra.mxu0 %v4293_v29 }
 0x1cc   : > { %4107 = vmatprep.subr.bf16.mxu0 %v4294_v32 }
 0x1ce   : > { %4090 = vmatmul.mubr.bf16.gmra.mxu1 %v1890_v49 }
 0x1cf   : > { %4108 = vmatpush3.bf16.msra.mxu0 %v4294_v32 }
 0x276   : > { %v4079_v5 = vpop.f32.mrf.mxu1 }
 0x277   : > { %v2005_v11 = vadd.f32 %v4079_v5, %v5144_v7 }
 0x278   : > { %v1996_v35 = vpop.f32.mrf.mxu1 }
 0x279   : > { %v1997_v39 = vadd.f32 %v5144_v7, %v1996_v35  ;;  %v5152_v47 = vmax.f32 %v2005_v11, 0.0 }
 0x27a   : > { %v4080_v41 = vpop.f32.mrf.mxu1 }
 0x27b   : > { %v2008_v13 = vadd.f32 %v4080_v41, %v5144_v7  ;;  %v5149_v46 = vmax.f32 %v1997_v39, 0.0  ;;  %v2099_v53 = vmul.f32 %v5152_v47, %v5152_v47 }
 0x27c   : > { %v1999_v21 = vpop.f32.mrf.mxu1 }
 0x27d   : > { %v2000_v38 = vadd.f32 %v5144_v7, %v1999_v21  ;;  %v5156_v19 = vmax.f32 %v2008_v13, 0.0  ;;  %v2097_v14 = vmul.f32 %v5149_v46, %v5149_v46 }
 0x27e   : > { %v4083_v0 = vpop.f32.mrf.mxu1 }
 0x27f   : > { %v5154_v17 = vmax.f32 %v2000_v38, 0.0  ;;  %v2021_v28 = vadd.f32 %v4083_v0, %v5144_v7  ;;  %v2100_v20 = vmul.f32 %v5156_v19, %v5156_v19 }
 0x280   : > { %v2012_v9 = vpop.f32.mrf.mxu1 }
 0x281   : > { %v2075_v40 = vadd.f32 %v5154_v17, %v5149_v46  ;;  %v2098_v51 = vmul.f32 %v5154_v17, %v5154_v17  ;;  %v2013_v3 = vadd.f32 %v5144_v7, %v2012_v9  ;;  %v5176_v6 = vmax.f32 %v2021_v28, 0.0 }
 0x282   : > { %v4084_v26 = vpop.f32.mrf.mxu1 }
 0x283   : > { %v2076_v54 = vadd.f32 %v2075_v40, %v5152_v47  ;;  %v2113_v15 = vadd.f32 %v2098_v51, %v2097_v14  ;;  %v5169_v1 = vmax.f32 %v2013_v3, 0.0  ;;  %v2024_v2 = vadd.f32 %v4084_v26, %v5144_v7 }
 0x284   : > { %v2015_v44 = vpop.f32.mrf.mxu1  ;;  %v2103_v36 = vmul.f32 %v5176_v6, %v5176_v6 }
 0x285   : > { %v2114_v61 = vadd.f32 %v2113_v15, %v2099_v53  ;;  %v2077_v16 = vadd.f32 %v2076_v54, %v5156_v19  ;;  %v2016_v52 = vadd.f32 %v5144_v7, %v2015_v44  ;;  %v2101_v8 = vmul.f32 %v5169_v1, %v5169_v1 }
 0x286   : > { %v4087_v57 = vpop.f32.mrf.mxu1  ;;  %v5183_v55 = vmax.f32 %v2024_v2, 0.0 }
 0x287   : > { %v2078_v56 = vadd.f32 %v2077_v16, %v5169_v1  ;;  %v2115_v33 = vadd.f32 %v2114_v61, %v2100_v20  ;;  %v5181_v62 = vmax.f32 %v2016_v52, 0.0  ;;  %v2037_v24 = vadd.f32 %v4087_v57, %v5144_v7 }
 0x288   : > { %v2028_v37 = vpop.f32.mrf.mxu1  ;;  %v2104_v63 = vmul.f32 %v5183_v55, %v5183_v55 }
 0x289   : > { %v2116_v30 = vadd.f32 %v2115_v33, %v2101_v8  ;;  %v2079_v27 = vadd.f32 %v2078_v56, %v5181_v62  ;;  %v2102_v22 = vmul.f32 %v5181_v62, %v5181_v62  ;;  %v2029_v10 = vadd.f32 %v5144_v7, %v2028_v37 }
 0x28a   : > { %v4088_v45 = vpop.f32.mrf.mxu1  ;;  %v5200_v43 = vmax.f32 %v2037_v24, 0.0 }
 0x28b   : > { %v2080_v48 = vadd.f32 %v2079_v27, %v5176_v6  ;;  %v2117_v23 = vadd.f32 %v2116_v30, %v2102_v22  ;;  %v5193_v25 = vmax.f32 %v2029_v10, 0.0  ;;  %v2040_v58 = vadd.f32 %v4088_v45, %v5144_v7 }
 0x28c   : > { %v2031_v60 = vpop.f32.mrf.mxu1  ;;  %v2107_v21 = vmul.f32 %v5200_v43, %v5200_v43 }
 0x28d   : > { %v2118_v12 = vadd.f32 %v2117_v23, %v2103_v36  ;;  %v2081_v49 = vadd.f32 %v2080_v48, %v5183_v55  ;;  %v2032_v31 = vadd.f32 %v5144_v7, %v2031_v60  ;;  %v2105_v4 = vmul.f32 %v5193_v25, %v5193_v25 }
 0x28e   : > { %v4091_v59 = vpop.f32.mrf.mxu1  ;;  %v5207_v32 = vmax.f32 %v2040_v58, 0.0 }
 0x28f   : > { %v2082_v34 = vadd.f32 %v2081_v49, %v5193_v25  ;;  %v2119_v50 = vadd.f32 %v2118_v12, %v2104_v63  ;;  %v5205_v29 = vmax.f32 %v2032_v31, 0.0  ;;  %v2053_v14 = vadd.f32 %v4091_v59, %v5144_v7 }
 0x290   : > { %v2044_v5 = vpop.f32.mrf.mxu1  ;;  %v2108_v51 = vmul.f32 %v5207_v32, %v5207_v32 }
 0x291   : > { %v2120_v35 = vadd.f32 %v2119_v50, %v2105_v4  ;;  %v2083_v39 = vadd.f32 %v2082_v34, %v5205_v29  ;;  %v2106_v41 = vmul.f32 %v5205_v29, %v5205_v29  ;;  %v2045_v11 = vadd.f32 %v5144_v7, %v2044_v5 }
 0x292   : > { %v4092_v13 = vpop.f32.mrf.mxu1  ;;  %v5227_v44 = vmax.f32 %v2053_v14, 0.0 }
 0x293   : > { %v2084_v38 = vadd.f32 %v2083_v39, %v5200_v43  ;;  %v2121_v0 = vadd.f32 %v2120_v35, %v2106_v41  ;;  %v5216_v9 = vmax.f32 %v2045_v11, 0.0  ;;  %v2056_v26 = vadd.f32 %v4092_v13, %v5144_v7  ;;  %v2138_v35 = vld [vmem:[%s6050_s30] sm:$0x1] }
 0x294   : > { %v2047_v40 = vpop.f32.mrf.mxu1  ;;  %v2111_v56 = vmul.f32 %v5227_v44, %v5227_v44  ;;  %v2142_v11 = vld [vmem:[%s6051_s3] sm:$0x1] }
 0x295   : > { %v2122_v3 = vadd.f32 %v2121_v0, %v2107_v21  ;;  %v2085_v28 = vadd.f32 %v2084_v38, %v5207_v32  ;;  %v2048_v53 = vadd.f32 %v5144_v7, %v2047_v40  ;;  %v2109_v15 = vmul.f32 %v5216_v9, %v5216_v9 }
 0x296   : > { %v5229_v2 = vmax.f32 %v2056_v26, 0.0 }
 0x297   : > { %v2086_v54 = vadd.f32 %v2085_v28, %v5216_v9  ;;  %v2123_v20 = vadd.f32 %v2122_v3, %v2108_v51  ;;  %v2072_v61 = vmax.f32 %v2048_v53, 0.0 }
 0x298   : > { %v2112_v33 = vmul.f32 %v5229_v2, %v5229_v2 }
 0x299   : > { %v2124_v16 = vadd.f32 %v2123_v20, %v2109_v15  ;;  %v2087_v52 = vadd.f32 %v2086_v54, %v2072_v61  ;;  %v2110_v57 = vmul.f32 %v2072_v61, %v2072_v61 }
 0x29b   : > { %v2088_v8 = vadd.f32 %v2087_v52, %v5227_v44  ;;  %v2125_v7 = vadd.f32 %v2124_v16, %v2110_v57 }
 0x29d   : > { %v2089_v37 = vadd.f32 %v2088_v8, %v5229_v2  ;;  %v2126_v30 = vadd.f32 %v2125_v7, %v2111_v56 }
 0x29f   : > { %v2090_v27 = vrot.slane %v2089_v37, 4  ;;  %v2127_v22 = vadd.f32 %v2126_v30, %v2112_v33 }
 0x2a1   : > { %v2091_v24 = vadd.f32 %v2090_v27, %v2089_v37  ;;  %v2128_v10 = vrot.slane %v2127_v22, 4 }
 0x2a3   : > { %v2092_v45 = vrot.slane %v2091_v24, 2  ;;  %v2129_v36 = vadd.f32 %v2128_v10, %v2127_v22 }
 0x2a5   : > { %v2093_v48 = vadd.f32 %v2092_v45, %v2091_v24  ;;  %v2130_v23 = vrot.slane %v2129_v36, 2 }
 0x2a7   : > { %v2094_v58 = vrot.slane %v2093_v48, 1  ;;  %v2131_v60 = vadd.f32 %v2130_v23, %v2129_v36 }
 0x2a9   : > { %v2095_v63 = vadd.f32 %v2094_v58, %v2093_v48  ;;  %v2132_v12 = vrot.slane %v2131_v60, 1 }
 0x2ab   : > { %v2096_v49 = vmul.f32 0.0078125, %v2095_v63  ;;  %v2133_v31 = vadd.f32 %v2132_v12, %v2131_v60  ;;  %v4299_v60 = vld [vmem:[%s5996_s13 + $0x18] sm:$0xff]   ;;  %v4300_v63 = vld [vmem:[%s5996_s13 + $0x10] sm:$0xff]   ;;  %v4301_v12 = vld [vmem:[%s5996_s13 + $0x8] sm:$0xff]  }
 0x2ad   : > { %v2134_v59 = vmul.f32 0.0078125, %v2133_v31  ;;  %v2135_v34 = vmul.f32 %v2096_v49, %v2096_v49 }
 0x2af   : > { %v2136_v4 = vsub.f32 %v2134_v59, %v2135_v34  ;;  %v5287_v59 = vld [vmem:[%s5993_s10] ss:$0 sm:$0xff] }
 0x2b1   : > { %v2137_v50 = vmax.f32 %v2136_v4, 0.0 }
 0x2b3   : > { %v2139_v5 = vadd.f32 1e-05, %v2137_v50 }
 0x2b5   : > { %4321 = vrsqrt.f32 %v2139_v5 }
 0x2c2   : > { %v4322_v39 = vpop.eup %4321 }
 0x2c3   : > { %v2141_v41 = vmul.f32 %v4322_v39, %v2138_v35 }
 0x2c5   : > { %v2143_v13 = vmul.f32 %v2141_v41, %v2096_v49  ;;  %v2149_v21 = vrot.slane %v2141_v41, %v5095_v18  ;;  %v4302_v49 = vld [vmem:[%s5996_s13] sm:$0xff]  }
 0x2c7   : > { %v2144_v38 = vsub.f32 %v2142_v11, %v2143_v13  ;;  %v2164_v0 = vmul.f32 %v2149_v21, %v2072_v61  ;;  %v2151_v14 = vmul.f32 %v2149_v21, %v5149_v46  ;;  %v2152_v40 = vmul.f32 %v2149_v21, %v5154_v17 }
 0x2c8   : > { %v2153_v3 = vmul.f32 %v2149_v21, %v5152_v47  ;;  %v2154_v28 = vmul.f32 %v2149_v21, %v5156_v19  ;;  %v2155_v26 = vmul.f32 %v2149_v21, %v5169_v1  ;;  %v2156_v53 = vmul.f32 %v2149_v21, %v5181_v62 }
 0x2c9   : > { %v2171_v51 = vrot.slane %v2144_v38, %v5095_v18  ;;  %v2159_v54 = vmul.f32 %v2149_v21, %v5193_v25  ;;  %v2160_v15 = vmul.f32 %v2149_v21, %v5205_v29  ;;  %v2161_v20 = vmul.f32 %v2149_v21, %v5200_v43 }
 0x2ca   : > { %v2162_v47 = vmul.f32 %v2149_v21, %v5207_v32  ;;  %v2163_v19 = vmul.f32 %v2149_v21, %v5216_v9  ;;  %v2165_v30 = vmul.f32 %v2149_v21, %v5227_v44  ;;  %v2157_v27 = vmul.f32 %v2149_v21, %v5176_v6  ;;  %v4295_v6 = vld [vmem:[%s5996_s13 + $0x38] sm:$0xff]   ;;  %v4297_v44 = vld [vmem:[%s5996_s13 + $0x28] sm:$0xff]  }
 0x2cb   : > { %v2173_v61 = vadd.f32 %v2171_v51, %v2151_v14  ;;  %v2174_v46 = vadd.f32 %v2171_v51, %v2152_v40  ;;  %v2175_v16 = vadd.f32 %v2171_v51, %v2153_v3  ;;  %v2176_v17 = vadd.f32 %v2171_v51, %v2154_v28  ;;  %4125 = vmatprep.subr.bf16.mxu1 %v4295_v6 }
 0x2cc   : > { %v2177_v52 = vadd.f32 %v2171_v51, %v2155_v26  ;;  %v2178_v57 = vadd.f32 %v2171_v51, %v2156_v53  ;;  %v2181_v8 = vadd.f32 %v2171_v51, %v2159_v54  ;;  %v2182_v62 = vadd.f32 %v2171_v51, %v2160_v15  ;;  %4126 = vmatpush3.bf16.msra.mxu1 %v4295_v6 }
 0x2cd   : > { %v2189_v56 = vpack.c.bf16 %v2174_v46, %v2173_v61  ;;  %v2190_v1 = vpack.c.bf16 %v2176_v17, %v2175_v16  ;;  %v2183_v25 = vadd.f32 %v2171_v51, %v2161_v20  ;;  %v2184_v33 = vadd.f32 %v2171_v51, %v2162_v47 }
 0x2ce   : > { %v2191_v7 = vpack.c.bf16 %v2178_v57, %v2177_v52  ;;  %v2193_v29 = vpack.c.bf16 %v2182_v62, %v2181_v8  ;;  %v2185_v43 = vadd.f32 %v2171_v51, %v2163_v19  ;;  %v2186_v37 = vadd.f32 %v2171_v51, %v2164_v0 }
 0x2cf   : > { %4109 = vmatprep.mubr.bf16.mxu0 %v2189_v56  ;;  %v2158_v32 = vmul.f32 %v2149_v21, %v5183_v55  ;;  %v2194_v22 = vpack.c.bf16 %v2184_v33, %v2183_v25  ;;  %v2166_v9 = vmul.f32 %v2149_v21, %v5229_v2  ;;  %v2187_v10 = vadd.f32 %v2171_v51, %v2165_v30  ;;  %v4296_v55 = vld [vmem:[%s5996_s13 + $0x30] sm:$0xff]   ;;  %v4298_v2 = vld [vmem:[%s5996_s13 + $0x20] sm:$0xff]  }
 0x2d0   : > { %4110 = vmatmul.mubr.bf16.vlgmr.msra.gmra.mxu0 %v2190_v1  ;;  %v2195_v24 = vpack.c.bf16 %v2186_v37, %v2185_v43  ;;  %v2179_v45 = vadd.f32 %v2171_v51, %v2157_v27  ;;  %4127 = vmatprep.subr.bf16.mxu1 %v4296_v55 }
 0x2d1   : > { %4113 = vmatprep.mubr.bf16.mxu0 %v2191_v7  ;;  %v2180_v36 = vadd.f32 %v2171_v51, %v2158_v32  ;;  %v2188_v48 = vadd.f32 %v2171_v51, %v2166_v9  ;;  %4128 = vmatpush3.bf16.msra.mxu1 %v4296_v55 }
 0x2d2   : > { %4129 = vmatprep.subr.bf16.mxu1 %v4297_v44 }
 0x2d3   : > { %v2196_v23 = vpack.c.bf16 %v2188_v48, %v2187_v10  ;;  %v2192_v58 = vpack.c.bf16 %v2180_v36, %v2179_v45 }
 0x2d5   : > { %4130 = vmatpush3.bf16.msra.mxu1 %v4297_v44 }
 0x2d6   : > { %4131 = vmatprep.subr.bf16.mxu1 %v4298_v2 }
 0x2d8   : > { %4114 = vmatmul.mubr.bf16.gmra.mxu0 %v2192_v58 }
 0x2d9   : > { %4117 = vmatprep.mubr.bf16.mxu0 %v2193_v29  ;;  %4132 = vmatpush3.bf16.msra.mxu1 %v4298_v2 }
 0x2da   : > { %4133 = vmatprep.subr.bf16.mxu1 %v4299_v60 }
 0x2dd   : > { %4134 = vmatpush3.bf16.msra.mxu1 %v4299_v60 }
 0x2de   : > { %4135 = vmatprep.subr.bf16.mxu1 %v4300_v63 }
 0x2e0   : > { %4118 = vmatmul.mubr.bf16.gmra.mxu0 %v2194_v22 }
 0x2e1   : > { %4121 = vmatprep.mubr.bf16.mxu0 %v2195_v24  ;;  %4136 = vmatpush3.bf16.msra.mxu1 %v4300_v63 }
 0x2e2   : > { %4137 = vmatprep.subr.bf16.mxu1 %v4301_v12 }
 0x2e5   : > { %4138 = vmatpush3.bf16.msra.mxu1 %v4301_v12 }
 0x2e6   : > { %4139 = vmatprep.subr.bf16.mxu1 %v4302_v49 }
 0x2e8   : > { %4122 = vmatmul.mubr.bf16.gmra.mxu0 %v2196_v23 }
 0x2e9   : > { %4140 = vmatpush3.bf16.msra.mxu1 %v4302_v49 }
 0x390   : > { %v4111_v31 = vpop.f32.mrf.mxu0 }
 0x391   : > { %v2311_v5 = vadd.f32 %v4111_v31, %v5287_v59 }
 0x392   : > { %v2302_v34 = vpop.f32.mrf.mxu0 }
 0x393   : > { %v2303_v4 = vadd.f32 %v5287_v59, %v2302_v34  ;;  %v5295_v21 = vmax.f32 %v2311_v5, 0.0 }
 0x394   : > { %v4112_v50 = vpop.f32.mrf.mxu0 }
 0x395   : > { %v2314_v35 = vadd.f32 %v4112_v50, %v5287_v59  ;;  %v5292_v41 = vmax.f32 %v2303_v4, 0.0  ;;  %v2405_v54 = vmul.f32 %v5295_v21, %v5295_v21 }
 0x396   : > { %v2305_v39 = vpop.f32.mrf.mxu0 }
 0x397   : > { %v2306_v11 = vadd.f32 %v5287_v59, %v2305_v39  ;;  %v5299_v0 = vmax.f32 %v2314_v35, 0.0  ;;  %v2403_v40 = vmul.f32 %v5292_v41, %v5292_v41 }
 0x398   : > { %v4115_v13 = vpop.f32.mrf.mxu0 }
 0x399   : > { %v5297_v38 = vmax.f32 %v2306_v11, 0.0  ;;  %v2327_v26 = vadd.f32 %v4115_v13, %v5287_v59  ;;  %v2406_v46 = vmul.f32 %v5299_v0, %v5299_v0 }
 0x39a   : > { %v2318_v14 = vpop.f32.mrf.mxu0 }
 0x39b   : > { %v2381_v51 = vadd.f32 %v5297_v38, %v5292_v41  ;;  %v2404_v3 = vmul.f32 %v5297_v38, %v5297_v38  ;;  %v2319_v28 = vadd.f32 %v5287_v59, %v2318_v14  ;;  %v5319_v19 = vmax.f32 %v2327_v26, 0.0 }
 0x39c   : > { %v4116_v53 = vpop.f32.mrf.mxu0 }
 0x39d   : > { %v2382_v15 = vadd.f32 %v2381_v51, %v5295_v21  ;;  %v2419_v20 = vadd.f32 %v2404_v3, %v2403_v40  ;;  %v5312_v61 = vmax.f32 %v2319_v28, 0.0  ;;  %v2330_v57 = vadd.f32 %v4116_v53, %v5287_v59 }
 0x39e   : > { %v2321_v16 = vpop.f32.mrf.mxu0  ;;  %v2409_v22 = vmul.f32 %v5319_v19, %v5319_v19 }
 0x39f   : > { %v2420_v17 = vadd.f32 %v2419_v20, %v2405_v54  ;;  %v2383_v52 = vadd.f32 %v2382_v15, %v5299_v0  ;;  %v2322_v47 = vadd.f32 %v5287_v59, %v2321_v16  ;;  %v2407_v8 = vmul.f32 %v5312_v61, %v5312_v61 }
 0x3a0   : > { %v4119_v56 = vpop.f32.mrf.mxu0  ;;  %v5326_v29 = vmax.f32 %v2330_v57, 0.0 }
 0x3a1   : > { %v2384_v1 = vadd.f32 %v2383_v52, %v5312_v61  ;;  %v2421_v62 = vadd.f32 %v2420_v17, %v2406_v46  ;;  %v5324_v7 = vmax.f32 %v2322_v47, 0.0  ;;  %v2343_v30 = vadd.f32 %v4119_v56, %v5287_v59 }
 0x3a2   : > { %v2334_v25 = vpop.f32.mrf.mxu0  ;;  %v2410_v48 = vmul.f32 %v5326_v29, %v5326_v29 }
 0x3a3   : > { %v2422_v33 = vadd.f32 %v2421_v62, %v2407_v8  ;;  %v2385_v43 = vadd.f32 %v2384_v1, %v5324_v7  ;;  %v2408_v37 = vmul.f32 %v5324_v7, %v5324_v7  ;;  %v2335_v27 = vadd.f32 %v5287_v59, %v2334_v25 }
 0x3a4   : > { %v4120_v32 = vpop.f32.mrf.mxu0  ;;  %v5343_v55 = vmax.f32 %v2343_v30, 0.0 }
 0x3a5   : > { %v2386_v9 = vadd.f32 %v2385_v43, %v5319_v19  ;;  %v2423_v24 = vadd.f32 %v2422_v33, %v2408_v37  ;;  %v5336_v10 = vmax.f32 %v2335_v27, 0.0  ;;  %v2346_v45 = vadd.f32 %v4120_v32, %v5287_v59 }
 0x3a6   : > { %v2337_v36 = vpop.f32.mrf.mxu0  ;;  %v2413_v39 = vmul.f32 %v5343_v55, %v5343_v55 }
 0x3a7   : > { %v2424_v23 = vadd.f32 %v2423_v24, %v2409_v22  ;;  %v2387_v58 = vadd.f32 %v2386_v9, %v5326_v29  ;;  %v2338_v6 = vadd.f32 %v5287_v59, %v2337_v36  ;;  %v2411_v60 = vmul.f32 %v5336_v10, %v5336_v10 }
 0x3a8   : > { %v4123_v44 = vpop.f32.mrf.mxu0  ;;  %v5350_v49 = vmax.f32 %v2346_v45, 0.0 }
 0x3a9   : > { %v2388_v2 = vadd.f32 %v2387_v58, %v5336_v10  ;;  %v2425_v63 = vadd.f32 %v2424_v23, %v2410_v48  ;;  %v5348_v12 = vmax.f32 %v2338_v6, 0.0  ;;  %v2359_v40 = vadd.f32 %v4123_v44, %v5287_v59 }
 0x3aa   : > { %v2350_v31 = vpop.f32.mrf.mxu0  ;;  %v2414_v3 = vmul.f32 %v5350_v49, %v5350_v49 }
 0x3ab   : > { %v2426_v34 = vadd.f32 %v2425_v63, %v2411_v60  ;;  %v2389_v4 = vadd.f32 %v2388_v2, %v5348_v12  ;;  %v2412_v50 = vmul.f32 %v5348_v12, %v5348_v12  ;;  %v2351_v5 = vadd.f32 %v5287_v59, %v2350_v31 }
 0x3ac   : > { %v4124_v35 = vpop.f32.mrf.mxu0  ;;  %v5370_v16 = vmax.f32 %v2359_v40, 0.0 }
 0x3ad   : > { %v2390_v11 = vadd.f32 %v2389_v4, %v5343_v55  ;;  %v2427_v13 = vadd.f32 %v2426_v34, %v2412_v50  ;;  %v5359_v14 = vmax.f32 %v2351_v5, 0.0  ;;  %v2362_v53 = vadd.f32 %v4124_v35, %v5287_v59  ;;  %v2444_v34 = vld [vmem:[%s5994_s11] sm:$0x1] }
 0x3ae   : > { %v2353_v51 = vpop.f32.mrf.mxu0  ;;  %v2417_v1 = vmul.f32 %v5370_v16, %v5370_v16  ;;  %v2448_v5 = vld [vmem:[%s5995_s12] sm:$0x1] }
 0x3af   : > { %v2428_v28 = vadd.f32 %v2427_v13, %v2413_v39  ;;  %v2391_v26 = vadd.f32 %v2390_v11, %v5350_v49  ;;  %v2354_v54 = vadd.f32 %v5287_v59, %v2353_v51  ;;  %v2415_v20 = vmul.f32 %v5359_v14, %v5359_v14 }
 0x3b0   : > { %v5372_v57 = vmax.f32 %v2362_v53, 0.0 }
 0x3b1   : > { %v2392_v15 = vadd.f32 %v2391_v26, %v5359_v14  ;;  %v2429_v46 = vadd.f32 %v2428_v28, %v2414_v3  ;;  %v2378_v17 = vmax.f32 %v2354_v54, 0.0 }
 0x3b2   : > { %v2418_v62 = vmul.f32 %v5372_v57, %v5372_v57 }
 0x3b3   : > { %v2430_v52 = vadd.f32 %v2429_v46, %v2415_v20  ;;  %v2393_v47 = vadd.f32 %v2392_v15, %v2378_v17  ;;  %v2416_v56 = vmul.f32 %v2378_v17, %v2378_v17 }
 0x3b5   : > { %v2394_v8 = vadd.f32 %v2393_v47, %v5370_v16  ;;  %v2431_v59 = vadd.f32 %v2430_v52, %v2416_v56 }
 0x3b7   : > { %v2395_v25 = vadd.f32 %v2394_v8, %v5372_v57  ;;  %v2432_v33 = vadd.f32 %v2431_v59, %v2417_v1 }
 0x3b9   : > { %v2396_v43 = vrot.slane %v2395_v25, 4  ;;  %v2433_v37 = vadd.f32 %v2432_v33, %v2418_v62 }
 0x3bb   : > { %v2397_v30 = vadd.f32 %v2396_v43, %v2395_v25  ;;  %v2434_v27 = vrot.slane %v2433_v37, 4 }
 0x3bd   : > { %v2398_v32 = vrot.slane %v2397_v30, 2  ;;  %v2435_v22 = vadd.f32 %v2434_v27, %v2433_v37 }
 0x3bf   : > { %v2399_v9 = vadd.f32 %v2398_v32, %v2397_v30  ;;  %v2436_v24 = vrot.slane %v2435_v22, 2 }
 0x3c1   : > { %v2400_v45 = vrot.slane %v2399_v9, 1  ;;  %v2437_v36 = vadd.f32 %v2436_v24, %v2435_v22 }
 0x3c3   : > { %v2401_v48 = vadd.f32 %v2400_v45, %v2399_v9  ;;  %v2438_v23 = vrot.slane %v2437_v36, 1 }
 0x3c5   : > { %v2402_v58 = vmul.f32 0.0078125, %v2401_v48  ;;  %v2439_v6 = vadd.f32 %v2438_v23, %v2437_v36  ;;  %v4307_v36 = vld [vmem:[%s6000_s17 + $0x18] sm:$0xff]   ;;  %v4308_v48 = vld [vmem:[%s6000_s17 + $0x10] sm:$0xff]   ;;  %v4309_v23 = vld [vmem:[%s6000_s17 + $0x8] sm:$0xff]  }
 0x3c7   : > { %v2440_v44 = vmul.f32 0.0078125, %v2439_v6  ;;  %v2441_v2 = vmul.f32 %v2402_v58, %v2402_v58 }
 0x3c9   : > { %v2442_v60 = vsub.f32 %v2440_v44, %v2441_v2  ;;  %v5430_v44 = vld [vmem:[%s5997_s14] ss:$0 sm:$0xff] }
 0x3cb   : > { %v2443_v63 = vmax.f32 %v2442_v60, 0.0 }
 0x3cd   : > { %v2445_v31 = vadd.f32 1e-05, %v2443_v63 }
 0x3cf   : > { %4323 = vrsqrt.f32 %v2445_v31 }
 0x3dc   : > { %v4324_v4 = vpop.eup %4323 }
 0x3dd   : > { %v2447_v50 = vmul.f32 %v4324_v4, %v2444_v34 }
 0x3df   : > { %v2449_v35 = vmul.f32 %v2447_v50, %v2402_v58  ;;  %v2455_v39 = vrot.slane %v2447_v50, %v5095_v18  ;;  %v4310_v58 = vld [vmem:[%s6000_s17] sm:$0xff]  }
 0x3e1   : > { %v2450_v11 = vsub.f32 %v2448_v5, %v2449_v35  ;;  %v2470_v13 = vmul.f32 %v2455_v39, %v2378_v17  ;;  %v2457_v40 = vmul.f32 %v2455_v39, %v5292_v41  ;;  %v2458_v51 = vmul.f32 %v2455_v39, %v5297_v38 }
 0x3e2   : > { %v2459_v28 = vmul.f32 %v2455_v39, %v5295_v21  ;;  %v2460_v26 = vmul.f32 %v2455_v39, %v5299_v0  ;;  %v2461_v53 = vmul.f32 %v2455_v39, %v5312_v61  ;;  %v2462_v54 = vmul.f32 %v2455_v39, %v5324_v7 }
 0x3e3   : > { %v2477_v3 = vrot.slane %v2450_v11, %v5095_v18  ;;  %v2465_v15 = vmul.f32 %v2455_v39, %v5336_v10  ;;  %v2466_v20 = vmul.f32 %v2455_v39, %v5348_v12  ;;  %v2467_v46 = vmul.f32 %v2455_v39, %v5343_v55 }
 0x3e4   : > { %v2468_v21 = vmul.f32 %v2455_v39, %v5350_v49  ;;  %v2469_v0 = vmul.f32 %v2455_v39, %v5359_v14  ;;  %v2471_v33 = vmul.f32 %v2455_v39, %v5370_v16  ;;  %v2463_v43 = vmul.f32 %v2455_v39, %v5319_v19  ;;  %v4303_v19 = vld [vmem:[%s6000_s17 + $0x38] sm:$0xff]   ;;  %v4305_v16 = vld [vmem:[%s6000_s17 + $0x28] sm:$0xff]  }
 0x3e5   : > { %v2479_v17 = vadd.f32 %v2477_v3, %v2457_v40  ;;  %v2480_v41 = vadd.f32 %v2477_v3, %v2458_v51  ;;  %v2481_v52 = vadd.f32 %v2477_v3, %v2459_v28  ;;  %v2482_v38 = vadd.f32 %v2477_v3, %v2460_v26  ;;  %4157 = vmatprep.subr.bf16.mxu0 %v4303_v19 }
 0x3e6   : > { %v2483_v47 = vadd.f32 %v2477_v3, %v2461_v53  ;;  %v2484_v56 = vadd.f32 %v2477_v3, %v2462_v54  ;;  %v2487_v8 = vadd.f32 %v2477_v3, %v2465_v15  ;;  %v2488_v7 = vadd.f32 %v2477_v3, %v2466_v20  ;;  %4158 = vmatpush3.bf16.msra.mxu0 %v4303_v19 }
 0x3e7   : > { %v2495_v1 = vpack.c.bf16 %v2480_v41, %v2479_v17  ;;  %v2496_v61 = vpack.c.bf16 %v2482_v38, %v2481_v52  ;;  %v2489_v10 = vadd.f32 %v2477_v3, %v2467_v46  ;;  %v2490_v62 = vadd.f32 %v2477_v3, %v2468_v21 }
 0x3e8   : > { %v2497_v59 = vpack.c.bf16 %v2484_v56, %v2483_v47  ;;  %v2499_v12 = vpack.c.bf16 %v2488_v7, %v2487_v8  ;;  %v2491_v55 = vadd.f32 %v2477_v3, %v2469_v0  ;;  %v2492_v25 = vadd.f32 %v2477_v3, %v2470_v13 }
 0x3e9   : > { %4141 = vmatprep.mubr.bf16.mxu1 %v2495_v1  ;;  %v2464_v49 = vmul.f32 %v2455_v39, %v5326_v29  ;;  %v2500_v37 = vpack.c.bf16 %v2490_v62, %v2489_v10  ;;  %v2472_v14 = vmul.f32 %v2455_v39, %v5372_v57  ;;  %v2493_v27 = vadd.f32 %v2477_v3, %v2471_v33  ;;  %v4304_v29 = vld [vmem:[%s6000_s17 + $0x30] sm:$0xff]   ;;  %v4306_v57 = vld [vmem:[%s6000_s17 + $0x20] sm:$0xff]  }
 0x3ea   : > { %4142 = vmatmul.mubr.bf16.vlgmr.msra.gmra.mxu1 %v2496_v61  ;;  %v2501_v30 = vpack.c.bf16 %v2492_v25, %v2491_v55  ;;  %v2485_v32 = vadd.f32 %v2477_v3, %v2463_v43  ;;  %4159 = vmatprep.subr.bf16.mxu0 %v4304_v29 }
 0x3eb   : > { %4145 = vmatprep.mubr.bf16.mxu1 %v2497_v59  ;;  %v2486_v22 = vadd.f32 %v2477_v3, %v2464_v49  ;;  %v2494_v9 = vadd.f32 %v2477_v3, %v2472_v14  ;;  %4160 = vmatpush3.bf16.msra.mxu0 %v4304_v29 }
 0x3ec   : > { %4161 = vmatprep.subr.bf16.mxu0 %v4305_v16 }
 0x3ed   : > { %v2502_v24 = vpack.c.bf16 %v2494_v9, %v2493_v27  ;;  %v2498_v45 = vpack.c.bf16 %v2486_v22, %v2485_v32 }
 0x3ef   : > { %4162 = vmatpush3.bf16.msra.mxu0 %v4305_v16 }
 0x3f0   : > { %4163 = vmatprep.subr.bf16.mxu0 %v4306_v57 }
 0x3f2   : > { %4146 = vmatmul.mubr.bf16.gmra.mxu1 %v2498_v45 }
 0x3f3   : > { %4149 = vmatprep.mubr.bf16.mxu1 %v2499_v12  ;;  %4164 = vmatpush3.bf16.msra.mxu0 %v4306_v57 }
 0x3f4   : > { %4165 = vmatprep.subr.bf16.mxu0 %v4307_v36 }
 0x3f7   : > { %4166 = vmatpush3.bf16.msra.mxu0 %v4307_v36 }
 0x3f8   : > { %4167 = vmatprep.subr.bf16.mxu0 %v4308_v48 }
 0x3fa   : > { %4150 = vmatmul.mubr.bf16.gmra.mxu1 %v2500_v37 }
 0x3fb   : > { %4153 = vmatprep.mubr.bf16.mxu1 %v2501_v30  ;;  %4168 = vmatpush3.bf16.msra.mxu0 %v4308_v48 }
 0x3fc   : > { %4169 = vmatprep.subr.bf16.mxu0 %v4309_v23 }
 0x3ff   : > { %4170 = vmatpush3.bf16.msra.mxu0 %v4309_v23 }
 0x400   : > { %4171 = vmatprep.subr.bf16.mxu0 %v4310_v58 }
 0x402   : > { %4154 = vmatmul.mubr.bf16.gmra.mxu1 %v2502_v24 }
 0x403   : > { %4172 = vmatpush3.bf16.msra.mxu0 %v4310_v58 }
 0x4aa   : > { %v4143_v6 = vpop.f32.mrf.mxu1 }
 0x4ab   : > { %v2617_v31 = vadd.f32 %v4143_v6, %v5430_v44 }
 0x4ac   : > { %v2608_v2 = vpop.f32.mrf.mxu1 }
 0x4ad   : > { %v2609_v60 = vadd.f32 %v5430_v44, %v2608_v2  ;;  %v5438_v39 = vmax.f32 %v2617_v31, 0.0 }
 0x4ae   : > { %v4144_v63 = vpop.f32.mrf.mxu1 }
 0x4af   : > { %v2620_v34 = vadd.f32 %v4144_v63, %v5430_v44  ;;  %v5435_v50 = vmax.f32 %v2609_v60, 0.0  ;;  %v2711_v15 = vmul.f32 %v5438_v39, %v5438_v39 }
 0x4b0   : > { %v2611_v4 = vpop.f32.mrf.mxu1 }
 0x4b1   : > { %v2612_v5 = vadd.f32 %v5430_v44, %v2611_v4  ;;  %v5442_v13 = vmax.f32 %v2620_v34, 0.0  ;;  %v2709_v51 = vmul.f32 %v5435_v50, %v5435_v50 }
 0x4b2   : > { %v4147_v35 = vpop.f32.mrf.mxu1 }
 0x4b3   : > { %v5440_v11 = vmax.f32 %v2612_v5, 0.0  ;;  %v2633_v53 = vadd.f32 %v4147_v35, %v5430_v44  ;;  %v2712_v41 = vmul.f32 %v5442_v13, %v5442_v13 }
 0x4b4   : > { %v2624_v40 = vpop.f32.mrf.mxu1 }
 0x4b5   : > { %v2687_v3 = vadd.f32 %v5440_v11, %v5435_v50  ;;  %v2710_v28 = vmul.f32 %v5440_v11, %v5440_v11  ;;  %v2625_v26 = vadd.f32 %v5430_v44, %v2624_v40  ;;  %v5462_v0 = vmax.f32 %v2633_v53, 0.0 }
 0x4b6   : > { %v4148_v54 = vpop.f32.mrf.mxu1 }
 0x4b7   : > { %v2688_v20 = vadd.f32 %v2687_v3, %v5438_v39  ;;  %v2725_v46 = vadd.f32 %v2710_v28, %v2709_v51  ;;  %v5455_v17 = vmax.f32 %v2625_v26, 0.0  ;;  %v2636_v56 = vadd.f32 %v4148_v54, %v5430_v44 }
 0x4b8   : > { %v2627_v52 = vpop.f32.mrf.mxu1  ;;  %v2715_v37 = vmul.f32 %v5462_v0, %v5462_v0 }
 0x4b9   : > { %v2726_v38 = vadd.f32 %v2725_v46, %v2711_v15  ;;  %v2689_v47 = vadd.f32 %v2688_v20, %v5442_v13  ;;  %v2628_v21 = vadd.f32 %v5430_v44, %v2627_v52  ;;  %v2713_v8 = vmul.f32 %v5455_v17, %v5455_v17 }
 0x4ba   : > { %v4151_v1 = vpop.f32.mrf.mxu1  ;;  %v5469_v12 = vmax.f32 %v2636_v56, 0.0 }
 0x4bb   : > { %v2690_v61 = vadd.f32 %v2689_v47, %v5455_v17  ;;  %v2727_v7 = vadd.f32 %v2726_v38, %v2712_v41  ;;  %v5467_v59 = vmax.f32 %v2628_v21, 0.0  ;;  %v2649_v33 = vadd.f32 %v4151_v1, %v5430_v44 }
 0x4bc   : > { %v2640_v10 = vpop.f32.mrf.mxu1  ;;  %v2716_v9 = vmul.f32 %v5469_v12, %v5469_v12 }
 0x4bd   : > { %v2728_v62 = vadd.f32 %v2727_v7, %v2713_v8  ;;  %v2691_v55 = vadd.f32 %v2690_v61, %v5467_v59  ;;  %v2714_v25 = vmul.f32 %v5467_v59, %v5467_v59  ;;  %v2641_v43 = vadd.f32 %v5430_v44, %v2640_v10 }
 0x4be   : > { %v4152_v49 = vpop.f32.mrf.mxu1  ;;  %v5486_v29 = vmax.f32 %v2649_v33, 0.0 }
 0x4bf   : > { %v2692_v14 = vadd.f32 %v2691_v55, %v5462_v0  ;;  %v2729_v30 = vadd.f32 %v2728_v62, %v2714_v25  ;;  %v5479_v27 = vmax.f32 %v2641_v43, 0.0  ;;  %v2652_v32 = vadd.f32 %v4152_v49, %v5430_v44 }
 0x4c0   : > { %v2643_v22 = vpop.f32.mrf.mxu1  ;;  %v2719_v4 = vmul.f32 %v5486_v29, %v5486_v29 }
 0x4c1   : > { %v2730_v24 = vadd.f32 %v2729_v30, %v2715_v37  ;;  %v2693_v45 = vadd.f32 %v2692_v14, %v5469_v12  ;;  %v2644_v19 = vadd.f32 %v5430_v44, %v2643_v22  ;;  %v2717_v36 = vmul.f32 %v5479_v27, %v5479_v27 }
 0x4c2   : > { %v4155_v16 = vpop.f32.mrf.mxu1  ;;  %v5493_v58 = vmax.f32 %v2652_v32, 0.0 }
 0x4c3   : > { %v2694_v57 = vadd.f32 %v2693_v45, %v5479_v27  ;;  %v2731_v48 = vadd.f32 %v2730_v24, %v2716_v9  ;;  %v5491_v23 = vmax.f32 %v2644_v19, 0.0  ;;  %v2665_v51 = vadd.f32 %v4155_v16, %v5430_v44 }
 0x4c4   : > { %v2656_v6 = vpop.f32.mrf.mxu1  ;;  %v2720_v28 = vmul.f32 %v5493_v58, %v5493_v58 }
 0x4c5   : > { %v2732_v2 = vadd.f32 %v2731_v48, %v2717_v36  ;;  %v2695_v60 = vadd.f32 %v2694_v57, %v5491_v23  ;;  %v2718_v63 = vmul.f32 %v5491_v23, %v5491_v23  ;;  %v2657_v31 = vadd.f32 %v5430_v44, %v2656_v6 }
 0x4c6   : > { %v4156_v34 = vpop.f32.mrf.mxu1  ;;  %v5513_v52 = vmax.f32 %v2665_v51, 0.0 }
 0x4c7   : > { %v2696_v5 = vadd.f32 %v2695_v60, %v5486_v29  ;;  %v2733_v35 = vadd.f32 %v2732_v2, %v2718_v63  ;;  %v5502_v40 = vmax.f32 %v2657_v31, 0.0  ;;  %v2668_v54 = vadd.f32 %v4156_v34, %v5430_v44  ;;  %v2750_v2 = vld [vmem:[%s5998_s15] sm:$0x1] }
 0x4c8   : > { %v2659_v3 = vpop.f32.mrf.mxu1  ;;  %v2723_v61 = vmul.f32 %v5513_v52, %v5513_v52  ;;  %v2754_v31 = vld [vmem:[%s5999_s16] sm:$0x1] }
 0x4c9   : > { %v2734_v26 = vadd.f32 %v2733_v35, %v2719_v4  ;;  %v2697_v53 = vadd.f32 %v2696_v5, %v5493_v58  ;;  %v2660_v15 = vadd.f32 %v5430_v44, %v2659_v3  ;;  %v2721_v46 = vmul.f32 %v5502_v40, %v5502_v40 }
 0x4ca   : > { %v5515_v56 = vmax.f32 %v2668_v54, 0.0 }
 0x4cb   : > { %v2698_v20 = vadd.f32 %v2697_v53, %v5502_v40  ;;  %v2735_v41 = vadd.f32 %v2734_v26, %v2720_v28  ;;  %v2684_v38 = vmax.f32 %v2660_v15, 0.0 }
 0x4cc   : > { %v2724_v7 = vmul.f32 %v5515_v56, %v5515_v56 }
 0x4cd   : > { %v2736_v47 = vadd.f32 %v2735_v41, %v2721_v46  ;;  %v2699_v21 = vadd.f32 %v2698_v20, %v2684_v38  ;;  %v2722_v1 = vmul.f32 %v2684_v38, %v2684_v38 }
 0x4cf   : > { %v2700_v8 = vadd.f32 %v2699_v21, %v5513_v52  ;;  %v2737_v44 = vadd.f32 %v2736_v47, %v2722_v1 }
 0x4d1   : > { %v2701_v10 = vadd.f32 %v2700_v8, %v5515_v56  ;;  %v2738_v62 = vadd.f32 %v2737_v44, %v2723_v61 }
 0x4d3   : > { %v2702_v55 = vrot.slane %v2701_v10, 4  ;;  %v2739_v25 = vadd.f32 %v2738_v62, %v2724_v7 }
 0x4d5   : > { %v2703_v33 = vadd.f32 %v2702_v55, %v2701_v10  ;;  %v2740_v43 = vrot.slane %v2739_v25, 4 }
 0x4d7   : > { %v2704_v49 = vrot.slane %v2703_v33, 2  ;;  %v2741_v37 = vadd.f32 %v2740_v43, %v2739_v25 }
 0x4d9   : > { %v2705_v14 = vadd.f32 %v2704_v49, %v2703_v33  ;;  %v2742_v30 = vrot.slane %v2741_v37, 2 }
 0x4db   : > { %v2706_v32 = vrot.slane %v2705_v14, 1  ;;  %v2743_v22 = vadd.f32 %v2742_v30, %v2741_v37 }
 0x4dd   : > { %v2707_v9 = vadd.f32 %v2706_v32, %v2705_v14  ;;  %v2744_v24 = vrot.slane %v2743_v22, 1 }
 0x4df   : > { %v2708_v45 = vmul.f32 0.0078125, %v2707_v9  ;;  %v2745_v19 = vadd.f32 %v2744_v24, %v2743_v22  ;;  %v4315_v22 = vld [vmem:[%s6004_s21 + $0x18] sm:$0xff]   ;;  %v4316_v9 = vld [vmem:[%s6004_s21 + $0x10] sm:$0xff]   ;;  %v4317_v24 = vld [vmem:[%s6004_s21 + $0x8] sm:$0xff]  }
 0x4e1   : > { %v2746_v16 = vmul.f32 0.0078125, %v2745_v19  ;;  %v2747_v57 = vmul.f32 %v2708_v45, %v2708_v45 }
 0x4e3   : > { %v2748_v36 = vsub.f32 %v2746_v16, %v2747_v57  ;;  %v5573_v16 = vld [vmem:[%s6001_s18] ss:$0 sm:$0xff] }
 0x4e5   : > { %v2749_v48 = vmax.f32 %v2748_v36, 0.0 }
 0x4e7   : > { %v2751_v6 = vadd.f32 1e-05, %v2749_v48 }
 0x4e9   : > { %4325 = vrsqrt.f32 %v2751_v6 }
 0x4f6   : > { %v4326_v60 = vpop.eup %4325 }
 0x4f7   : > { %v2753_v63 = vmul.f32 %v4326_v60, %v2750_v2 }
 0x4f9   : > { %v2755_v34 = vmul.f32 %v2753_v63, %v2708_v45  ;;  %v2761_v4 = vrot.slane %v2753_v63, %v5095_v18  ;;  %v4318_v45 = vld [vmem:[%s6004_s21] sm:$0xff]  }
 0x4fb   : > { %v2756_v5 = vsub.f32 %v2754_v31, %v2755_v34  ;;  %v2776_v35 = vmul.f32 %v2761_v4, %v2684_v38  ;;  %v2763_v51 = vmul.f32 %v2761_v4, %v5435_v50  ;;  %v2764_v3 = vmul.f32 %v2761_v4, %v5440_v11 }
 0x4fc   : > { %v2765_v26 = vmul.f32 %v2761_v4, %v5438_v39  ;;  %v2766_v53 = vmul.f32 %v2761_v4, %v5442_v13  ;;  %v2767_v54 = vmul.f32 %v2761_v4, %v5455_v17  ;;  %v2768_v15 = vmul.f32 %v2761_v4, %v5467_v59 }
 0x4fd   : > { %v2783_v28 = vrot.slane %v2756_v5, %v5095_v18  ;;  %v2771_v20 = vmul.f32 %v2761_v4, %v5479_v27  ;;  %v2772_v46 = vmul.f32 %v2761_v4, %v5491_v23  ;;  %v2773_v41 = vmul.f32 %v2761_v4, %v5486_v29 }
 0x4fe   : > { %v2774_v39 = vmul.f32 %v2761_v4, %v5493_v58  ;;  %v2775_v13 = vmul.f32 %v2761_v4, %v5502_v40  ;;  %v2777_v62 = vmul.f32 %v2761_v4, %v5513_v52  ;;  %v2769_v55 = vmul.f32 %v2761_v4, %v5462_v0  ;;  %v4311_v0 = vld [vmem:[%s6004_s21 + $0x38] sm:$0xff]   ;;  %v4313_v52 = vld [vmem:[%s6004_s21 + $0x28] sm:$0xff]  }
 0x4ff   : > { %v2785_v38 = vadd.f32 %v2783_v28, %v2763_v51  ;;  %v2786_v50 = vadd.f32 %v2783_v28, %v2764_v3  ;;  %v2787_v47 = vadd.f32 %v2783_v28, %v2765_v26  ;;  %v2788_v11 = vadd.f32 %v2783_v28, %v2766_v53  ;;  %4189 = vmatprep.subr.bf16.mxu1 %v4311_v0 }
 0x500   : > { %v2789_v21 = vadd.f32 %v2783_v28, %v2767_v54  ;;  %v2790_v1 = vadd.f32 %v2783_v28, %v2768_v15  ;;  %v2793_v8 = vadd.f32 %v2783_v28, %v2771_v20  ;;  %v2794_v59 = vadd.f32 %v2783_v28, %v2772_v46  ;;  %4190 = vmatpush3.bf16.msra.mxu1 %v4311_v0 }
 0x501   : > { %v2801_v61 = vpack.c.bf16 %v2786_v50, %v2785_v38  ;;  %v2802_v17 = vpack.c.bf16 %v2788_v11, %v2787_v47  ;;  %v2795_v27 = vadd.f32 %v2783_v28, %v2773_v41  ;;  %v2796_v7 = vadd.f32 %v2783_v28, %v2774_v39 }
 0x502   : > { %v2803_v44 = vpack.c.bf16 %v2790_v1, %v2789_v21  ;;  %v2805_v23 = vpack.c.bf16 %v2794_v59, %v2793_v8  ;;  %v2797_v29 = vadd.f32 %v2783_v28, %v2775_v13  ;;  %v2798_v10 = vadd.f32 %v2783_v28, %v2776_v35 }
 0x503   : > { %4173 = vmatprep.mubr.bf16.mxu0 %v2801_v61  ;;  %v2770_v58 = vmul.f32 %v2761_v4, %v5469_v12  ;;  %v2806_v25 = vpack.c.bf16 %v2796_v7, %v2795_v27  ;;  %v2778_v40 = vmul.f32 %v2761_v4, %v5515_v56  ;;  %v2799_v43 = vadd.f32 %v2783_v28, %v2777_v62  ;;  %v4312_v12 = vld [vmem:[%s6004_s21 + $0x30] sm:$0xff]   ;;  %v4314_v56 = vld [vmem:[%s6004_s21 + $0x20] sm:$0xff]  }
 0x504   : > { %4174 = vmatmul.mubr.bf16.vlgmr.msra.gmra.mxu0 %v2802_v17  ;;  %v2807_v33 = vpack.c.bf16 %v2798_v10, %v2797_v29  ;;  %v2791_v49 = vadd.f32 %v2783_v28, %v2769_v55  ;;  %4191 = vmatprep.subr.bf16.mxu1 %v4312_v12 }
 0x505   : > { %4177 = vmatprep.mubr.bf16.mxu0 %v2803_v44  ;;  %v2792_v37 = vadd.f32 %v2783_v28, %v2770_v58  ;;  %v2800_v14 = vadd.f32 %v2783_v28, %v2778_v40  ;;  %4192 = vmatpush3.bf16.msra.mxu1 %v4312_v12 }
 0x506   : > { %4193 = vmatprep.subr.bf16.mxu1 %v4313_v52 }
 0x507   : > { %v2808_v30 = vpack.c.bf16 %v2800_v14, %v2799_v43  ;;  %v2804_v32 = vpack.c.bf16 %v2792_v37, %v2791_v49 }
 0x509   : > { %4194 = vmatpush3.bf16.msra.mxu1 %v4313_v52 }
 0x50a   : > { %4195 = vmatprep.subr.bf16.mxu1 %v4314_v56 }
 0x50c   : > { %4178 = vmatmul.mubr.bf16.gmra.mxu0 %v2804_v32 }
 0x50d   : > { %4181 = vmatprep.mubr.bf16.mxu0 %v2805_v23  ;;  %4196 = vmatpush3.bf16.msra.mxu1 %v4314_v56 }
 0x50e   : > { %4197 = vmatprep.subr.bf16.mxu1 %v4315_v22 }
 0x511   : > { %4198 = vmatpush3.bf16.msra.mxu1 %v4315_v22 }
 0x512   : > { %4199 = vmatprep.subr.bf16.mxu1 %v4316_v9 }
 0x514   : > { %4182 = vmatmul.mubr.bf16.gmra.mxu0 %v2806_v25 }
 0x515   : > { %4185 = vmatprep.mubr.bf16.mxu0 %v2807_v33  ;;  %4200 = vmatpush3.bf16.msra.mxu1 %v4316_v9 }
 0x516   : > { %4201 = vmatprep.subr.bf16.mxu1 %v4317_v24 }
 0x519   : > { %4202 = vmatpush3.bf16.msra.mxu1 %v4317_v24 }
 0x51a   : > { %4203 = vmatprep.subr.bf16.mxu1 %v4318_v45 }
 0x51c   : > { %4186 = vmatmul.mubr.bf16.gmra.mxu0 %v2808_v30 }
 0x51d   : > { %4204 = vmatpush3.bf16.msra.mxu1 %v4318_v45 }
 0x5c4   : > { %v4175_v19 = vpop.f32.mrf.mxu0 }
 0x5c5   : > { %v2923_v6 = vadd.f32 %v4175_v19, %v5573_v16 }
 0x5c6   : > { %v2914_v57 = vpop.f32.mrf.mxu0 }
 0x5c7   : > { %v2915_v36 = vadd.f32 %v5573_v16, %v2914_v57  ;;  %v5581_v4 = vmax.f32 %v2923_v6, 0.0 }
 0x5c8   : > { %v4176_v48 = vpop.f32.mrf.mxu0 }
 0x5c9   : > { %v2926_v2 = vadd.f32 %v4176_v48, %v5573_v16  ;;  %v5578_v63 = vmax.f32 %v2915_v36, 0.0  ;;  %v3017_v20 = vmul.f32 %v5581_v4, %v5581_v4 }
 0x5ca   : > { %v2917_v60 = vpop.f32.mrf.mxu0 }
 0x5cb   : > { %v2918_v31 = vadd.f32 %v5573_v16, %v2917_v60  ;;  %v5585_v35 = vmax.f32 %v2926_v2, 0.0  ;;  %v3015_v3 = vmul.f32 %v5578_v63, %v5578_v63 }
 0x5cc   : > { %v4179_v34 = vpop.f32.mrf.mxu0 }
 0x5cd   : > { %v5583_v5 = vmax.f32 %v2918_v31, 0.0  ;;  %v2939_v54 = vadd.f32 %v4179_v34, %v5573_v16  ;;  %v3018_v50 = vmul.f32 %v5585_v35, %v5585_v35 }
 0x5ce   : > { %v2930_v51 = vpop.f32.mrf.mxu0 }
 0x5cf   : > { %v2993_v28 = vadd.f32 %v5583_v5, %v5578_v63  ;;  %v3016_v26 = vmul.f32 %v5583_v5, %v5583_v5  ;;  %v2931_v53 = vadd.f32 %v5573_v16, %v2930_v51  ;;  %v5605_v13 = vmax.f32 %v2939_v54, 0.0 }
 0x5d0   : > { %v4180_v15 = vpop.f32.mrf.mxu0 }
 0x5d1   : > { %v2994_v46 = vadd.f32 %v2993_v28, %v5581_v4  ;;  %v3031_v41 = vadd.f32 %v3016_v26, %v3015_v3  ;;  %v5598_v38 = vmax.f32 %v2931_v53, 0.0  ;;  %v2942_v1 = vadd.f32 %v4180_v15, %v5573_v16 }
 0x5d2   : > { %v2933_v47 = vpop.f32.mrf.mxu0  ;;  %v3021_v25 = vmul.f32 %v5605_v13, %v5605_v13 }
 0x5d3   : > { %v3032_v11 = vadd.f32 %v3031_v41, %v3017_v20  ;;  %v2995_v21 = vadd.f32 %v2994_v46, %v5585_v35  ;;  %v2934_v39 = vadd.f32 %v5573_v16, %v2933_v47  ;;  %v3019_v8 = vmul.f32 %v5598_v38, %v5598_v38 }
 0x5d4   : > { %v4183_v61 = vpop.f32.mrf.mxu0  ;;  %v5612_v23 = vmax.f32 %v2942_v1, 0.0 }
 0x5d5   : > { %v2996_v17 = vadd.f32 %v2995_v21, %v5598_v38  ;;  %v3033_v59 = vadd.f32 %v3032_v11, %v3018_v50  ;;  %v5610_v44 = vmax.f32 %v2934_v39, 0.0  ;;  %v2955_v62 = vadd.f32 %v4183_v61, %v5573_v16 }
 0x5d6   : > { %v2946_v27 = vpop.f32.mrf.mxu0  ;;  %v3022_v14 = vmul.f32 %v5612_v23, %v5612_v23 }
 0x5d7   : > { %v3034_v7 = vadd.f32 %v3033_v59, %v3019_v8  ;;  %v2997_v29 = vadd.f32 %v2996_v17, %v5610_v44  ;;  %v3020_v10 = vmul.f32 %v5610_v44, %v5610_v44  ;;  %v2947_v55 = vadd.f32 %v5573_v16, %v2946_v27 }
 0x5d8   : > { %v4184_v58 = vpop.f32.mrf.mxu0  ;;  %v5629_v12 = vmax.f32 %v2955_v62, 0.0 }
 0x5d9   : > { %v2998_v40 = vadd.f32 %v2997_v29, %v5605_v13  ;;  %v3035_v33 = vadd.f32 %v3034_v7, %v3020_v10  ;;  %v5622_v43 = vmax.f32 %v2947_v55, 0.0  ;;  %v2958_v49 = vadd.f32 %v4184_v58, %v5573_v16 }
 0x5da   : > { %v2949_v37 = vpop.f32.mrf.mxu0  ;;  %v3025_v60 = vmul.f32 %v5629_v12, %v5629_v12 }
 0x5db   : > { %v3036_v30 = vadd.f32 %v3035_v33, %v3021_v25  ;;  %v2999_v32 = vadd.f32 %v2998_v40, %v5612_v23  ;;  %v2950_v0 = vadd.f32 %v5573_v16, %v2949_v37  ;;  %v3023_v22 = vmul.f32 %v5622_v43, %v5622_v43 }
 0x5dc   : > { %v4187_v52 = vpop.f32.mrf.mxu0  ;;  %v5636_v45 = vmax.f32 %v2958_v49, 0.0 }
 0x5dd   : > { %v3000_v56 = vadd.f32 %v2999_v32, %v5622_v43  ;;  %v3037_v9 = vadd.f32 %v3036_v30, %v3022_v14  ;;  %v5634_v24 = vmax.f32 %v2950_v0, 0.0  ;;  %v2971_v3 = vadd.f32 %v4187_v52, %v5573_v16 }
 0x5de   : > { %v2962_v19 = vpop.f32.mrf.mxu0  ;;  %v3026_v26 = vmul.f32 %v5636_v45, %v5636_v45 }
 0x5df   : > { %v3038_v57 = vadd.f32 %v3037_v9, %v3023_v22  ;;  %v3001_v36 = vadd.f32 %v3000_v56, %v5634_v24  ;;  %v3024_v48 = vmul.f32 %v5634_v24, %v5634_v24  ;;  %v2963_v6 = vadd.f32 %v5573_v16, %v2962_v19 }
 0x5e0   : > { %v4188_v2 = vpop.f32.mrf.mxu0  ;;  %v5656_v47 = vmax.f32 %v2971_v3, 0.0 }
 0x5e1   : > { %v3002_v31 = vadd.f32 %v3001_v36, %v5629_v12  ;;  %v3039_v34 = vadd.f32 %v3038_v57, %v3024_v48  ;;  %v5645_v51 = vmax.f32 %v2963_v6, 0.0  ;;  %v2974_v15 = vadd.f32 %v4188_v2, %v5573_v16  ;;  %v3056_v57 = vld [vmem:[%s6002_s19] sm:$0x1] }
 0x5e2   : > { %v2965_v28 = vpop.f32.mrf.mxu0  ;;  %v3029_v17 = vmul.f32 %v5656_v47, %v5656_v47  ;;  %v3060_v6 = vld [vmem:[%s6003_s20] sm:$0x1] }
 0x5e3   : > { %v3040_v53 = vadd.f32 %v3039_v34, %v3025_v60  ;;  %v3003_v54 = vadd.f32 %v3002_v31, %v5636_v45  ;;  %v2966_v20 = vadd.f32 %v5573_v16, %v2965_v28  ;;  %v3027_v41 = vmul.f32 %v5645_v51, %v5645_v51 }
 0x5e4   : > { %v5658_v1 = vmax.f32 %v2974_v15, 0.0 }
 0x5e5   : > { %v3004_v46 = vadd.f32 %v3003_v54, %v5645_v51  ;;  %v3041_v50 = vadd.f32 %v3040_v53, %v3026_v26  ;;  %v2990_v11 = vmax.f32 %v2966_v20, 0.0 }
 0x5e6   : > { %v3030_v59 = vmul.f32 %v5658_v1, %v5658_v1 }
 0x5e7   : > { %v3042_v21 = vadd.f32 %v3041_v50, %v3027_v41  ;;  %v3005_v39 = vadd.f32 %v3004_v46, %v2990_v11  ;;  %v3028_v61 = vmul.f32 %v2990_v11, %v2990_v11 }
 0x5e9   : > { %v3006_v8 = vadd.f32 %v3005_v39, %v5656_v47  ;;  %v3043_v16 = vadd.f32 %v3042_v21, %v3028_v61 }
 0x5eb   : > { %v3007_v27 = vadd.f32 %v3006_v8, %v5658_v1  ;;  %v3044_v7 = vadd.f32 %v3043_v16, %v3029_v17 }
 0x5ed   : > { %v3008_v29 = vrot.slane %v3007_v27, 4  ;;  %v3045_v10 = vadd.f32 %v3044_v7, %v3030_v59 }
 0x5ef   : > { %v3009_v62 = vadd.f32 %v3008_v29, %v3007_v27  ;;  %v3046_v55 = vrot.slane %v3045_v10, 4 }
 0x5f1   : > { %v3010_v58 = vrot.slane %v3009_v62, 2  ;;  %v3047_v25 = vadd.f32 %v3046_v55, %v3045_v10 }
 0x5f3   : > { %v3011_v40 = vadd.f32 %v3010_v58, %v3009_v62  ;;  %v3048_v33 = vrot.slane %v3047_v25, 2 }
 0x5f5   : > { %v3012_v49 = vrot.slane %v3011_v40, 1  ;;  %v3049_v37 = vadd.f32 %v3048_v33, %v3047_v25 }
 0x5f7   : > { %v3013_v14 = vadd.f32 %v3012_v49, %v3011_v40  ;;  %v3050_v30 = vrot.slane %v3049_v37, 1 }
 0x5f9   : > { %v3014_v32 = vmul.f32 0.0078125, %v3013_v14  ;;  %v3051_v0 = vadd.f32 %v3050_v30, %v3049_v37 }
 0x5fb   : > { %v3052_v52 = vmul.f32 0.0078125, %v3051_v0  ;;  %v3053_v56 = vmul.f32 %v3014_v32, %v3014_v32 }
 0x5fd   : > { %v3054_v22 = vsub.f32 %v3052_v52, %v3053_v56 }
 0x5ff   : > { %v3055_v9 = vmax.f32 %v3054_v22, 0.0 }
 0x601   : > { %v3057_v19 = vadd.f32 1e-05, %v3055_v9 }
 0x603   : > { %4327 = vrsqrt.f32 %v3057_v19 }
 0x610   : > { %v4328_v36 = vpop.eup %4327 }
 0x611   : > { %v3059_v48 = vmul.f32 %v4328_v36, %v3056_v57 }
 0x613   : > { %v3061_v2 = vmul.f32 %v3059_v48, %v3014_v32  ;;  %v3067_v60 = vrot.slane %v3059_v48, %v5095_v18 }
 0x615   : > { %v3062_v31 = vsub.f32 %v3060_v6, %v3061_v2  ;;  %v3082_v34 = vmul.f32 %v3067_v60, %v2990_v11  ;;  %v3069_v3 = vmul.f32 %v3067_v60, %v5578_v63  ;;  %v3070_v28 = vmul.f32 %v3067_v60, %v5583_v5 }
 0x616   : > { %v3071_v53 = vmul.f32 %v3067_v60, %v5581_v4  ;;  %v3072_v54 = vmul.f32 %v3067_v60, %v5585_v35  ;;  %v3073_v15 = vmul.f32 %v3067_v60, %v5598_v38  ;;  %v3074_v20 = vmul.f32 %v3067_v60, %v5610_v44 }
 0x617   : > { %v3089_v26 = vrot.slane %v3062_v31, %v5095_v18  ;;  %v3077_v46 = vmul.f32 %v3067_v60, %v5622_v43  ;;  %v3078_v41 = vmul.f32 %v3067_v60, %v5634_v24  ;;  %v3079_v50 = vmul.f32 %v3067_v60, %v5629_v12 }
 0x618   : > { %v3080_v4 = vmul.f32 %v3067_v60, %v5636_v45  ;;  %v3081_v35 = vmul.f32 %v3067_v60, %v5645_v51  ;;  %v3083_v7 = vmul.f32 %v3067_v60, %v5656_v47  ;;  %v3075_v29 = vmul.f32 %v3067_v60, %v5605_v13  ;;  %v5692_v13 = vld [vmem:[%s6005_s22] ss:$0 sm:$0xff] }
 0x619   : > { %v3091_v11 = vadd.f32 %v3089_v26, %v3069_v3  ;;  %v3092_v63 = vadd.f32 %v3089_v26, %v3070_v28  ;;  %v3093_v21 = vadd.f32 %v3089_v26, %v3071_v53  ;;  %v3094_v5 = vadd.f32 %v3089_v26, %v3072_v54 }
 0x61a   : > { %v3095_v39 = vadd.f32 %v3089_v26, %v3073_v15  ;;  %v3096_v61 = vadd.f32 %v3089_v26, %v3074_v20  ;;  %v3099_v8 = vadd.f32 %v3089_v26, %v3077_v46  ;;  %v3100_v44 = vadd.f32 %v3089_v26, %v3078_v41 }
 0x61b   : > { %v3107_v17 = vpack.c.bf16 %v3092_v63, %v3091_v11  ;;  %v3108_v38 = vpack.c.bf16 %v3094_v5, %v3093_v21  ;;  %v3101_v43 = vadd.f32 %v3089_v26, %v3079_v50  ;;  %v3102_v59 = vadd.f32 %v3089_v26, %v3080_v4 }
 0x61c   : > { %v3109_v16 = vpack.c.bf16 %v3096_v61, %v3095_v39  ;;  %v3111_v24 = vpack.c.bf16 %v3100_v44, %v3099_v8  ;;  %v3103_v12 = vadd.f32 %v3089_v26, %v3081_v35  ;;  %v3104_v27 = vadd.f32 %v3089_v26, %v3082_v34 }
 0x61d   : > { %4205 = vmatprep.mubr.bf16.mxu1 %v3107_v17  ;;  %v3076_v45 = vmul.f32 %v3067_v60, %v5612_v23  ;;  %v3112_v10 = vpack.c.bf16 %v3102_v59, %v3101_v43  ;;  %v3084_v51 = vmul.f32 %v3067_v60, %v5658_v1  ;;  %v3105_v55 = vadd.f32 %v3089_v26, %v3083_v7 }
 0x61e   : > { %4206 = vmatmul.mubr.bf16.vlgmr.msra.gmra.mxu1 %v3108_v38  ;;  %v3113_v62 = vpack.c.bf16 %v3104_v27, %v3103_v12  ;;  %v3097_v58 = vadd.f32 %v3089_v26, %v3075_v29 }
 0x61f   : > { %4209 = vmatprep.mubr.bf16.mxu1 %v3109_v16  ;;  %v3098_v25 = vadd.f32 %v3089_v26, %v3076_v45  ;;  %v3106_v40 = vadd.f32 %v3089_v26, %v3084_v51 }
 0x621   : > { %v3114_v33 = vpack.c.bf16 %v3106_v40, %v3105_v55  ;;  %v3110_v49 = vpack.c.bf16 %v3098_v25, %v3097_v58 }
 0x626   : > { %4210 = vmatmul.mubr.bf16.gmra.mxu1 %v3110_v49 }
 0x627   : > { %4213 = vmatprep.mubr.bf16.mxu1 %v3111_v24 }
 0x62e   : > { %4214 = vmatmul.mubr.bf16.gmra.mxu1 %v3112_v10 }
 0x62f   : > { %4217 = vmatprep.mubr.bf16.mxu1 %v3113_v62 }
 0x636   : > { %4218 = vmatmul.mubr.bf16.gmra.mxu1 %v3114_v33 }
 0x6de   : > { %v4207_v47 = vpop.f32.mrf.mxu1 }
 0x6df   : > { %v3229_v14 = vadd.f32 %v4207_v47, %v5692_v13 }
 0x6e0   : > { %v3220_v23 = vpop.f32.mrf.mxu1 }
 0x6e1   : > { %v3221_v1 = vadd.f32 %v5692_v13, %v3220_v23  ;;  %v5700_v22 = vmax.f32 %v3229_v14, 0.0 }
 0x6e2   : > { %v4208_v37 = vpop.f32.mrf.mxu1 }
 0x6e3   : > { %v3232_v30 = vadd.f32 %v4208_v37, %v5692_v13  ;;  %v5697_v0 = vmax.f32 %v3221_v1, 0.0  ;;  %v3323_v34 = vmul.f32 %v5700_v22, %v5700_v22 }
 0x6e4   : > { %v3223_v32 = vpop.f32.mrf.mxu1 }
 0x6e5   : > { %v3224_v52 = vadd.f32 %v5692_v13, %v3223_v32  ;;  %v5704_v19 = vmax.f32 %v3232_v30, 0.0  ;;  %v3321_v36 = vmul.f32 %v5697_v0, %v5697_v0 }
 0x6e6   : > { %v4211_v56 = vpop.f32.mrf.mxu1 }
 0x6e7   : > { %v5702_v9 = vmax.f32 %v3224_v52, 0.0  ;;  %v3245_v60 = vadd.f32 %v4211_v56, %v5692_v13  ;;  %v3324_v53 = vmul.f32 %v5704_v19, %v5704_v19 }
 0x6e8   : > { %v3236_v57 = vpop.f32.mrf.mxu1 }
 0x6e9   : > { %v3299_v48 = vadd.f32 %v5702_v9, %v5697_v0  ;;  %v3322_v6 = vmul.f32 %v5702_v9, %v5702_v9  ;;  %v3237_v2 = vadd.f32 %v5692_v13, %v3236_v57  ;;  %v5724_v50 = vmax.f32 %v3245_v60, 0.0 }
 0x6ea   : > { %v4212_v31 = vpop.f32.mrf.mxu1 }
 0x6eb   : > { %v3300_v3 = vadd.f32 %v3299_v48, %v5700_v22  ;;  %v3337_v28 = vadd.f32 %v3322_v6, %v3321_v36  ;;  %v5717_v26 = vmax.f32 %v3237_v2, 0.0  ;;  %v3248_v46 = vadd.f32 %v4212_v31, %v5692_v13 }
 0x6ec   : > { %v3239_v54 = vpop.f32.mrf.mxu1  ;;  %v3327_v43 = vmul.f32 %v5724_v50, %v5724_v50 }
 0x6ed   : > { %v3338_v15 = vadd.f32 %v3337_v28, %v3323_v34  ;;  %v3301_v20 = vadd.f32 %v3300_v3, %v5704_v19  ;;  %v3240_v41 = vadd.f32 %v5692_v13, %v3239_v54  ;;  %v3325_v21 = vmul.f32 %v5717_v26, %v5717_v26 }
 0x6ee   : > { %v4215_v11 = vpop.f32.mrf.mxu1  ;;  %v5731_v35 = vmax.f32 %v3248_v46, 0.0 }
 0x6ef   : > { %v3302_v63 = vadd.f32 %v3301_v20, %v5717_v26  ;;  %v3339_v5 = vadd.f32 %v3338_v15, %v3324_v53  ;;  %v5729_v39 = vmax.f32 %v3240_v41, 0.0  ;;  %v3261_v8 = vadd.f32 %v4215_v11, %v5692_v13 }
 0x6f0   : > { %v3252_v61 = vpop.f32.mrf.mxu1  ;;  %v3328_v29 = vmul.f32 %v5731_v35, %v5731_v35 }
 0x6f1   : > { %v3340_v4 = vadd.f32 %v3339_v5, %v3325_v21  ;;  %v3303_v17 = vadd.f32 %v3302_v63, %v5729_v39  ;;  %v3326_v38 = vmul.f32 %v5729_v39, %v5729_v39  ;;  %v3253_v44 = vadd.f32 %v5692_v13, %v3252_v61 }
 0x6f2   : > { %v4216_v16 = vpop.f32.mrf.mxu1  ;;  %v5748_v62 = vmax.f32 %v3261_v8, 0.0 }
 0x6f3   : > { %v3304_v59 = vadd.f32 %v3303_v17, %v5724_v50  ;;  %v3341_v24 = vadd.f32 %v3340_v4, %v3326_v38  ;;  %v5741_v12 = vmax.f32 %v3253_v44, 0.0  ;;  %v3264_v27 = vadd.f32 %v4216_v16, %v5692_v13 }
 0x6f4   : > { %v3255_v7 = vpop.f32.mrf.mxu1  ;;  %v3331_v32 = vmul.f32 %v5748_v62, %v5748_v62 }
 0x6f5   : > { %v3342_v45 = vadd.f32 %v3341_v24, %v3327_v43  ;;  %v3305_v10 = vadd.f32 %v3304_v59, %v5731_v35  ;;  %v3256_v51 = vadd.f32 %v5692_v13, %v3255_v7  ;;  %v3329_v25 = vmul.f32 %v5741_v12, %v5741_v12 }
 0x6f6   : > { %v4219_v55 = vpop.f32.mrf.mxu1  ;;  %v5755_v49 = vmax.f32 %v3264_v27, 0.0 }
 0x6f7   : > { %v3306_v58 = vadd.f32 %v3305_v10, %v5741_v12  ;;  %v3343_v40 = vadd.f32 %v3342_v45, %v3328_v29  ;;  %v5753_v33 = vmax.f32 %v3256_v51, 0.0  ;;  %v3277_v36 = vadd.f32 %v4219_v55, %v5692_v13 }
 0x6f8   : > { %v3268_v47 = vpop.f32.mrf.mxu1  ;;  %v3332_v6 = vmul.f32 %v5755_v49, %v5755_v49 }
 0x6f9   : > { %v3344_v23 = vadd.f32 %v3343_v40, %v3329_v25  ;;  %v3307_v1 = vadd.f32 %v3306_v58, %v5753_v33  ;;  %v3330_v37 = vmul.f32 %v5753_v33, %v5753_v33  ;;  %v3269_v14 = vadd.f32 %v5692_v13, %v3268_v47 }
 0x6fa   : > { %v4220_v30 = vpop.f32.mrf.mxu1  ;;  %v5775_v54 = vmax.f32 %v3277_v36, 0.0 }
 0x6fb   : > { %v3308_v52 = vadd.f32 %v3307_v1, %v5748_v62  ;;  %v3345_v56 = vadd.f32 %v3344_v23, %v3330_v37  ;;  %v5764_v57 = vmax.f32 %v3269_v14, 0.0  ;;  %v3280_v31 = vadd.f32 %v4220_v30, %v5692_v13  ;;  %v3362_v23 = vld [vmem:[%s6006_s23] sm:$0x1] }
 0x6fc   : > { %v3271_v48 = vpop.f32.mrf.mxu1  ;;  %v3366_v14 = vld [vmem:[%s6007_s24] sm:$0x1] }
 0x6fd   : > { %v3346_v2 = vadd.f32 %v3345_v56, %v3331_v32  ;;  %v3309_v60 = vadd.f32 %v3308_v52, %v5755_v49  ;;  %v3272_v34 = vadd.f32 %v5692_v13, %v3271_v48  ;;  %v3333_v28 = vmul.f32 %v5764_v57, %v5764_v57 }
 0x6fe   : > { %v5779_v46 = vmax.f32 %v3280_v31, 0.0  ;;  %v3335_v13 = vmul.f32 %v5775_v54, %v5775_v54  ;;  %v5798_v52 = vand.u32 127, %v1840_v42 }
 0x6ff   : > { %v3310_v3 = vadd.f32 %v3309_v60, %v5764_v57  ;;  %v3347_v53 = vadd.f32 %v3346_v2, %v3332_v6  ;;  %v5777_v15 = vmax.f32 %v3272_v34, 0.0 }
 0x700   : > { %v3336_v5 = vmul.f32 %v5779_v46, %v5779_v46  ;;  %vm3415_vm1 = vcmp.lt.s32.totalorder %v5798_v52, 10 }
 0x701   : > { %v3348_v20 = vadd.f32 %v3347_v53, %v3333_v28  ;;  %v3311_v41 = vadd.f32 %v3310_v3, %v5777_v15  ;;  %v3334_v11 = vmul.f32 %v5777_v15, %v5777_v15 }
 0x703   : > { %v3312_v63 = vadd.f32 %v3311_v41, %v5775_v54  ;;  %v3349_v21 = vadd.f32 %v3348_v20, %v3334_v11 }
 0x705   : > { %v3313_v61 = vadd.f32 %v3312_v63, %v5779_v46  ;;  %v3350_v4 = vadd.f32 %v3349_v21, %v3335_v13 }
 0x707   : > { %v3314_v17 = vrot.slane %v3313_v61, 4  ;;  %v3351_v38 = vadd.f32 %v3350_v4, %v3336_v5 }
 0x709   : > { %v3315_v8 = vadd.f32 %v3314_v17, %v3313_v61  ;;  %v3352_v44 = vrot.slane %v3351_v38, 4 }
 0x70b   : > { %v3316_v16 = vrot.slane %v3315_v8, 2  ;;  %v3353_v43 = vadd.f32 %v3352_v44, %v3351_v38 }
 0x70d   : > { %v3317_v59 = vadd.f32 %v3316_v16, %v3315_v8  ;;  %v3354_v24 = vrot.slane %v3353_v43, 2 }
 0x70f   : > { %v3318_v27 = vrot.slane %v3317_v59, 1  ;;  %v3355_v7 = vadd.f32 %v3354_v24, %v3353_v43 }
 0x711   : > { %v3319_v29 = vadd.f32 %v3318_v27, %v3317_v59  ;;  %v3356_v45 = vrot.slane %v3355_v7, 1 }
 0x713   : > { %v3320_v10 = vmul.f32 0.0078125, %v3319_v29  ;;  %v3357_v51 = vadd.f32 %v3356_v45, %v3355_v7 }
 0x715   : > { %v3358_v55 = vmul.f32 0.0078125, %v3357_v51  ;;  %v3359_v58 = vmul.f32 %v3320_v10, %v3320_v10 }
 0x717   : > { %v3360_v25 = vsub.f32 %v3358_v55, %v3359_v58 }
 0x719   : > { %v3361_v40 = vmax.f32 %v3360_v25, 0.0 }
 0x71b   : > { %v3363_v47 = vadd.f32 1e-05, %v3361_v40 }
 0x71d   : > { %4329 = vrsqrt.f32 %v3363_v47 }
 0x72a   : > { %v4330_v1 = vpop.eup %4329 }
 0x72b   : > { %v3365_v37 = vmul.f32 %v4330_v1, %v3362_v23 }
 0x72d   : > { %v3367_v30 = vmul.f32 %v3365_v37, %v3320_v10  ;;  %v3373_v32 = vrot.slane %v3365_v37, %v5095_v18 }
 0x72f   : > { %v3368_v56 = vsub.f32 %v3366_v14, %v3367_v30  ;;  %v3377_v48 = vmul.f32 %v3373_v32, %v5700_v22  ;;  %v3375_v6 = vmul.f32 %v3373_v32, %v5697_v0  ;;  %v3378_v31 = vmul.f32 %v3373_v32, %v5704_v19 }
 0x730   : > { %v3376_v34 = vmul.f32 %v3373_v32, %v5702_v9  ;;  %v3380_v0 = vmul.f32 %v3373_v32, %v5729_v39  ;;  %v3379_v22 = vmul.f32 %v3373_v32, %v5717_v26  ;;  %v3382_v41 = vmul.f32 %v3373_v32, %v5731_v35 }
 0x731   : > { %v3395_v36 = vrot.slane %v3368_v56, %v5095_v18  ;;  %v3381_v11 = vmul.f32 %v3373_v32, %v5724_v50  ;;  %v3384_v21 = vmul.f32 %v3373_v32, %v5753_v33  ;;  %v3383_v5 = vmul.f32 %v3373_v32, %v5741_v12 }
 0x732   : > { %v3386_v17 = vmul.f32 %v3373_v32, %v5755_v49  ;;  %v3385_v38 = vmul.f32 %v3373_v32, %v5748_v62  ;;  %v3388_v16 = vmul.f32 %v3373_v32, %v5777_v15  ;;  %v3387_v43 = vmul.f32 %v3373_v32, %v5764_v57 }
 0x733   : > { %v3399_v2 = vadd.f32 %v3395_v36, %v3377_v48  ;;  %v3397_v60 = vadd.f32 %v3395_v36, %v3375_v6  ;;  %v3400_v18 = vadd.f32 %v3395_v36, %v3378_v31  ;;  %v3398_v28 = vadd.f32 %v3395_v36, %v3376_v34 }
 0x734   : > { %v3402_v53 = vadd.f32 %v3395_v36, %v3380_v0  ;;  %v3401_v20 = vadd.f32 %v3395_v36, %v3379_v22  ;;  %v3404_v13 = vadd.f32 %v3395_v36, %v3382_v41  ;;  %v3403_v63 = vadd.f32 %v3395_v36, %v3381_v11 }
 0x735   : > { %v5808_v3 = vsel %vm3415_vm1, %v3399_v2, -1e+30  ;;  %v3416_v42 = vsel %vm3415_vm1, %v3397_v60, -1e+30  ;;  %v5817_v19 = vsel %vm3415_vm1, %v3400_v18, -1e+30  ;;  %v3406_v61 = vadd.f32 %v3395_v36, %v3384_v21 }
 0x736   : > { %3436 = vmax.xlane.f32.xlu1 %v5808_v3  ;;  %3432 = vmax.xlane.f32.xlu0 %v3416_v42  ;;  %v3417_v9 = vsel %vm3415_vm1, %v3398_v28, -1e+30  ;;  %v5826_v39 = vsel %vm3415_vm1, %v3402_v53, -1e+30  ;;  %v3420_v26 = vsel %vm3415_vm1, %v3401_v20, -1e+30  ;;  %v3405_v4 = vadd.f32 %v3395_v36, %v3383_v5 }
 0x737   : > { %v5835_v35 = vsel %vm3415_vm1, %v3404_v13, -1e+30  ;;  %v3422_v50 = vsel %vm3415_vm1, %v3403_v63, -1e+30  ;;  %v5844_v33 = vsel %vm3415_vm1, %v3406_v61, -1e+30  ;;  %v3408_v8 = vadd.f32 %v3395_v36, %v3386_v17 }
 0x738   : > { %v3424_v12 = vsel %vm3415_vm1, %v3405_v4, -1e+30  ;;  %v3407_v44 = vadd.f32 %v3395_v36, %v3385_v38  ;;  %v3410_v59 = vadd.f32 %v3395_v36, %v3388_v16  ;;  %v3409_v24 = vadd.f32 %v3395_v36, %v3387_v43 }
 0x739   : > { %v5853_v49 = vsel %vm3415_vm1, %v3408_v8, -1e+30  ;;  %v3390_v27 = vmul.f32 %v3373_v32, %v5779_v46  ;;  %v3389_v15 = vmul.f32 %v3373_v32, %v5775_v54 }
 0x73a   : > { %3438 = vmax.xlane.f32.xlu1 %v5817_v19  ;;  %3434 = vmax.xlane.f32.xlu0 %v3417_v9  ;;  %v5857_v62 = vsel %vm3415_vm1, %v3407_v44, -1e+30  ;;  %v5865_v57 = vsel %vm3415_vm1, %v3410_v59, -1e+30  ;;  %v5869_v7 = vsel %vm3415_vm1, %v3409_v24, -1e+30 }
 0x73b   : > { %v3412_v29 = vadd.f32 %v3395_v36, %v3390_v27  ;;  %v3411_v45 = vadd.f32 %v3395_v36, %v3389_v15 }
 0x73d   : > { %v5875_v10 = vsel %vm3415_vm1, %v3412_v29, -1e+30  ;;  %v5879_v54 = vsel %vm3415_vm1, %v3411_v45, -1e+30 }
 0x73e   : > { %3442 = vmax.xlane.f32.xlu1 %v5826_v39  ;;  %3440 = vmax.xlane.f32.xlu0 %v3420_v26 }
 0x742   : > { %3446 = vmax.xlane.f32.xlu1 %v5835_v35  ;;  %3444 = vmax.xlane.f32.xlu0 %v3422_v50 }
 0x746   : > { %3450 = vmax.xlane.f32.xlu1 %v5844_v33  ;;  %3448 = vmax.xlane.f32.xlu0 %v3424_v12 }
 0x74a   : > { %3454 = vmax.xlane.f32.xlu1 %v5853_v49  ;;  %3452 = vmax.xlane.f32.xlu0 %v5857_v62 }
 0x74e   : > { %3458 = vmax.xlane.f32.xlu1 %v5865_v57  ;;  %3456 = vmax.xlane.f32.xlu0 %v5869_v7 }
 0x752   : > { %3462 = vmax.xlane.f32.xlu1 %v5875_v10  ;;  %3460 = vmax.xlane.f32.xlu0 %v5879_v54 }
 0x7bf   : > { %v3437_v46 = vpop.xlane.xlu1 %3436  ;;  %v3433_v51 = vpop.xlane.xlu0 %3432 }
 0x7c0   : > { %v3466_v55 = vsub.f32 %v5808_v3, %v3437_v46  ;;  %v3464_v58 = vsub.f32 %v3416_v42, %v3433_v51 }
 0x7c2   : > { %v3480_v25 = vmul.f32 1.442695, %v3464_v58  ;;  %v3484_v23 = vmul.f32 1.442695, %v3466_v55 }
 0x7c3   : > { %v3439_v40 = vpop.xlane.xlu1 %3438  ;;  %v3435_v47 = vpop.xlane.xlu0 %3434 }
 0x7c4   : > { %v3467_v1 = vsub.f32 %v5817_v19, %v3439_v40  ;;  %v3465_v37 = vsub.f32 %v3417_v9, %v3435_v47  ;;  %4331 = vpow2.f32 %v3480_v25 }
 0x7c5   : > { %4333 = vpow2.f32 %v3484_v23 }
 0x7c6   : > { %v3482_v14 = vmul.f32 1.442695, %v3465_v37  ;;  %v3486_v52 = vmul.f32 1.442695, %v3467_v1 }
 0x7c7   : > { %v3443_v30 = vpop.xlane.xlu1 %3442  ;;  %v3441_v32 = vpop.xlane.xlu0 %3440 }
 0x7c8   : > { %v3469_v56 = vsub.f32 %v5826_v39, %v3443_v30  ;;  %v3468_v36 = vsub.f32 %v3420_v26, %v3441_v32  ;;  %4335 = vpow2.f32 %v3482_v14 }
 0x7c9   : > { %4337 = vpow2.f32 %v3486_v52 }
 0x7ca   : > { %v3488_v48 = vmul.f32 1.442695, %v3468_v36  ;;  %v3490_v60 = vmul.f32 1.442695, %v3469_v56 }
 0x7cb   : > { %v3447_v6 = vpop.xlane.xlu1 %3446  ;;  %v3445_v2 = vpop.xlane.xlu0 %3444 }
 0x7cc   : > { %v3471_v31 = vsub.f32 %v5835_v35, %v3447_v6  ;;  %v3470_v34 = vsub.f32 %v3422_v50, %v3445_v2  ;;  %4339 = vpow2.f32 %v3488_v48 }
 0x7cd   : > { %4341 = vpow2.f32 %v3490_v60 }
 0x7ce   : > { %v3492_v3 = vmul.f32 1.442695, %v3470_v34  ;;  %v3494_v28 = vmul.f32 1.442695, %v3471_v31 }
 0x7cf   : > { %v3451_v42 = vpop.xlane.xlu1 %3450  ;;  %v3449_v18 = vpop.xlane.xlu0 %3448 }
 0x7d0   : > { %v3473_v0 = vsub.f32 %v5844_v33, %v3451_v42  ;;  %v3472_v22 = vsub.f32 %v3424_v12, %v3449_v18  ;;  %4343 = vpow2.f32 %v3492_v3 }
 0x7d1   : > { %v5888_v19 = vpop.eup %4331  ;;  %4345 = vpow2.f32 %v3494_v28 }
 0x7d2   : > { %v3496_v9 = vmul.f32 1.442695, %v3472_v22  ;;  %3512 = vadd.xlane.f32.xlu0 %v5888_v19  ;;  %v3498_v41 = vmul.f32 1.442695, %v3473_v0  ;;  %v5893_v26 = vpop.eup %4333 }
 0x7d3   : > { %v3455_v53 = vpop.xlane.xlu1 %3454  ;;  %v3453_v20 = vpop.xlane.xlu0 %3452 }
 0x7d4   : > { %v3475_v11 = vsub.f32 %v5853_v49, %v3455_v53  ;;  %v3474_v39 = vsub.f32 %v5857_v62, %v3453_v20  ;;  %4347 = vpow2.f32 %v3496_v9 }
 0x7d5   : > { %v5895_v13 = vpop.eup %4335  ;;  %4349 = vpow2.f32 %v3498_v41 }
 0x7d6   : > { %v3500_v63 = vmul.f32 1.442695, %v3474_v39  ;;  %3516 = vadd.xlane.f32.xlu0 %v5893_v26  ;;  %3514 = vadd.xlane.f32.xlu1 %v5895_v13  ;;  %v3502_v35 = vmul.f32 1.442695, %v3475_v11  ;;  %v5901_v4 = vpop.eup %4337 }
 0x7d7   : > { %v3459_v21 = vpop.xlane.xlu1 %3458  ;;  %v3457_v5 = vpop.xlane.xlu0 %3456 }
 0x7d8   : > { %v3477_v50 = vsub.f32 %v5865_v57, %v3459_v21  ;;  %v3476_v61 = vsub.f32 %v5869_v7, %v3457_v5  ;;  %4351 = vpow2.f32 %v3500_v63 }
 0x7d9   : > { %v5903_v17 = vpop.eup %4339  ;;  %4353 = vpow2.f32 %v3502_v35 }
 0x7da   : > { %v3504_v38 = vmul.f32 1.442695, %v3476_v61  ;;  %3518 = vadd.xlane.f32.xlu1 %v5901_v4  ;;  %3520 = vadd.xlane.f32.xlu0 %v5903_v17  ;;  %v3506_v8 = vmul.f32 1.442695, %v3477_v50  ;;  %v5908_v16 = vpop.eup %4341 }
 0x7db   : > { %v3463_v33 = vpop.xlane.xlu1 %3462  ;;  %v3461_v12 = vpop.xlane.xlu0 %3460 }
 0x7dc   : > { %v3478_v44 = vsub.f32 %v5879_v54, %v3461_v12  ;;  %4355 = vpow2.f32 %v3504_v38  ;;  %v3479_v43 = vsub.f32 %v5875_v10, %v3463_v33 }
 0x7dd   : > { %v5911_v49 = vpop.eup %4343  ;;  %4357 = vpow2.f32 %v3506_v8 }
 0x7de   : > { %v3508_v62 = vmul.f32 1.442695, %v3478_v44  ;;  %3522 = vadd.xlane.f32.xlu1 %v5908_v16  ;;  %3524 = vadd.xlane.f32.xlu0 %v5911_v49  ;;  %v5915_v59 = vpop.eup %4345  ;;  %v3510_v24 = vmul.f32 1.442695, %v3479_v43 }
 0x7e0   : > { %4359 = vpow2.f32 %v3508_v62 }
 0x7e1   : > { %v5917_v27 = vpop.eup %4347  ;;  %4361 = vpow2.f32 %v3510_v24 }
 0x7e2   : > { %3526 = vadd.xlane.f32.xlu1 %v5915_v59  ;;  %3528 = vadd.xlane.f32.xlu0 %v5917_v27  ;;  %v5921_v15 = vpop.eup %4349 }
 0x7e5   : > { %v5923_v57 = vpop.eup %4351 }
 0x7e6   : > { %3530 = vadd.xlane.f32.xlu1 %v5921_v15  ;;  %3532 = vadd.xlane.f32.xlu0 %v5923_v57  ;;  %v5927_v7 = vpop.eup %4353 }
 0x7e9   : > { %v5929_v29 = vpop.eup %4355 }
 0x7ea   : > { %3534 = vadd.xlane.f32.xlu1 %v5927_v7  ;;  %3536 = vadd.xlane.f32.xlu0 %v5929_v29  ;;  %v5933_v45 = vpop.eup %4357 }
 0x7ed   : > { %v5935_v10 = vpop.eup %4359 }
 0x7ee   : > { %3538 = vadd.xlane.f32.xlu1 %v5933_v45  ;;  %3540 = vadd.xlane.f32.xlu0 %v5935_v10  ;;  %v5939_v54 = vpop.eup %4361 }
 0x7f2   : > { %3542 = vadd.xlane.f32.xlu1 %v5939_v54 }
 0x85b   : > { %v3513_v46 = vpop.xlane.xlu0 %3512 }
 0x85c   : > { %4363 = vrcp.f32 %v3513_v46 }
 0x85f   : > { %v3515_v51 = vpop.xlane.xlu1 %3514  ;;  %v3517_v55 = vpop.xlane.xlu0 %3516 }
 0x860   : > { %4365 = vrcp.f32 %v3515_v51 }
 0x861   : > { %4367 = vrcp.f32 %v3517_v55 }
 0x863   : > { %v3519_v58 = vpop.xlane.xlu1 %3518  ;;  %v3521_v25 = vpop.xlane.xlu0 %3520 }
 0x864   : > { %4369 = vrcp.f32 %v3519_v58 }
 0x865   : > { %4371 = vrcp.f32 %v3521_v25 }
 0x867   : > { %v3523_v40 = vpop.xlane.xlu1 %3522  ;;  %v3525_v47 = vpop.xlane.xlu0 %3524 }
 0x868   : > { %4373 = vrcp.f32 %v3523_v40 }
 0x869   : > { %v4364_v23 = vpop.eup %4363  ;;  %4375 = vrcp.f32 %v3525_v47 }
 0x86a   : > { %v3545_v1 = vmul.f32 %v4364_v23, %v5888_v19 }
 0x86b   : > { %v3527_v37 = vpop.xlane.xlu1 %3526  ;;  %v3529_v14 = vpop.xlane.xlu0 %3528 }
 0x86c   : > { %3576 = vst [vmem:[%s5946_s26] sm:$0xff] %v3545_v1  ;;  %4377 = vrcp.f32 %v3527_v37 }
 0x86d   : > { %v4366_v30 = vpop.eup %4365  ;;  %4379 = vrcp.f32 %v3529_v14 }
 0x86e   : > { %v4368_v32 = vpop.eup %4367  ;;  %v3547_v52 = vmul.f32 %v4366_v30, %v5895_v13 }
 0x86f   : > { %v3549_v56 = vmul.f32 %v4368_v32, %v5893_v26  ;;  %v3531_v36 = vpop.xlane.xlu1 %3530  ;;  %v3533_v48 = vpop.xlane.xlu0 %3532 }
 0x870   : > { %3577 = vst [vmem:[%s5946_s26 + $0x8] sm:$0xff] %v3547_v52  ;;  %4381 = vrcp.f32 %v3531_v36 }
 0x871   : > { %v4370_v6 = vpop.eup %4369  ;;  %3578 = vst [vmem:[%s5946_s26 + $0x10] sm:$0xff] %v3549_v56  ;;  %4383 = vrcp.f32 %v3533_v48 }
 0x872   : > { %v4372_v2 = vpop.eup %4371  ;;  %v3551_v60 = vmul.f32 %v4370_v6, %v5901_v4 }
 0x873   : > { %v3553_v31 = vmul.f32 %v4372_v2, %v5903_v17  ;;  %v3535_v34 = vpop.xlane.xlu1 %3534  ;;  %v3537_v3 = vpop.xlane.xlu0 %3536 }
 0x874   : > { %3579 = vst [vmem:[%s5946_s26 + $0x18] sm:$0xff] %v3551_v60  ;;  %4385 = vrcp.f32 %v3535_v34 }
 0x875   : > { %v4374_v42 = vpop.eup %4373  ;;  %3580 = vst [vmem:[%s5946_s26 + $0x20] sm:$0xff] %v3553_v31  ;;  %4387 = vrcp.f32 %v3537_v3 }
 0x876   : > { %v4376_v18 = vpop.eup %4375  ;;  %v3555_v28 = vmul.f32 %v4374_v42, %v5908_v16 }
 0x877   : > { %v3557_v0 = vmul.f32 %v4376_v18, %v5911_v49  ;;  %v3539_v22 = vpop.xlane.xlu1 %3538  ;;  %v3541_v19 = vpop.xlane.xlu0 %3540 }
 0x878   : > { %3581 = vst [vmem:[%s5946_s26 + $0x28] sm:$0xff] %v3555_v28  ;;  %4389 = vrcp.f32 %v3539_v22 }
 0x879   : > { %v4378_v9 = vpop.eup %4377  ;;  %3582 = vst [vmem:[%s5946_s26 + $0x30] sm:$0xff] %v3557_v0  ;;  %4391 = vrcp.f32 %v3541_v19 }
 0x87a   : > { %v4380_v53 = vpop.eup %4379  ;;  %v3559_v20 = vmul.f32 %v4378_v9, %v5915_v59 }
 0x87b   : > { %v3561_v41 = vmul.f32 %v4380_v53, %v5917_v27  ;;  %v3543_v11 = vpop.xlane.xlu1 %3542 }
 0x87c   : > { %3583 = vst [vmem:[%s5946_s26 + $0x38] sm:$0xff] %v3559_v20  ;;  %4393 = vrcp.f32 %v3543_v11 }
 0x87d   : > { %v4382_v39 = vpop.eup %4381  ;;  %3584 = vst [vmem:[%s5946_s26 + $0x40] sm:$0xff] %v3561_v41 }
 0x87e   : > { %v4384_v26 = vpop.eup %4383  ;;  %v3563_v13 = vmul.f32 %v4382_v39, %v5921_v15 }
 0x87f   : > { %v3565_v63 = vmul.f32 %v4384_v26, %v5923_v57 }
 0x880   : > { %3585 = vst [vmem:[%s5946_s26 + $0x48] sm:$0xff] %v3563_v13 }
 0x881   : > { %v4386_v21 = vpop.eup %4385  ;;  %3586 = vst [vmem:[%s5946_s26 + $0x50] sm:$0xff] %v3565_v63 }
 0x882   : > { %v4388_v5 = vpop.eup %4387  ;;  %v3567_v35 = vmul.f32 %v4386_v21, %v5927_v7 }
 0x883   : > { %v3569_v50 = vmul.f32 %v4388_v5, %v5929_v29 }
 0x884   : > { %3587 = vst [vmem:[%s5946_s26 + $0x58] sm:$0xff] %v3567_v35 }
 0x885   : > { %v4390_v61 = vpop.eup %4389  ;;  %3588 = vst [vmem:[%s5946_s26 + $0x60] sm:$0xff] %v3569_v50 }
 0x886   : > { %v4392_v4 = vpop.eup %4391  ;;  %v3571_v17 = vmul.f32 %v4390_v61, %v5933_v45 }
 0x887   : > { %v3573_v38 = vmul.f32 %v4392_v4, %v5935_v10 }
 0x888   : > { %3589 = vst [vmem:[%s5946_s26 + $0x68] sm:$0xff] %v3571_v17 }
 0x889   : > { %v4394_v33 = vpop.eup %4393  ;;  %3590 = vst [vmem:[%s5946_s26 + $0x70] sm:$0xff] %v3573_v38 }
 0x88a   : > { %v3575_v12 = vmul.f32 %v4394_v33, %v5939_v54 }
 0x88c   : > { %3591 = vst [vmem:[%s5946_s26 + $0x78] sm:$0xff] %v3575_v12 }
 0x88d PF: > { %s35_s29 = sadd.s32 1, %s4401_s29  }
 0x88e   : > { %p32_p4 = scmp.ge.s32.totalorder %s35_s29, 4  }
 0x890   :  { %34 = sbr.rel (!%p32_p4) target bundleno = 11 (0xb), region = 150 }

</bundles_post_ra>
